<compile_context>
chip_gen: v6e
topology: v6e:2x2x1
jax: 0.10.0
libtpu: 0.0.40
codegen_flags: <defaults>
</compile_context>

<pallas_src>
import numpy as np
import jax
import jax.numpy as jnp
from jax import lax
from jax.experimental import pallas as pl
from jax.experimental.pallas import tpu as pltpu

_EPS = 1e-5
_LANES = 128


# ----------------------------------------------------------------------------- #
# Small helpers
# ----------------------------------------------------------------------------- #
def _round_up(x, m):
    return ((x + m - 1) // m) * m


def _win(start, size, stride):
    return pl.ds(start, size) if stride == 1 else pl.ds(start, size, stride)


def _fold_bn(tot, g, b, inv_m, eps=_EPS):
    """tot: (2, C) = [sum, sum_sq] over the batch; g, b: (1, C).
    Fold batch-stats BN (biased var, single pass) into per-channel scale/shift."""
    mean = tot[0:1, :] * inv_m
    var = jnp.maximum(tot[1:2, :] * inv_m - mean * mean, 0.0)
    scale = g * lax.rsqrt(var + eps)
    shift = b - mean * scale
    return scale, shift


def _bn_scale_shift(st_ref, g_ref, b_ref, inv_m):
    """Reduce (N, 2, C) per-image partials and fold into scale/shift."""
    return _fold_bn(jnp.sum(st_ref[...], axis=0), g_ref[...], b_ref[...], inv_m)


def _stats(y2d):
    """Per-channel [sum, sum_sq] of a (M, C) f32 block -> (2, C)."""
    return jnp.concatenate(
        [jnp.sum(y2d, axis=0, keepdims=True),
         jnp.sum(y2d * y2d, axis=0, keepdims=True)], axis=0)


def _compiler_params(semantics, est_bytes):
    # Right-size the VMEM request from the actual footprint; never ask for the
    # whole physical VMEM (64 MiB on a v7x TensorCore).
    limit = int(min(max(4 * est_bytes, 16 << 20), 48 << 20))
    return pltpu.CompilerParams(dimension_semantics=semantics,
                                vmem_limit_bytes=limit)


# ----------------------------------------------------------------------------- #
# Kernels
# ----------------------------------------------------------------------------- #
def _make_stage_a_kernel(stride, has_proj):
    """conv1 (3x3, stride) of one padded NHWC image as a single im2col matmul,
    BN1 partial stats, and (optionally) the fused 1x1 projection shortcut."""

    def conv1_core(xp_ref, w1_ref, y1_ref, st1_ref):
        _, Ho, Wo, cp = y1_ref.shape
        cin_p = xp_ref.shape[-1]
        taps = [xp_ref[0, _win(dy, Ho, stride), _win(dx, Wo, stride), :]
                .reshape(Ho * Wo, cin_p)
                for dy in range(3) for dx in range(3)]
        cols = jnp.concatenate(taps, axis=1)          # (Ho*Wo, 9*cin_p) bf16, VMEM only
        y1 = jnp.dot(cols, w1_ref[...], preferred_element_type=jnp.float32)
        st1_ref[0] = _stats(y1)                       # stats from f32 accumulator
        y1_ref[...] = y1.reshape(y1_ref.shape).astype(y1_ref.dtype)
        return taps[4]                                # centre tap == stride-s input window

    if not has_proj:
        def kernel(xp_ref, w1_ref, y1_ref, st1_ref):
            conv1_core(xp_ref, w1_ref, y1_ref, st1_ref)
        return kernel

    def kernel(xp_ref, w1_ref, ws_ref, y1_ref, st1_ref, sc_ref, sts_ref):
        centre = conv1_core(xp_ref, w1_ref, y1_ref, st1_ref)
        sc = jnp.dot(centre, ws_ref[...], preferred_element_type=jnp.float32)
        sts_ref[0] = _stats(sc)
        sc_ref[0] = sc.astype(sc_ref.dtype)
    return kernel


def _make_stage_b_kernel(has_proj, want_pre, inv_m):
    """Fused bn1+ReLU -> conv2 (single im2col matmul) -> bn2 [+ bn_short]
    + residual add + ReLU.  Raw conv2 outputs and conv2 batch stats stay
    VMEM-resident across the image grid; finalize runs at the last grid step."""
    n_extra = 4 if has_proj else 1
    n_out = 2 if want_pre else 1

    def kernel(*refs):
        y1_ref, st1_ref, g1_ref, b1_ref, w2_ref, g2_ref, b2_ref = refs[:7]
        extra = refs[7:7 + n_extra]
        outs = refs[7 + n_extra:7 + n_extra + n_out]
        a_pad, st2_acc = refs[7 + n_extra + n_out:]
        out_ref = outs[0]

        n = pl.program_id(0)
        _, Ho, Wo, cp = y1_ref.shape

        @pl.when(n == 0)
        def _init():
            a_pad[...] = jnp.zeros_like(a_pad)        # zero halo once; interior rewritten
            st2_acc[...] = jnp.zeros_like(st2_acc)

        # bn1 fold + ReLU applied ONCE (f32 math, v5e-safe), one bf16 cast.
        s1, h1 = _bn_scale_shift(st1_ref, g1_ref, b1_ref, inv_m)
        a = jnp.maximum(y1_ref[0].astype(jnp.float32) * s1.reshape(1, 1, cp)
                        + h1.reshape(1, 1, cp), 0.0)
        a_pad[pl.ds(1, Ho), pl.ds(1, Wo), :] = a.astype(a_pad.dtype)

        # conv2: one K = 9*cp matmul over plain slices of the zero-haloed scratch.
        cols = jnp.concatenate(
            [a_pad[pl.ds(dy, Ho), pl.ds(dx, Wo), :].reshape(Ho * Wo, cp)
             for dy in range(3) for dx in range(3)], axis=1)
        y2 = jnp.dot(cols, w2_ref[...], preferred_element_type=jnp.float32)

        st2_acc[...] += _stats(y2)
        out_ref[n] = y2                               # raw conv2, resident across grid

        @pl.when(n == pl.num_programs(0) - 1)
        def _finalize():
            s2, h2 = _fold_bn(st2_acc[...], g2_ref[...], b2_ref[...], inv_m)
            if has_proj:
                sc_ref, sts_ref, gs_ref, bs_ref = extra
                ss, hs = _bn_scale_shift(sts_ref, gs_ref, bs_ref, inv_m)
                res = (sc_ref[...].astype(jnp.float32) * ss.reshape(1, 1, cp)
                       + hs.reshape(1, 1, cp))
            else:
                (xp_ref,) = extra                     # padded bf16 input reused as residual
                res = xp_ref[:, pl.ds(1, Ho), pl.ds(1, Wo), :].astype(jnp.float32)
                res = res.reshape(out_ref.shape)
            pre = out_ref[...] * s2.reshape(1, 1, cp) + h2.reshape(1, 1, cp) + res
            out_ref[...] = jnp.maximum(pre, 0.0)
            if want_pre:
                outs[1][...] = pre

    return kernel


# ----------------------------------------------------------------------------- #
# Module wrapper
# ----------------------------------------------------------------------------- #
class BasicBlockSTLPallas:
    expansion = 1

    def __init__(self, key, in_planes, planes, stride=1, is_last=False):
        self.in_planes, self.planes = in_planes, planes
        self.stride, self.is_last = stride, is_last
        self.has_proj = (stride != 1) or (in_planes != self.expansion * planes)
        ks = jax.random.split(key, 9)
        f32 = jnp.float32
        # conv weights stored OIHW, like PyTorch
        self.w1 = 0.1 * jax.random.normal(ks[0], (planes, in_planes, 3, 3), f32)
        self.g1 = 1.0 + 0.1 * jax.random.normal(ks[1], (planes,), f32)
        self.b1 = 0.05 * jax.random.normal(ks[2], (planes,), f32)
        self.w2 = 0.1 * jax.random.normal(ks[3], (planes, planes, 3, 3), f32)
        self.g2 = 1.0 + 0.1 * jax.random.normal(ks[4], (planes,), f32)
        self.b2 = 0.05 * jax.random.normal(ks[5], (planes,), f32)
        if self.has_proj:
            self.ws = 0.1 * jax.random.normal(ks[6], (planes, in_planes, 1, 1), f32)
            self.gs = 1.0 + 0.1 * jax.random.normal(ks[7], (planes,), f32)
            self.bs = 0.05 * jax.random.normal(ks[8], (planes,), f32)

    # ---- parameter repacking (layout glue only) ----
    @staticmethod
    def _w3x3_im2col(w_oihw, cin_p, cout_p):
        # (Cout, Cin, 3, 3) -> (9*Cin_p, Cout_p) bf16; row index = (kh*3+kw)*Cin_p + ci
        cout, cin = w_oihw.shape[0], w_oihw.shape[1]
        w = jnp.transpose(w_oihw, (2, 3, 1, 0))                  # (3,3,Cin,Cout)
        w = jnp.pad(w, ((0, 0), (0, 0), (0, cin_p - cin), (0, cout_p - cout)))
        return w.reshape(9 * cin_p, cout_p).astype(jnp.bfloat16)

    @staticmethod
    def _w1x1(w, cin_p, cout_p):
        cout, cin = w.shape[0], w.shape[1]
        wm = jnp.transpose(w[:, :, 0, 0])                        # (Cin, Cout)
        wm = jnp.pad(wm, ((0, cin_p - cin), (0, cout_p - cout)))
        return wm.astype(jnp.bfloat16)

    @staticmethod
    def _cvec(v, cp):
        return jnp.pad(v, (0, cp - v.shape[0])).reshape(1, cp).astype(jnp.float32)

    def __call__(self, x_nchw):
        N, Cin, H, W = x_nchw.shape
        s, planes = self.stride, self.planes
        cin_p = _round_up(Cin, _LANES)
        cp = _round_up(planes, _LANES)
        Ho = (H + 2 - 3) // s + 1
        Wo = (W + 2 - 3) // s + 1
        M = N * Ho * Wo
        inv_m = 1.0 / float(M)
        f32, bf16 = jnp.float32, jnp.bfloat16

        # One fused layout pass: NCHW -> NHWC bf16, pad H/W by 1 and channels to a
        # lane multiple.  (Between chained blocks one would keep padded NHWC and
        # skip this and the epilogue transpose entirely.)
        xp = jnp.pad(jnp.transpose(x_nchw, (0, 2, 3, 1)).astype(bf16),
                     ((0, 0), (1, 1), (1, 1), (0, cin_p - Cin)))

        w1c = self._w3x3_im2col(self.w1, cin_p, cp)
        w2c = self._w3x3_im2col(self.w2, cp, cp)
        g1, b1 = self._cvec(self.g1, cp), self._cvec(self.b1, cp)
        g2, b2 = self._cvec(self.g2, cp), self._cvec(self.b2, cp)

        # ------------- stage A: conv1 (+ 1x1 proj) + BN partial stats ---------- #
        in_specs_a = [
            pl.BlockSpec((1, H + 2, W + 2, cin_p), lambda n: (n, 0, 0, 0)),
            pl.BlockSpec((9 * cin_p, cp), lambda n: (0, 0)),           # resident
        ]
        out_specs_a = [
            pl.BlockSpec((1, Ho, Wo, cp), lambda n: (n, 0, 0, 0)),
            pl.BlockSpec((1, 2, cp), lambda n: (n, 0, 0)),
        ]
        out_shape_a = [
            jax.ShapeDtypeStruct((N, Ho, Wo, cp), bf16),
            jax.ShapeDtypeStruct((N, 2, cp), f32),
        ]
        args_a = [xp, w1c]
        if self.has_proj:
            wsm = self._w1x1(self.ws, cin_p, cp)
            in_specs_a.append(pl.BlockSpec((cin_p, cp), lambda n: (0, 0)))
            out_specs_a += [
                pl.BlockSpec((1, Ho * Wo, cp), lambda n: (n, 0, 0)),
                pl.BlockSpec((1, 2, cp), lambda n: (n, 0, 0)),
            ]
            out_shape_a += [
                jax.ShapeDtypeStruct((N, Ho * Wo, cp), bf16),
                jax.ShapeDtypeStruct((N, 2, cp), f32),
            ]
            args_a.append(wsm)

        est_a = ((H + 2) * (W + 2) * cin_p * 2 + 9 * cin_p * cp * 2
                 + Ho * Wo * (9 * cin_p + cp) * 2 + Ho * Wo * cp * 4)
        if self.has_proj:
            est_a += cin_p * cp * 2 + Ho * Wo * cp * 6

        res_a = pl.pallas_call(
            _make_stage_a_kernel(s, self.has_proj),
            grid=(N,),
            in_specs=in_specs_a,
            out_specs=tuple(out_specs_a),
            out_shape=tuple(out_shape_a),
            compiler_params=_compiler_params(("parallel",), est_a),
        )(*args_a)
        if self.has_proj:
            y1, st1, sc, sts = res_a
        else:
            y1, st1 = res_a

        # -- stage B: bn1+relu -> conv2 -> fused bn2 (+ bn_short) + add + relu -- #
        kernel_b = _make_stage_b_kernel(self.has_proj, self.is_last, inv_m)
        in_specs_b = [
            pl.BlockSpec((1, Ho, Wo, cp), lambda n: (n, 0, 0, 0)),     # y1
            pl.BlockSpec((N, 2, cp), lambda n: (0, 0, 0)),             # st1 (resident)
            pl.BlockSpec((1, cp), lambda n: (0, 0)),                   # g1
            pl.BlockSpec((1, cp), lambda n: (0, 0)),                   # b1
            pl.BlockSpec((9 * cp, cp), lambda n: (0, 0)),              # w2 (resident)
            pl.BlockSpec((1, cp), lambda n: (0, 0)),                   # g2
            pl.BlockSpec((1, cp), lambda n: (0, 0)),                   # b2
        ]
        args_b = [y1, st1, g1, b1, w2c, g2, b2]
        if self.has_proj:
            gs, bs = self._cvec(self.gs, cp), self._cvec(self.bs, cp)
            in_specs_b += [
                pl.BlockSpec((N, Ho * Wo, cp), lambda n: (0, 0, 0)),   # sc (resident)
                pl.BlockSpec((N, 2, cp), lambda n: (0, 0, 0)),         # sts (resident)
                pl.BlockSpec((1, cp), lambda n: (0, 0)),
                pl.BlockSpec((1, cp), lambda n: (0, 0)),
            ]
            args_b += [sc, sts, gs, bs]
        else:
            # identity residual: reuse the padded bf16 input; its interior is
            # sliced at finalize, so no extra residual tensor hits HBM.
            in_specs_b.append(
                pl.BlockSpec((N, H + 2, W + 2, cin_p), lambda n: (0, 0, 0, 0)))
            args_b.append(xp)

        out_spec_full = pl.BlockSpec((N, Ho * Wo, cp), lambda n: (0, 0, 0))
        if self.is_last:
            out_specs_b = (out_spec_full, out_spec_full)
            out_shape_b = (jax.ShapeDtypeStruct((N, Ho * Wo, cp), f32),
                           jax.ShapeDtypeStruct((N, Ho * Wo, cp), f32))
        else:
            out_specs_b = out_spec_full
            out_shape_b = jax.ShapeDtypeStruct((N, Ho * Wo, cp), f32)

        est_b = (Ho * Wo * cp * 2 + 9 * cp * cp * 2 + N * 2 * cp * 4
                 + (Ho + 2) * (Wo + 2) * cp * 2 + Ho * Wo * 9 * cp * 2
                 + Ho * Wo * cp * 4
                 + N * Ho * Wo * cp * 4 * (4 if self.is_last else 3))
        if self.has_proj:
            est_b += N * Ho * Wo * cp * 2 + N * 2 * cp * 4
        else:
            est_b += N * (H + 2) * (W + 2) * cin_p * 2

        res_b = pl.pallas_call(
            kernel_b,
            grid=(N,),
            in_specs=in_specs_b,
            out_specs=out_specs_b,
            out_shape=out_shape_b,
            scratch_shapes=[pltpu.VMEM((Ho + 2, Wo + 2, cp), bf16),   # bn1+relu, haloed
                            pltpu.VMEM((2, cp), f32)],                # conv2 stat accum
            compiler_params=_compiler_params(("arbitrary",), est_b),
        )(*args_b)

        def to_nchw(flat):
            return jnp.transpose(flat.reshape(N, Ho, Wo, cp)[..., :planes],
                                 (0, 3, 1, 2))

        if self.is_last:
            out_m, pre_m = res_b
            return to_nchw(out_m), to_nchw(pre_m)
        return to_nchw(res_b)

    # Pure-JAX reference (same math, XLA conv, all f32) for correctness checking.
    def reference(self, x_nchw):
        x = jnp.transpose(x_nchw, (0, 2, 3, 1)).astype(jnp.float32)

        def conv(inp, w_oihw, stride, pad):
            w = jnp.transpose(w_oihw, (2, 3, 1, 0))  # HWIO
            return jax.lax.conv_general_dilated(
                inp, w, (stride, stride), [(pad, pad), (pad, pad)],
                dimension_numbers=("NHWC", "HWIO", "NHWC"))

        def bn(inp, g, b):
            m = jnp.mean(inp, axis=(0, 1, 2), keepdims=True)
            v = jnp.mean((inp - m) ** 2, axis=(0, 1, 2), keepdims=True)
            return (inp - m) * jax.lax.rsqrt(v + _EPS) * g + b

        out = jax.nn.relu(bn(conv(x, self.w1, self.stride, 1), self.g1, self.b1))
        out = bn(conv(out, self.w2, 1, 1), self.g2, self.b2)
        short = bn(conv(x, self.ws, self.stride, 0), self.gs, self.bs) if self.has_proj else x
        pre = out + short
        out = jax.nn.relu(pre)
        out = jnp.transpose(out, (0, 3, 1, 2))
        pre = jnp.transpose(pre, (0, 3, 1, 2))
        return (out, pre) if self.is_last else out


# ----------------------------------------------------------------------------- #
if __name__ == "__main__":
    key = jax.random.PRNGKey(0)
    kx1, kx2, kp1, kp2 = jax.random.split(key, 4)

    # Tolerances account for bf16 MXU inputs / bf16 inter-stage storage
    # (f32 accumulation and f32 BN math inside the kernels).
    RTOL = ATOL = 3e-2

    # Case 1: projection shortcut (in_planes != planes), is_last=True -> (out, preact)
    x1 = jax.random.normal(kx1, (2, 4, 16, 16), jnp.float32)
    blk1 = BasicBlockSTLPallas(kp1, in_planes=4, planes=8, stride=1, is_last=True)
    out1, pre1 = blk1(x1)
    jax.block_until_ready((out1, pre1))
    r_out1, r_pre1 = blk1.reference(x1)
    np.testing.assert_allclose(np.asarray(out1), np.asarray(r_out1), rtol=RTOL, atol=ATOL)
    np.testing.assert_allclose(np.asarray(pre1), np.asarray(r_pre1), rtol=RTOL, atol=ATOL)

    # Case 2: identity shortcut, is_last=False -> out only
    x2 = jax.random.normal(kx2, (2, 8, 16, 16), jnp.float32)
    blk2 = BasicBlockSTLPallas(kp2, in_planes=8, planes=8, stride=1, is_last=False)
    out2 = blk2(x2)
    jax.block_until_ready(out2)
    r_out2 = blk2.reference(x2)
    np.testing.assert_allclose(np.asarray(out2), np.asarray(r_out2), rtol=RTOL, atol=ATOL)

    print("KERNEL_OK")
</pallas_src>

<mosaic_0001>
module attributes {stable_mosaic.version = 11 : i64} {
  func.func @kernel(%arg0: i32, %arg1: memref<1x18x18x128xbf16, #tpu.memory_space<vmem>>, %arg2: memref<1152x128xbf16, #tpu.memory_space<vmem>>, %arg3: memref<128x128xbf16, #tpu.memory_space<vmem>>, %arg4: memref<1x16x16x128xbf16, #tpu.memory_space<vmem>>, %arg5: memref<1x2x128xf32, #tpu.memory_space<vmem>>, %arg6: memref<1x256x128xbf16, #tpu.memory_space<vmem>>, %arg7: memref<1x2x128xf32, #tpu.memory_space<vmem>>) attributes {dimension_semantics = [#tpu.dimension_semantics<parallel>], iteration_bounds = array<i64: 2>, scalar_prefetch = 0 : i64, scratch_operands = 0 : i64, tpu.core_type = #tpu.core_type<tc>, window_params = [{transform_indices = @transform_0, window_bounds = array<i64: 1, 18, 18, 128>}, {pipeline_mode = #tpu.pipeline_mode<synchronous>, transform_indices = @transform_1, window_bounds = array<i64: 1152, 128>}, {pipeline_mode = #tpu.pipeline_mode<synchronous>, transform_indices = @transform_2, window_bounds = array<i64: 128, 128>}, {transform_indices = @transform_3, window_bounds = array<i64: 1, 16, 16, 128>}, {transform_indices = @transform_4, window_bounds = array<i64: 1, 2, 128>}, {transform_indices = @transform_5, window_bounds = array<i64: 1, 256, 128>}, {transform_indices = @transform_6, window_bounds = array<i64: 1, 2, 128>}]} {
    %c0 = arith.constant 0 : index
    %c0_0 = arith.constant 0 : index
    %c0_1 = arith.constant 0 : index
    %c0_2 = arith.constant 0 : index
    %0 = vector.load %arg1[%c0, %c0_0, %c0_1, %c0_2] : memref<1x18x18x128xbf16, #tpu.memory_space<vmem>>, vector<1x16x16x128xbf16>
    %1 = vector.shape_cast %0 : vector<1x16x16x128xbf16> to vector<16x16x128xbf16>
    %2 = vector.shape_cast %1 : vector<16x16x128xbf16> to vector<256x128xbf16>
    %c0_3 = arith.constant 0 : index
    %c0_4 = arith.constant 0 : index
    %c1 = arith.constant 1 : index
    %c0_5 = arith.constant 0 : index
    %3 = vector.load %arg1[%c0_3, %c0_4, %c1, %c0_5] : memref<1x18x18x128xbf16, #tpu.memory_space<vmem>>, vector<1x16x16x128xbf16>
    %4 = vector.shape_cast %3 : vector<1x16x16x128xbf16> to vector<16x16x128xbf16>
    %5 = vector.shape_cast %4 : vector<16x16x128xbf16> to vector<256x128xbf16>
    %c0_6 = arith.constant 0 : index
    %c0_7 = arith.constant 0 : index
    %c2 = arith.constant 2 : index
    %c0_8 = arith.constant 0 : index
    %6 = vector.load %arg1[%c0_6, %c0_7, %c2, %c0_8] : memref<1x18x18x128xbf16, #tpu.memory_space<vmem>>, vector<1x16x16x128xbf16>
    %7 = vector.shape_cast %6 : vector<1x16x16x128xbf16> to vector<16x16x128xbf16>
    %8 = vector.shape_cast %7 : vector<16x16x128xbf16> to vector<256x128xbf16>
    %c0_9 = arith.constant 0 : index
    %c1_10 = arith.constant 1 : index
    %c0_11 = arith.constant 0 : index
    %c0_12 = arith.constant 0 : index
    %9 = vector.load %arg1[%c0_9, %c1_10, %c0_11, %c0_12] : memref<1x18x18x128xbf16, #tpu.memory_space<vmem>>, vector<1x16x16x128xbf16>
    %10 = vector.shape_cast %9 : vector<1x16x16x128xbf16> to vector<16x16x128xbf16>
    %11 = vector.shape_cast %10 : vector<16x16x128xbf16> to vector<256x128xbf16>
    %c0_13 = arith.constant 0 : index
    %c1_14 = arith.constant 1 : index
    %c1_15 = arith.constant 1 : index
    %c0_16 = arith.constant 0 : index
    %12 = vector.load %arg1[%c0_13, %c1_14, %c1_15, %c0_16] : memref<1x18x18x128xbf16, #tpu.memory_space<vmem>>, vector<1x16x16x128xbf16>
    %13 = vector.shape_cast %12 : vector<1x16x16x128xbf16> to vector<16x16x128xbf16>
    %14 = vector.shape_cast %13 : vector<16x16x128xbf16> to vector<256x128xbf16>
    %c0_17 = arith.constant 0 : index
    %c1_18 = arith.constant 1 : index
    %c2_19 = arith.constant 2 : index
    %c0_20 = arith.constant 0 : index
    %15 = vector.load %arg1[%c0_17, %c1_18, %c2_19, %c0_20] : memref<1x18x18x128xbf16, #tpu.memory_space<vmem>>, vector<1x16x16x128xbf16>
    %16 = vector.shape_cast %15 : vector<1x16x16x128xbf16> to vector<16x16x128xbf16>
    %17 = vector.shape_cast %16 : vector<16x16x128xbf16> to vector<256x128xbf16>
    %c0_21 = arith.constant 0 : index
    %c2_22 = arith.constant 2 : index
    %c0_23 = arith.constant 0 : index
    %c0_24 = arith.constant 0 : index
    %18 = vector.load %arg1[%c0_21, %c2_22, %c0_23, %c0_24] : memref<1x18x18x128xbf16, #tpu.memory_space<vmem>>, vector<1x16x16x128xbf16>
    %19 = vector.shape_cast %18 : vector<1x16x16x128xbf16> to vector<16x16x128xbf16>
    %20 = vector.shape_cast %19 : vector<16x16x128xbf16> to vector<256x128xbf16>
    %c0_25 = arith.constant 0 : index
    %c2_26 = arith.constant 2 : index
    %c1_27 = arith.constant 1 : index
    %c0_28 = arith.constant 0 : index
    %21 = vector.load %arg1[%c0_25, %c2_26, %c1_27, %c0_28] : memref<1x18x18x128xbf16, #tpu.memory_space<vmem>>, vector<1x16x16x128xbf16>
    %22 = vector.shape_cast %21 : vector<1x16x16x128xbf16> to vector<16x16x128xbf16>
    %23 = vector.shape_cast %22 : vector<16x16x128xbf16> to vector<256x128xbf16>
    %c0_29 = arith.constant 0 : index
    %c2_30 = arith.constant 2 : index
    %c2_31 = arith.constant 2 : index
    %c0_32 = arith.constant 0 : index
    %24 = vector.load %arg1[%c0_29, %c2_30, %c2_31, %c0_32] : memref<1x18x18x128xbf16, #tpu.memory_space<vmem>>, vector<1x16x16x128xbf16>
    %25 = vector.shape_cast %24 : vector<1x16x16x128xbf16> to vector<16x16x128xbf16>
    %26 = vector.shape_cast %25 : vector<16x16x128xbf16> to vector<256x128xbf16>
    %27 = tpu.concatenate %2, %5, %8, %11, %14, %17, %20, %23, %26 in 1 : vector<256x128xbf16>, vector<256x128xbf16>, vector<256x128xbf16>, vector<256x128xbf16>, vector<256x128xbf16>, vector<256x128xbf16>, vector<256x128xbf16>, vector<256x128xbf16>, vector<256x128xbf16> -> vector<256x1152xbf16>
    %c0_33 = arith.constant 0 : index
    %c0_34 = arith.constant 0 : index
    %28 = vector.load %arg2[%c0_33, %c0_34] : memref<1152x128xbf16, #tpu.memory_space<vmem>>, vector<1152x128xbf16>
    %cst = arith.constant dense<0.000000e+00> : vector<256x128xf32>
    %29 = tpu.matmul %27, %28, %cst {dimension_numbers = #tpu.dot_dimension_numbers<[1], [0], [0], [1], [0, 0, 1, 1], [], []>} : vector<256x1152xbf16>, vector<1152x128xbf16>, vector<256x128xf32> -> vector<256x128xf32>
    %cst_35 = arith.constant dense<0.000000e+00> : vector<128xf32>
    %30 = vector.multi_reduction <add>, %29, %cst_35 [0] : vector<256x128xf32> to vector<128xf32>
    %31 = vector.shape_cast %30 : vector<128xf32> to vector<1x128xf32>
    %32 = arith.mulf %29, %29 : vector<256x128xf32>
    %cst_36 = arith.constant dense<0.000000e+00> : vector<128xf32>
    %33 = vector.multi_reduction <add>, %32, %cst_36 [0] : vector<256x128xf32> to vector<128xf32>
    %34 = vector.shape_cast %33 : vector<128xf32> to vector<1x128xf32>
    %35 = tpu.concatenate %31, %34 in 0 : vector<1x128xf32>, vector<1x128xf32> -> vector<2x128xf32>
    %c0_37 = arith.constant 0 : index
    %c0_38 = arith.constant 0 : index
    %c0_39 = arith.constant 0 : index
    %36 = vector.load %arg5[%c0_37, %c0_38, %c0_39] : memref<1x2x128xf32, #tpu.memory_space<vmem>>, vector<1x2x128xf32>
    %37 = vector.shape_cast %36 : vector<1x2x128xf32> to vector<2x128xf32>
    %38 = vector.shape_cast %35 : vector<2x128xf32> to vector<1x2x128xf32>
    tpu.vector_store %arg5[%c0_37, %c0_38, %c0_39], %38 {strides = array<i32>} : memref<1x2x128xf32, #tpu.memory_space<vmem>>, vector<1x2x128xf32>,
    %39 = vector.shape_cast %29 : vector<256x128xf32> to vector<1x16x16x128xf32>
    %40 = arith.truncf %39 : vector<1x16x16x128xf32> to vector<1x16x16x128xbf16>
    %c0_40 = arith.constant 0 : index
    %c0_41 = arith.constant 0 : index
    %c0_42 = arith.constant 0 : index
    %c0_43 = arith.constant 0 : index
    %41 = vector.load %arg4[%c0_40, %c0_41, %c0_42, %c0_43] : memref<1x16x16x128xbf16, #tpu.memory_space<vmem>>, vector<1x16x16x128xbf16>
    tpu.vector_store %arg4[%c0_40, %c0_41, %c0_42, %c0_43], %40 {strides = array<i32>} : memref<1x16x16x128xbf16, #tpu.memory_space<vmem>>, vector<1x16x16x128xbf16>,
    %c0_44 = arith.constant 0 : index
    %c0_45 = arith.constant 0 : index
    %42 = vector.load %arg3[%c0_44, %c0_45] : memref<128x128xbf16, #tpu.memory_space<vmem>>, vector<128x128xbf16>
    %cst_46 = arith.constant dense<0.000000e+00> : vector<256x128xf32>
    %43 = tpu.matmul %14, %42, %cst_46 {dimension_numbers = #tpu.dot_dimension_numbers<[1], [0], [0], [1], [0, 0, 1, 1], [], []>} : vector<256x128xbf16>, vector<128x128xbf16>, vector<256x128xf32> -> vector<256x128xf32>
    %cst_47 = arith.constant dense<0.000000e+00> : vector<128xf32>
    %44 = vector.multi_reduction <add>, %43, %cst_47 [0] : vector<256x128xf32> to vector<128xf32>
    %45 = vector.shape_cast %44 : vector<128xf32> to vector<1x128xf32>
    %46 = arith.mulf %43, %43 : vector<256x128xf32>
    %cst_48 = arith.constant dense<0.000000e+00> : vector<128xf32>
    %47 = vector.multi_reduction <add>, %46, %cst_48 [0] : vector<256x128xf32> to vector<128xf32>
    %48 = vector.shape_cast %47 : vector<128xf32> to vector<1x128xf32>
    %49 = tpu.concatenate %45, %48 in 0 : vector<1x128xf32>, vector<1x128xf32> -> vector<2x128xf32>
    %c0_49 = arith.constant 0 : index
    %c0_50 = arith.constant 0 : index
    %c0_51 = arith.constant 0 : index
    %50 = vector.load %arg7[%c0_49, %c0_50, %c0_51] : memref<1x2x128xf32, #tpu.memory_space<vmem>>, vector<1x2x128xf32>
    %51 = vector.shape_cast %50 : vector<1x2x128xf32> to vector<2x128xf32>
    %52 = vector.shape_cast %49 : vector<2x128xf32> to vector<1x2x128xf32>
    tpu.vector_store %arg7[%c0_49, %c0_50, %c0_51], %52 {strides = array<i32>} : memref<1x2x128xf32, #tpu.memory_space<vmem>>, vector<1x2x128xf32>,
    %53 = arith.truncf %43 : vector<256x128xf32> to vector<256x128xbf16>
    %c0_52 = arith.constant 0 : index
    %c0_53 = arith.constant 0 : index
    %c0_54 = arith.constant 0 : index
    %54 = vector.load %arg6[%c0_52, %c0_53, %c0_54] : memref<1x256x128xbf16, #tpu.memory_space<vmem>>, vector<1x256x128xbf16>
    %55 = vector.shape_cast %54 : vector<1x256x128xbf16> to vector<256x128xbf16>
    %56 = vector.shape_cast %53 : vector<256x128xbf16> to vector<1x256x128xbf16>
    tpu.vector_store %arg6[%c0_52, %c0_53, %c0_54], %56 {strides = array<i32>} : memref<1x256x128xbf16, #tpu.memory_space<vmem>>, vector<1x256x128xbf16>,
    return
  }
  func.func @transform_0(%arg0: i32) -> (i32, i32, i32, i32) {
    %c0_i32 = arith.constant 0 : i32
    %c0_i32_0 = arith.constant 0 : i32
    %c0_i32_1 = arith.constant 0 : i32
    %c0_i32_2 = arith.constant 0 : i32
    return %arg0, %c0_i32, %c0_i32_0, %c0_i32_1 : i32, i32, i32, i32
  }
  func.func @transform_1(%arg0: i32) -> (i32, i32) {
    %c0_i32 = arith.constant 0 : i32
    %c0_i32_0 = arith.constant 0 : i32
    %c0_i32_1 = arith.constant 0 : i32
    return %c0_i32, %c0_i32_0 : i32, i32
  }
  func.func @transform_2(%arg0: i32) -> (i32, i32) {
    %c0_i32 = arith.constant 0 : i32
    %c0_i32_0 = arith.constant 0 : i32
    %c0_i32_1 = arith.constant 0 : i32
    return %c0_i32, %c0_i32_0 : i32, i32
  }
  func.func @transform_3(%arg0: i32) -> (i32, i32, i32, i32) {
    %c0_i32 = arith.constant 0 : i32
    %c0_i32_0 = arith.constant 0 : i32
    %c0_i32_1 = arith.constant 0 : i32
    %c0_i32_2 = arith.constant 0 : i32
    return %arg0, %c0_i32, %c0_i32_0, %c0_i32_1 : i32, i32, i32, i32
  }
  func.func @transform_4(%arg0: i32) -> (i32, i32, i32) {
    %c0_i32 = arith.constant 0 : i32
    %c0_i32_0 = arith.constant 0 : i32
    %c0_i32_1 = arith.constant 0 : i32
    return %arg0, %c0_i32, %c0_i32_0 : i32, i32, i32
  }
  func.func @transform_5(%arg0: i32) -> (i32, i32, i32) {
    %c0_i32 = arith.constant 0 : i32
    %c0_i32_0 = arith.constant 0 : i32
    %c0_i32_1 = arith.constant 0 : i32
    return %arg0, %c0_i32, %c0_i32_0 : i32, i32, i32
  }
  func.func @transform_6(%arg0: i32) -> (i32, i32, i32) {
    %c0_i32 = arith.constant 0 : i32
    %c0_i32_0 = arith.constant 0 : i32
    %c0_i32_1 = arith.constant 0 : i32
    return %arg0, %c0_i32, %c0_i32_0 : i32, i32, i32
  }
}

</mosaic_0001>

<bundles_post_ra>
// kernel: tpu_custom_call.1
= control target key start
LH: loop header
LB: loop body
LE: loop exit
PB: predicated region body
PF: predicated region fallthrough
CT: control target
= control target key end

     0   :  { %s9187_s0 = inlined_call_operand.vmem [shape: bf16[2,18,18,128], index: 0, kind: input, shape index: {}]   ;;  %s9188_s1 = inlined_call_operand.vmem [shape: bf16[1152,128], index: 1, kind: input, shape index: {}]   ;;  %s9189_s2 = inlined_call_operand.vmem [shape: bf16[128,128], index: 2, kind: input, shape index: {}]   ;;  %s9190_s3 = inlined_call_operand.hbm [shape: bf16[2,16,16,128], index: 3, kind: output, shape index: {0}]   ;;  %s9191_s4 = inlined_call_operand.hbm [shape: f32[2,2,128], index: 4, kind: output, shape index: {1}]   ;;  %s9192_s5 = inlined_call_operand.hbm [shape: bf16[2,256,128], index: 5, kind: output, shape index: {2}]   ;;  %s9193_s6 = inlined_call_operand.hbm [shape: f32[2,2,128], index: 6, kind: output, shape index: {3}]  }
   0x1   :  { %9215 = sst [smem:[#allocation37_spill]] %s9187_s0 }
   0x2   :  { %9216 = sst [smem:[#allocation38_spill]] %s9188_s1 }
   0x3   :  { %12 = vsyncpa [#allocation3], 0 }
   0x4   :  { %14 = vsyncpa [#allocation3 + $0x1], 0 }
   0x5   :  { %15 = vsyncpa [#allocation5], 0 }
   0x6   :  { %17 = vsyncpa [#allocation5 + $0x1], 0 }
   0x7   :  { %18 = vsyncpa [#allocation8], 0 }
   0x8   :  { %20 = vsyncpa [#allocation8 + $0x1], 0  ;;  %s6845_s21 = smov 0   ;;  %s6847_s22 = smov 0  }
   0x9   :  { %s6849_s23 = smov 0   ;;  %s6851_s24 = smov 0  }
   0xa LB: > { %s6866_s25 = sadd.s32 4294967295, %s6802_s24   ;;  %s9212_s26 = sadd.s32 4294967294, %s6802_s24   ;;  %s6802_s24 = sphi %s6851_s24, %s9328_s24   ;;  %s6798_s23 = sphi %s6849_s23, %s9327_s23   ;;  %s6794_s22 = sphi %s6847_s22, %s9326_s22   ;;  %s6790_s21 = sphi %s6845_s21, %s9325_s21  }
   0xb   : > { %s6870_s27 = sadd.s32 1, %s6802_s24   ;;  %s101_s28 = sadd.s32 1, %s6798_s23 }
   0xc   : > { %s98_s29 = ssub.s32 %s6802_s24, %s6870_s27  ;;  %p111_p0 = scmp.ne.s32.totalorder %s6798_s23, %s6794_s22 }
   0xd   : > { %p99_p1 = scmp.eq.s32.totalorder %s98_s29, 0  ;;  %p112_p2 = scmp.eq.s32.totalorder %s6866_s25, 1 }
   0xe   : > { %p117_p3 = scmp.ne.s32.totalorder %s6794_s22, %s6790_s21  ;;  %p118_p4 = scmp.eq.s32.totalorder %s9212_s26, 1 }
   0xf   : > { %s6883_s30 = scalar_select %p99_p1, %s6798_s23, %s101_s28  }
  0x10   : > { %p6885_p5 = por %p112_p2, %p111_p0  ;;  %p6889_p6 = por %p118_p4, %p117_p3 }
  0x11   : > { %p5107_p7 = scmp.ge.s32.totalorder %s6802_s24, 1  ;;  %p228_p8 = scmp.lt.s32.totalorder %s6802_s24, 3 }
  0x13   : > { %p229_p9 = pnand %p5107_p7, %p228_p8 }
  0x15   : > { %232 = sbr.rel (%p229_p9) target bundleno = 699 (0x2bb), region = 32 }
  0x1a   : > { %s9219_s1 = sld [smem:[#allocation38_spill]]  ;;  %p273_p10 = scmp.lt.s32.totalorder %s6866_s25, 1  ;;  %vm327_vm0 = vsmask.f32 3328  ;;  %vm328_vm1 = vsmask.f32 7440 }
  0x1b   : > { %s9220_s0 = sld [smem:[#allocation37_spill]]  ;;  %vm778_vm2 = vcmask 1042432   ;;  %vm779_vm3 = vcmask 1046532   ;;  %vm7021_vm4 = vmor %vm327_vm0, %vm328_vm1  ;;  %s5653_s16 = sshll.u32 %s6866_s25, 11 }
  0x1c   : > { %s274_s11 = scalar_select %p273_p10, %s6866_s25, 1  ;;  %vm7030_vm5 = vmor %vm778_vm2, %vm779_vm3 }
  0x1d   : > { %s9035_s29 = scalar_lea.hbm %s9190_s3, %s5653_s16  ;;  %s6804_s10 = smov [#allocation2]  }
  0x1e   : > { %s6437_s20 = smul.u32 216, %s274_s11  ;;  %s6660_s12 = sshll.u32 %s6804_s10, 4  ;;  %s6661_s12 = int_to_ptr.vmem [resolvable:$false] %s6660_s12 }
  0x1f   : > { %s6662_s13 = scalar_lea.vmem %s6661_s12, 4096 }
  0x20   : > { %v6494_v0 = vld [vmem:[%s9219_s1 + $0x78] sm:$0xff]   ;;  %v6498_v4 = vld [vmem:[%s9219_s1 + $0x70] sm:$0xff]   ;;  %v6502_v8 = vld [vmem:[%s9219_s1 + $0x68] sm:$0xff]  }
  0x21   : > { %v6495_v1 = vld [vmem:[%s9219_s1 + $0xf8] sm:$0xff]   ;;  %5845 = vmatprep.subr.bf16.mxu0 %v6494_v0  ;;  %v6499_v5 = vld [vmem:[%s9219_s1 + $0xf0] sm:$0xff]   ;;  %v6503_v9 = vld [vmem:[%s9219_s1 + $0xe8] sm:$0xff]   ;;  %s6990_s17 = scalar_lea.vmem %s9220_s0, %s6437_s20 }
  0x22   : > { %v6496_v2 = vld [vmem:[%s9219_s1 + $0x38] sm:$0xff]   ;;  %5957 = vmatprep.subr.bf16.mxu1 %v6495_v1  ;;  %v6500_v6 = vld [vmem:[%s9219_s1 + $0x30] sm:$0xff]   ;;  %v6504_v10 = vld [vmem:[%s9219_s1 + $0x28] sm:$0xff]  }
  0x23   : > { %v6497_v3 = vld [vmem:[%s9219_s1 + $0xb8] sm:$0xff]   ;;  %5846 = vmatpush3.bf16.msra.mxu0 %v6496_v2  ;;  %v6501_v7 = vld [vmem:[%s9219_s1 + $0xb0] sm:$0xff]   ;;  %v6505_v11 = vld [vmem:[%s9219_s1 + $0xa8] sm:$0xff]  }
  0x24   : > { %5958 = vmatpush3.bf16.msra.mxu1 %v6497_v3  ;;  %5847 = vmatprep.subr.bf16.mxu0 %v6498_v4  ;;  %v6506_v12 = vld [vmem:[%s9219_s1 + $0x60] sm:$0xff]   ;;  %v6510_v16 = vld [vmem:[%s9219_s1 + $0x58] sm:$0xff]   ;;  %v6514_v20 = vld [vmem:[%s9219_s1 + $0x50] sm:$0xff]  }
  0x25   : > { %5959 = vmatprep.subr.bf16.mxu1 %v6499_v5  ;;  %v6507_v13 = vld [vmem:[%s9219_s1 + $0xe0] sm:$0xff]   ;;  %v6511_v17 = vld [vmem:[%s9219_s1 + $0xd8] sm:$0xff]   ;;  %v6515_v21 = vld [vmem:[%s9219_s1 + $0xd0] sm:$0xff]  }
  0x26   : > { %v6508_v14 = vld [vmem:[%s9219_s1 + $0x20] sm:$0xff]   ;;  %v6512_v18 = vld [vmem:[%s9219_s1 + $0x18] sm:$0xff]   ;;  %v6516_v22 = vld [vmem:[%s9219_s1 + $0x10] sm:$0xff]  }
  0x27   : > { %5848 = vmatpush3.bf16.msra.mxu0 %v6500_v6  ;;  %v6509_v15 = vld [vmem:[%s9219_s1 + $0xa0] sm:$0xff]   ;;  %v6513_v19 = vld [vmem:[%s9219_s1 + $0x98] sm:$0xff]   ;;  %v6517_v23 = vld [vmem:[%s9219_s1 + $0x90] sm:$0xff]  }
  0x28   : > { %5960 = vmatpush3.bf16.msra.mxu1 %v6501_v7  ;;  %5849 = vmatprep.subr.bf16.mxu0 %v6502_v8  ;;  %v6518_v24 = vld [vmem:[%s9219_s1 + $0x48] sm:$0xff]   ;;  %v6522_v28 = vld [vmem:[%s9219_s1 + $0x40] sm:$0xff]   ;;  %v7011_v43 = vld [vmem:[%s6990_s17 + $0x10] sm:$0xf] }
  0x29   : > { %5961 = vmatprep.subr.bf16.mxu1 %v6503_v9  ;;  %v6519_v25 = vld [vmem:[%s9219_s1 + $0xc8] sm:$0xff]   ;;  %v6523_v29 = vld [vmem:[%s9219_s1 + $0xc0] sm:$0xff]   ;;  %v952_v48 = vshll.u32 %v7011_v43, 16  ;;  %v956_v53 = vshrl.u32 %v7011_v43, 16  ;;  %v6528_v54 = vld [vmem:[%s9219_s1 + $0x178] sm:$0xff]  }
  0x2a   : > { %v6520_v26 = vld [vmem:[%s9219_s1 + $0x8] sm:$0xff]   ;;  %v6524_v30 = vld [vmem:[%s9219_s1] sm:$0xff]   ;;  %v6530_v1 = vld [vmem:[%s9219_s1 + $0x1f8] sm:$0xff]  }
  0x2b   : > { %5850 = vmatpush3.bf16.msra.mxu0 %v6504_v10  ;;  %v6521_v27 = vld [vmem:[%s9219_s1 + $0x88] sm:$0xff]   ;;  %v6525_v31 = vld [vmem:[%s9219_s1 + $0x80] sm:$0xff]   ;;  %v7025_v58 = vrot.slane %v952_v48, 5  ;;  %v958_v63 = vrot.slane %v956_v53, 4  ;;  %v6529_v9 = vld [vmem:[%s9219_s1 + $0x138] sm:$0xff]  }
  0x2c   : > { %5962 = vmatpush3.bf16.msra.mxu1 %v6505_v11  ;;  %5851 = vmatprep.subr.bf16.mxu0 %v6506_v12  ;;  %v6999_v32 = vld [vmem:[%s6990_s17] sm:$0xf]  ;;  %v7002_v33 = vld [vmem:[%s6990_s17 + $0x4] sm:$0xf]  ;;  %v311_v34 = vld [vmem:[%s6990_s17 + $0x8] sm:$0x1] }
  0x2d   : > { %5963 = vmatprep.subr.bf16.mxu1 %v6507_v13  ;;  %v331_v35 = vshrl.u32 %v6999_v32, 16  ;;  %v334_v36 = vshll.u32 %v6999_v32, 16  ;;  %v340_v37 = vshll.u32 %v7002_v33, 16  ;;  %v344_v38 = vshrl.u32 %v7002_v33, 16  ;;  %v5129_v40 = vld [vmem:[%s6990_s17 + $0xc] sm:$0xf] }
  0x2e   : > { %v350_v39 = vshll.u32 %v311_v34, 16  ;;  %v943_v44 = vshrl.u32 %v5129_v40, 16  ;;  %v946_v45 = vshll.u32 %v5129_v40, 16  ;;  %v714_v49 = vld [vmem:[%s6990_s17] sm:$0xe]  ;;  %v5337_v59 = vcombine.low %v5129_v40, %v7011_v43  ;;  %v6544_v53 = vld [vmem:[%s9219_s1 + $0x168] sm:$0xff]  }
  0x2f   : > { %5852 = vmatpush3.bf16.msra.mxu0 %v6508_v14  ;;  %v333_v41 = vrot.slane %v331_v35, 4  ;;  %v336_v42 = vrot.slane %v334_v36, 5  ;;  %v342_v46 = vrot.slane %v340_v37, 5  ;;  %v346_v47 = vrot.slane %v344_v38, 4  ;;  %v6531_v14 = vld [vmem:[%s9219_s1 + $0x1b8] sm:$0xff]  }
  0x30   : > { %5964 = vmatpush3.bf16.msra.mxu1 %v6509_v15  ;;  %5853 = vmatprep.subr.bf16.mxu0 %v6510_v16  ;;  %v945_v51 = vrot.slane %v943_v44, 4  ;;  %v948_v52 = vrot.slane %v946_v45, 5  ;;  %v352_v57 = vrot.slane %v350_v39, 5  ;;  %v786_v61 = vrot.slane %v311_v34, 5  ;;  %v7057_v15 = vld [vmem:[%s6990_s17 + $0xc] sm:$0xf] }
  0x31   : > { %5965 = vmatprep.subr.bf16.mxu1 %v6511_v17  ;;  %v337_v50 = vor.u32 %v336_v42, %v333_v41  ;;  %v347_v56 = vor.u32 %v346_v47, %v342_v46  ;;  %3504 = vmatprep.mubr.bf16.mxu1 %v5337_v59  ;;  %v5113_v4 = vrot.slane %v714_v49, 9  ;;  %v783_v5 = vrot.slane %v7002_v33, 5  ;;  %v6538_v34 = vld [vmem:[%s9219_s1 + $0x1f0] sm:$0xff]   ;;  %v715_v39 = vld [vmem:[%s6990_s17 + $0xc] sm:$0xe] }
  0x32   : > { %v949_v62 = vor.u32 %v948_v52, %v945_v51  ;;  %v959_v8 = vor.u32 %v958_v63, %v7025_v58  ;;  %v5289_v11 = vcombine.low %v6999_v32, %v7002_v33  ;;  %v6537_v33 = vld [vmem:[%s9219_s1 + $0x130] sm:$0xff]   ;;  %v7097_v45 = vld [vmem:[%s6990_s17 + $0x18] sm:$0xf]  ;;  %v7107_v51 = vld [vmem:[%s6990_s17 + $0x1c] sm:$0xf] }
  0x33   : > { %5854 = vmatpush3.bf16.msra.mxu0 %v6512_v18  ;;  %v338_v60 = vrot.slane %v337_v50, 4  ;;  %v348_v2 = vrot.slane %v347_v56, 4  ;;  %v784_v12 = vsel %vm7030_vm5, %v5113_v4, %v783_v5  ;;  %v785_v13 = vrot.slane %v783_v5, 4  ;;  %v7110_v52 = vld [vmem:[%s6990_s17 + $0x20] sm:$0x1] }
  0x34   : > { %5966 = vmatpush3.bf16.msra.mxu1 %v6513_v19  ;;  %5855 = vmatprep.subr.bf16.mxu0 %v6514_v20  ;;  %v7041_v7 = vrot.slane %v949_v62, 4  ;;  %v7063_v18 = vrot.slane %v959_v8, 4  ;;  %v7066_v19 = vld [vmem:[%s6990_s17 + $0x10] sm:$0xf]  ;;  %v7069_v20 = vld [vmem:[%s6990_s17 + $0x14] sm:$0x1] }
  0x35   : > { %5967 = vmatprep.subr.bf16.mxu1 %v6515_v21  ;;  %v343_v6 = vsel %vm7021_vm4, %v338_v60, %v342_v46  ;;  %v353_v10 = vsel %vm7021_vm4, %v348_v2, %v352_v57  ;;  %v355_v21 = vshrl.u32 %v7057_v15, 16  ;;  %v6539_v46 = vld [vmem:[%s9219_s1 + $0x1b0] sm:$0xff]   ;;  %v5290_v50 = vcombine.low %v7057_v15, %v7066_v19  ;;  %v6545_v60 = vld [vmem:[%s9219_s1 + $0x128] sm:$0xff]   ;;  %v5133_v2 = vld [vmem:[%s6990_s17 + $0x24] sm:$0xf] }
  0x36   : > { %v5305_v16 = vcombine.low %v343_v6, %v353_v10  ;;  %v790_v56 = vrot.slane %v7066_v19, 5  ;;  %v793_v57 = vrot.slane %v7069_v20, 5  ;;  %v379_v59 = vshrl.u32 %v7097_v45, 16  ;;  %v6546_v10 = vld [vmem:[%s9219_s1 + $0x1e8] sm:$0xff]  }
  0x37   : > { %5856 = vmatpush3.bf16.msra.mxu0 %v6516_v22  ;;  %v787_v22 = vsel %vm7030_vm5, %v785_v13, %v786_v61  ;;  %v382_v63 = vshll.u32 %v7097_v45, 16  ;;  %v392_v8 = vshrl.u32 %v7107_v51, 16 }
  0x38   : > { %5968 = vmatpush3.bf16.msra.mxu1 %v6517_v23  ;;  %5857 = vmatprep.subr.bf16.mxu0 %v6518_v24  ;;  %v358_v23 = vshll.u32 %v7057_v15, 16  ;;  %v364_v24 = vshll.u32 %v7066_v19, 16  ;;  %v792_v5 = vrot.slane %v790_v56, 4  ;;  %v381_v6 = vrot.slane %v379_v59, 4  ;;  %v716_v15 = vld [vmem:[%s6990_s17 + $0x18] sm:$0xe] }
  0x39   : > { %5969 = vmatprep.subr.bf16.mxu1 %v6519_v25  ;;  %v368_v25 = vshrl.u32 %v7066_v19, 16  ;;  %3343 = vmatprep.mubr.bf16.mxu0 %v5305_v16  ;;  %v384_v13 = vrot.slane %v382_v63, 5  ;;  %v7178_v63 = vld [vmem:[%s6990_s17 + $0x34] sm:$0xf] }
  0x3a   : > { %v360_v35 = vrot.slane %v358_v23, 5  ;;  %v366_v36 = vrot.slane %v364_v24, 5  ;;  %v794_v19 = vsel %vm7030_vm5, %v792_v5, %v793_v57  ;;  %v991_v24 = vshrl.u32 %v5133_v2, 16  ;;  %v5135_v57 = vld [vmem:[%s6990_s17 + $0x30] sm:$0xf] }
  0x3b   : > { %5858 = vmatpush3.bf16.msra.mxu0 %v6520_v26  ;;  %v5131_v26 = vld [vmem:[%s6990_s17 + $0x18] sm:$0xf]  ;;  %v370_v37 = vrot.slane %v368_v25, 4  ;;  %v385_v23 = vor.u32 %v384_v13, %v381_v6  ;;  %v994_v25 = vshll.u32 %v5133_v2, 16  ;;  %v1015_v6 = vshrl.u32 %v5135_v57, 16 }
  0x3c   : > { %5970 = vmatpush3.bf16.msra.mxu1 %v6521_v27  ;;  %5859 = vmatprep.subr.bf16.mxu0 %v6522_v28  ;;  %v6536_v27 = vld [vmem:[%s9219_s1 + $0x170] sm:$0xff]   ;;  %v5321_v28 = vcombine.low %v784_v12, %v787_v22  ;;  %v967_v32 = vshrl.u32 %v5131_v26, 16  ;;  %v970_v38 = vshll.u32 %v5131_v26, 16  ;;  %v1018_v13 = vshll.u32 %v5135_v57, 16 }
  0x3d   : > { %5971 = vmatprep.subr.bf16.mxu1 %v6523_v29  ;;  %v357_v29 = vrot.slane %v355_v21, 4  ;;  %v371_v48 = vor.u32 %v370_v37, %v366_v36  ;;  %v398_v21 = vshll.u32 %v7110_v52, 16 }
  0x3e   : > { %v7092_v41 = vrot.slane %v967_v32, 4  ;;  %v7102_v49 = vrot.slane %v970_v38, 5  ;;  %v7143_v32 = vrot.slane %v991_v24, 4  ;;  %v5115_v38 = vrot.slane %v716_v15, 9  ;;  %v7192_v15 = vld [vmem:[%s6990_s17 + $0x30] sm:$0xf] }
  0x3f   : > { %5860 = vmatpush3.bf16.msra.mxu0 %v6524_v30  ;;  %v374_v30 = vshll.u32 %v7069_v20, 16  ;;  %v361_v47 = vor.u32 %v360_v35, %v357_v29  ;;  %v372_v62 = vrot.slane %v371_v48, 4  ;;  %v394_v20 = vrot.slane %v392_v8, 4  ;;  %v7150_v35 = vld [vmem:[%s6990_s17 + $0x24] sm:$0xf] }
  0x40   : > { %5972 = vmatpush3.bf16.msra.mxu1 %v6525_v31  ;;  %6069 = vmatprep.subr.bf16.mxu0 %v6528_v54  ;;  %v7083_v31 = vld [vmem:[%s6990_s17 + $0x1c] sm:$0xf]  ;;  %v5114_v54 = vrot.slane %v715_v39, 9  ;;  %v797_v39 = vrot.slane %v7107_v51, 5  ;;  %v406_v48 = vshll.u32 %v7150_v35, 16  ;;  %v7200_v24 = vrot.slane %v1018_v13, 5 }
  0x41   : > { %6181 = vmatprep.subr.bf16.mxu1 %v6530_v1  ;;  %v376_v40 = vrot.slane %v374_v30, 5  ;;  %v5338_v44 = vcombine.low %v5131_v26, %v7083_v31  ;;  %v362_v61 = vrot.slane %v361_v47, 4  ;;  %v388_v1 = vshll.u32 %v7107_v51, 16  ;;  %v717_v8 = vld [vmem:[%s6990_s17 + $0x24] sm:$0xe] }
  0x42   : > { %3344 = vmatmul.mubr.bf16.vlgmr.msra.gmra.mxu0 %v5289_v11  ;;  %v791_v4 = vsel %vm7030_vm5, %v5114_v54, %v790_v56  ;;  %v386_v30 = vrot.slane %v385_v23, 4  ;;  %v403_v47 = vshrl.u32 %v7150_v35, 16  ;;  %v799_v54 = vrot.slane %v797_v39, 4 }
  0x43   : > { %3505 = vmatmul.mubr.bf16.vlgmr.msra.gmra.mxu1 %v5321_v28  ;;  %6070 = vmatpush3.bf16.msra.mxu0 %v6529_v9  ;;  %v7128_v9 = vld [vmem:[%s6990_s17 + $0x28] sm:$0xf]  ;;  %v367_v11 = vsel %vm7021_vm4, %v362_v61, %v366_v36  ;;  %v377_v12 = vsel %vm7021_vm4, %v372_v62, %v376_v40  ;;  %v5322_v22 = vcombine.low %v791_v4, %v794_v19  ;;  %v800_v40 = vrot.slane %v7110_v52, 5 }
  0x44   : > { %6182 = vmatpush3.bf16.msra.mxu1 %v6531_v14  ;;  %6071 = vmatprep.subr.bf16.mxu0 %v6536_v27  ;;  %v390_v14 = vrot.slane %v388_v1, 5  ;;  %v5306_v16 = vcombine.low %v367_v11, %v377_v12  ;;  %v400_v27 = vrot.slane %v398_v21, 5  ;;  %v5339_v29 = vcombine.low %v5133_v2, %v7128_v9  ;;  %v6547_v36 = vld [vmem:[%s9219_s1 + $0x1a8] sm:$0xff]   ;;  %v6553_v1 = vld [vmem:[%s9219_s1 + $0x120] sm:$0xff]  }
  0x45   : > { %3512 = vmatprep.mubr.bf16.mxu1 %v5338_v44  ;;  %6183 = vmatprep.subr.bf16.mxu1 %v6538_v34  ;;  %v5291_v34 = vcombine.low %v7097_v45, %v7107_v51  ;;  %v7158_v44 = vld [vmem:[%s6990_s17 + $0x28] sm:$0xf]  ;;  %v7163_v45 = vld [vmem:[%s6990_s17 + $0x2c] sm:$0x1]  ;;  %v6552_v51 = vld [vmem:[%s9219_s1 + $0x160] sm:$0xff]   ;;  %v408_v61 = vrot.slane %v406_v48, 5  ;;  %v801_v2 = vsel %vm7030_vm5, %v799_v54, %v800_v40  ;;  %v5340_v21 = vcombine.low %v5135_v57, %v7178_v63 }
  0x46   : > { %3351 = vmatprep.mubr.bf16.mxu0 %v5306_v16  ;;  %v395_v26 = vor.u32 %v394_v20, %v390_v14  ;;  %v416_v56 = vshrl.u32 %v7158_v44, 16  ;;  %v422_v5 = vshll.u32 %v7163_v45, 16  ;;  %v7194_v20 = vrot.slane %v1015_v6, 4 }
  0x47   : > { %6072 = vmatpush3.bf16.msra.mxu0 %v6537_v33  ;;  %v7145_v33 = vrot.slane %v994_v25, 5  ;;  %v5292_v25 = vcombine.low %v7150_v35, %v7158_v44  ;;  %v430_v35 = vshll.u32 %v7192_v15, 16 }
  0x48   : > { %6184 = vmatpush3.bf16.msra.mxu1 %v6539_v46  ;;  %6073 = vmatprep.subr.bf16.mxu0 %v6544_v53  ;;  %v396_v37 = vrot.slane %v395_v26, 4  ;;  %v391_v46 = vsel %vm7021_vm4, %v386_v30, %v390_v14  ;;  %v798_v53 = vsel %vm7030_vm5, %v5115_v38, %v797_v39  ;;  %v418_v4 = vrot.slane %v416_v56, 4 }
  0x49   : > { %6185 = vmatprep.subr.bf16.mxu1 %v6546_v10  ;;  %v6554_v10 = vld [vmem:[%s9219_s1 + $0x1e0] sm:$0xff]   ;;  %v5323_v11 = vcombine.low %v798_v53, %v801_v2  ;;  %v424_v19 = vrot.slane %v422_v5, 5  ;;  %v5116_v26 = vrot.slane %v717_v8, 9  ;;  %v432_v54 = vrot.slane %v430_v35, 5  ;;  %v6562_v2 = vld [vmem:[%s9219_s1 + $0x1d8] sm:$0xff]  }
  0x4a   : > { %3352 = vmatmul.mubr.bf16.gmra.mxu0 %v5290_v50  ;;  %v412_v50 = vshll.u32 %v7158_v44, 16  ;;  %v401_v52 = vsel %vm7021_vm4, %v396_v37, %v400_v27  ;;  %v7205_v27 = vld [vmem:[%s6990_s17 + $0x38] sm:$0x1]  ;;  %v427_v37 = vshrl.u32 %v7192_v15, 16 }
  0x4b   : > { %6074 = vmatpush3.bf16.msra.mxu0 %v6545_v60  ;;  %3513 = vmatmul.mubr.bf16.gmra.mxu1 %v5322_v22  ;;  %v5307_v59 = vcombine.low %v391_v46, %v401_v52  ;;  %v405_v60 = vrot.slane %v403_v47, 4  ;;  %v7198_v22 = vld [vmem:[%s6990_s17 + $0x34] sm:$0xf]  ;;  %v5137_v46 = vld [vmem:[%s6990_s17 + $0x3c] sm:$0xf] }
  0x4c   : > { %3520 = vmatprep.mubr.bf16.mxu1 %v5339_v29  ;;  %6186 = vmatpush3.bf16.msra.mxu1 %v6547_v36  ;;  %v414_v62 = vrot.slane %v412_v50, 5  ;;  %v6555_v29 = vld [vmem:[%s9219_s1 + $0x1a0] sm:$0xff]   ;;  %v807_v36 = vrot.slane %v7163_v45, 5  ;;  %v436_v39 = vshll.u32 %v7198_v22, 16  ;;  %v440_v40 = vshrl.u32 %v7198_v22, 16 }
  0x4d   : > { %6075 = vmatprep.subr.bf16.mxu0 %v6552_v51  ;;  %3359 = vmatprep.mubr.bf16.mxu0 %v5307_v59  ;;  %v409_v12 = vor.u32 %v408_v61, %v405_v60  ;;  %v7220_v47 = vld [vmem:[%s6990_s17 + $0x40] sm:$0xf]  ;;  %v429_v51 = vrot.slane %v427_v37, 4  ;;  %v718_v52 = vld [vmem:[%s6990_s17 + $0x30] sm:$0xe]  ;;  %v6561_v59 = vld [vmem:[%s9219_s1 + $0x118] sm:$0xff]  }
  0x4e   : > { %v419_v16 = vor.u32 %v418_v4, %v414_v62  ;;  %6187 = vmatprep.subr.bf16.mxu1 %v6554_v10  ;;  %v438_v56 = vrot.slane %v436_v39, 5  ;;  %v442_v57 = vrot.slane %v440_v40, 4  ;;  %v446_v61 = vshll.u32 %v7205_v27, 16  ;;  %v6563_v10 = vld [vmem:[%s9219_s1 + $0x198] sm:$0xff]  }
  0x4f   : > { %6076 = vmatpush3.bf16.msra.mxu0 %v6553_v1  ;;  %v410_v23 = vrot.slane %v409_v12, 4  ;;  %v1042_v1 = vshll.u32 %v5137_v46, 16  ;;  %v433_v5 = vor.u32 %v432_v54, %v429_v51  ;;  %v811_v37 = vrot.slane %v7198_v22, 5  ;;  %v7476_v8 = vld [vmem:[%s6990_s17 + $0x78] sm:$0xf] }
  0x50   : > { %v420_v30 = vrot.slane %v419_v16, 4  ;;  %6188 = vmatpush3.bf16.msra.mxu1 %v6555_v29  ;;  %v443_v6 = vor.u32 %v442_v57, %v438_v56  ;;  %v5341_v16 = vcombine.low %v5137_v46, %v7220_v47  ;;  %v5293_v29 = vcombine.low %v7192_v15, %v7198_v22 }
  0x51   : > { %v415_v38 = vsel %vm7021_vm4, %v410_v23, %v414_v62  ;;  %v1039_v62 = vshrl.u32 %v5137_v46, 16  ;;  %v7245_v13 = vrot.slane %v1042_v1, 5  ;;  %6189 = vmatprep.subr.bf16.mxu1 %v6562_v2  ;;  %v434_v23 = vrot.slane %v433_v5, 4  ;;  %v6570_v1 = vld [vmem:[%s9219_s1 + $0x1d0] sm:$0xff]  }
  0x52   : > { %3360 = vmatmul.mubr.bf16.gmra.mxu0 %v5291_v34  ;;  %v804_v34 = vrot.slane %v7158_v44, 5  ;;  %v6560_v44 = vld [vmem:[%s9219_s1 + $0x158] sm:$0xff]   ;;  %v425_v45 = vsel %vm7021_vm4, %v420_v30, %v424_v19  ;;  %v5117_v30 = vrot.slane %v718_v52, 9 }
  0x53   : > { %3521 = vmatmul.mubr.bf16.gmra.mxu1 %v5323_v11  ;;  %v5308_v53 = vcombine.low %v415_v38, %v425_v45  ;;  %6077 = vmatprep.subr.bf16.mxu0 %v6560_v44  ;;  %v448_v11 = vrot.slane %v446_v61, 5  ;;  %v7243_v12 = vrot.slane %v1039_v62, 4  ;;  %v7249_v19 = vld [vmem:[%s6990_s17 + $0x3c] sm:$0xf]  ;;  %v814_v38 = vrot.slane %v7205_v27, 5 }
  0x54   : > { %3528 = vmatprep.mubr.bf16.mxu1 %v5340_v21  ;;  %v805_v48 = vsel %vm7030_vm5, %v5116_v26, %v804_v34  ;;  %v806_v50 = vrot.slane %v804_v34, 4  ;;  %6078 = vmatpush3.bf16.msra.mxu0 %v6561_v59  ;;  %v6568_v21 = vld [vmem:[%s9219_s1 + $0x150] sm:$0xff]   ;;  %v444_v26 = vrot.slane %v443_v6, 4  ;;  %v7257_v34 = vld [vmem:[%s6990_s17 + $0x40] sm:$0xf]  ;;  %v451_v35 = vshrl.u32 %v7249_v19, 16 }
  0x55   : > { %3367 = vmatprep.mubr.bf16.mxu0 %v5308_v53  ;;  %v454_v39 = vshll.u32 %v7249_v19, 16  ;;  %6190 = vmatpush3.bf16.msra.mxu1 %v6563_v10  ;;  %v439_v15 = vsel %vm7021_vm4, %v434_v23, %v438_v56  ;;  %v460_v46 = vshll.u32 %v7257_v34, 16  ;;  %v464_v22 = vshrl.u32 %v7257_v34, 16  ;;  %v7280_v56 = vld [vmem:[%s6990_s17 + $0x4c] sm:$0xf] }
  0x56   : > { %v808_v60 = vsel %vm7030_vm5, %v806_v50, %v807_v36  ;;  %v6569_v36 = vld [vmem:[%s9219_s1 + $0x110] sm:$0xff]   ;;  %v449_v40 = vsel %vm7021_vm4, %v444_v26, %v448_v11  ;;  %6079 = vmatprep.subr.bf16.mxu0 %v6568_v21  ;;  %v812_v44 = vsel %vm7030_vm5, %v5117_v30, %v811_v37  ;;  %v813_v45 = vrot.slane %v811_v37, 4  ;;  %v5139_v50 = vld [vmem:[%s6990_s17 + $0x48] sm:$0xf]  ;;  %v719_v62 = vld [vmem:[%s6990_s17 + $0x3c] sm:$0xe]  ;;  %6191 = vmatprep.subr.bf16.mxu1 %v6570_v1 }
  0x57   : > { %v5324_v4 = vcombine.low %v805_v48, %v808_v60  ;;  %v5309_v27 = vcombine.low %v439_v15, %v449_v40  ;;  %v453_v48 = vrot.slane %v451_v35, 4  ;;  %v456_v51 = vrot.slane %v454_v39, 5  ;;  %v7290_v10 = vld [vmem:[%s6990_s17 + $0x48] sm:$0xf]  ;;  %v7293_v11 = vld [vmem:[%s6990_s17 + $0x4c] sm:$0xf] }
  0x58   : > { %6080 = vmatpush3.bf16.msra.mxu0 %v6569_v36  ;;  %v462_v52 = vrot.slane %v460_v46, 5  ;;  %v466_v53 = vrot.slane %v464_v22, 4  ;;  %v815_v57 = vsel %vm7030_vm5, %v813_v45, %v814_v38  ;;  %v1063_v59 = vshrl.u32 %v5139_v50, 16  ;;  %v7306_v36 = vld [vmem:[%s6990_s17 + $0x50] sm:$0x1]  ;;  %v6578_v1 = vld [vmem:[%s9219_s1 + $0x1c8] sm:$0xff]  }
  0x59   : > { %v1066_v60 = vshll.u32 %v5139_v50, 16  ;;  %v5325_v2 = vcombine.low %v812_v44, %v815_v57  ;;  %v5342_v26 = vcombine.low %v5139_v50, %v7280_v56  ;;  %v5294_v30 = vcombine.low %v7249_v19, %v7257_v34  ;;  %v5141_v22 = vld [vmem:[%s6990_s17 + $0x54] sm:$0xf]  ;;  %v720_v45 = vld [vmem:[%s6990_s17 + $0x48] sm:$0xe] }
  0x5a   : > { %3368 = vmatmul.mubr.bf16.gmra.mxu0 %v5292_v25  ;;  %v7265_v25 = vld [vmem:[%s6990_s17 + $0x44] sm:$0x1]  ;;  %v467_v5 = vor.u32 %v466_v53, %v462_v52  ;;  %v7298_v21 = vrot.slane %v1063_v59, 4  ;;  %v5118_v35 = vrot.slane %v719_v62, 9  ;;  %v818_v39 = vrot.slane %v7257_v34, 5 }
  0x5b   : > { %3529 = vmatmul.mubr.bf16.gmra.mxu1 %v5324_v4  ;;  %v470_v54 = vshll.u32 %v7265_v25, 16  ;;  %3375 = vmatprep.mubr.bf16.mxu0 %v5309_v27  ;;  %v457_v4 = vor.u32 %v456_v51, %v453_v48  ;;  %v7300_v23 = vrot.slane %v1066_v60, 5  ;;  %v821_v15 = vrot.slane %v7265_v25, 5  ;;  %v7315_v27 = vld [vmem:[%s6990_s17 + $0x58] sm:$0xf]  ;;  %v6576_v48 = vld [vmem:[%s9219_s1 + $0x148] sm:$0xff]  }
  0x5c   : > { %3536 = vmatprep.mubr.bf16.mxu1 %v5341_v16  ;;  %v6571_v16 = vld [vmem:[%s9219_s1 + $0x190] sm:$0xff]   ;;  %v468_v38 = vrot.slane %v467_v5, 4  ;;  %v475_v40 = vshrl.u32 %v7290_v10, 16  ;;  %v478_v46 = vshll.u32 %v7290_v10, 16  ;;  %v484_v19 = vshll.u32 %v7293_v11, 16  ;;  %6081 = vmatprep.subr.bf16.mxu0 %v6576_v48 }
  0x5d   : > { %v472_v6 = vrot.slane %v470_v54, 5  ;;  %v458_v37 = vrot.slane %v457_v4, 4  ;;  %6192 = vmatpush3.bf16.msra.mxu1 %v6571_v16  ;;  %v819_v34 = vsel %vm7030_vm5, %v5118_v35, %v818_v39  ;;  %v820_v25 = vrot.slane %v818_v39, 4  ;;  %v7339_v16 = vld [vmem:[%s6990_s17 + $0x54] sm:$0xf] }
  0x5e   : > { %v477_v51 = vrot.slane %v475_v40, 4  ;;  %v480_v53 = vrot.slane %v478_v46, 5  ;;  %v486_v54 = vrot.slane %v484_v19, 5  ;;  %v488_v59 = vshrl.u32 %v7293_v11, 16  ;;  %v7345_v39 = vld [vmem:[%s6990_s17 + $0x58] sm:$0xf]  ;;  %6193 = vmatprep.subr.bf16.mxu1 %v6578_v1 }
  0x5f   : > { %v473_v44 = vsel %vm7021_vm4, %v468_v38, %v472_v6  ;;  %v822_v57 = vsel %vm7030_vm5, %v820_v25, %v821_v15  ;;  %v494_v60 = vshll.u32 %v7306_v36, 16  ;;  %v1087_v62 = vshrl.u32 %v5141_v22, 16  ;;  %v6579_v15 = vld [vmem:[%s9219_s1 + $0x188] sm:$0xff]   ;;  %v7360_v48 = vld [vmem:[%s6990_s17 + $0x5c] sm:$0x1] }
  0x60   : > { %v481_v4 = vor.u32 %v480_v53, %v477_v51  ;;  %v1090_v5 = vshll.u32 %v5141_v22, 16  ;;  %v5343_v35 = vcombine.low %v5141_v22, %v7315_v27  ;;  %v5295_v19 = vcombine.low %v7290_v10, %v7293_v11  ;;  %v6585_v10 = vld [vmem:[%s9219_s1 + $0x100] sm:$0xff]  }
  0x61   : > { %v7341_v38 = vrot.slane %v1087_v62, 4  ;;  %v828_v25 = vrot.slane %v7306_v36, 5  ;;  %v508_v51 = vshll.u32 %v7345_v39, 16  ;;  %6194 = vmatpush3.bf16.msra.mxu1 %v6579_v15  ;;  %v6586_v36 = vld [vmem:[%s9219_s1 + $0x1c0] sm:$0xff]  }
  0x62   : > { %3376 = vmatmul.mubr.bf16.gmra.mxu0 %v5293_v29  ;;  %v463_v29 = vsel %vm7021_vm4, %v458_v37, %v462_v52  ;;  %v6577_v52 = vld [vmem:[%s9219_s1 + $0x108] sm:$0xff]   ;;  %v496_v37 = vrot.slane %v494_v60, 5  ;;  %v482_v40 = vrot.slane %v481_v4, 4  ;;  %v7350_v46 = vrot.slane %v1090_v5, 5  ;;  %v5143_v4 = vld [vmem:[%s6990_s17 + $0x60] sm:$0xf]  ;;  %6195 = vmatprep.subr.bf16.mxu1 %v6586_v36 }
  0x63   : > { %3537 = vmatmul.mubr.bf16.gmra.mxu1 %v5325_v2  ;;  %v5310_v50 = vcombine.low %v463_v29, %v473_v44  ;;  %v5326_v2 = vcombine.low %v819_v34, %v822_v57  ;;  %6082 = vmatpush3.bf16.msra.mxu0 %v6577_v52  ;;  %v5119_v29 = vrot.slane %v720_v45, 9  ;;  %v6584_v44 = vld [vmem:[%s9219_s1 + $0x140] sm:$0xff]   ;;  %v825_v34 = vrot.slane %v7293_v11, 5 }
  0x64   : > { %3544 = vmatprep.mubr.bf16.mxu1 %v5342_v26  ;;  %v490_v26 = vrot.slane %v488_v59, 4  ;;  %v487_v45 = vsel %vm7021_vm4, %v482_v40, %v486_v54  ;;  %v512_v11 = vshrl.u32 %v7345_v39, 16  ;;  %6083 = vmatprep.subr.bf16.mxu0 %v6584_v44  ;;  %v6587_v59 = vld [vmem:[%s9219_s1 + $0x180] sm:$0xff]   ;;  %v510_v62 = vrot.slane %v508_v51, 5 }
  0x65   : > { %3383 = vmatprep.mubr.bf16.mxu0 %v5310_v50  ;;  %v499_v50 = vshrl.u32 %v7339_v16, 16  ;;  %v826_v52 = vsel %vm7030_vm5, %v5119_v29, %v825_v34  ;;  %v827_v57 = vrot.slane %v825_v34, 4  ;;  %v1111_v15 = vshrl.u32 %v5143_v4, 16  ;;  %6196 = vmatpush3.bf16.msra.mxu1 %v6587_v59 }
  0x66   : > { %v491_v22 = vor.u32 %v490_v26, %v486_v54  ;;  %v514_v1 = vrot.slane %v512_v11, 4  ;;  %v1114_v40 = vshll.u32 %v5143_v4, 16 }
  0x67   : > { %v501_v54 = vrot.slane %v499_v50, 4  ;;  %6084 = vmatpush3.bf16.msra.mxu0 %v6585_v10  ;;  %v829_v26 = vsel %vm7030_vm5, %v827_v57, %v828_v25  ;;  %v721_v50 = vld [vmem:[%s6990_s17 + $0x54] sm:$0xe]  ;;  %v7393_v10 = vld [vmem:[%s6990_s17 + $0x64] sm:$0xf]  ;;  %v7395_v11 = vrot.slane %v1111_v15, 4 }
  0x68   : > { %v492_v53 = vrot.slane %v491_v22, 4  ;;  %v5327_v44 = vcombine.low %v826_v52, %v829_v26  ;;  %v515_v34 = vor.u32 %v514_v1, %v510_v62  ;;  %v832_v52 = vrot.slane %v7345_v39, 5 }
  0x69   : > { %v835_v57 = vrot.slane %v7360_v48, 5 }
  0x6a   : > { %3384 = vmatmul.mubr.bf16.gmra.mxu0 %v5294_v30  ;;  %v502_v30 = vshll.u32 %v7339_v16, 16  ;;  %v497_v5 = vsel %vm7021_vm4, %v492_v53, %v496_v37  ;;  %v7398_v37 = vld [vmem:[%s6990_s17 + $0x68] sm:$0x1]  ;;  %v516_v36 = vrot.slane %v515_v34, 4  ;;  %v5120_v53 = vrot.slane %v721_v50, 9 }
  0x6b   : > { %3545 = vmatmul.mubr.bf16.gmra.mxu1 %v5326_v2  ;;  %v518_v2 = vshll.u32 %v7360_v48, 16  ;;  %v5311_v29 = vcombine.low %v487_v45, %v497_v5  ;;  %v834_v5 = vrot.slane %v832_v52, 4  ;;  %v7420_v34 = vrot.slane %v1114_v40, 5 }
  0x6c   : > { %3552 = vmatprep.mubr.bf16.mxu1 %v5343_v35  ;;  %v504_v60 = vrot.slane %v502_v30, 5  ;;  %v7386_v35 = vld [vmem:[%s6990_s17 + $0x64] sm:$0xf]  ;;  %v7390_v30 = vld [vmem:[%s6990_s17 + $0x60] sm:$0xf]  ;;  %v833_v48 = vsel %vm7030_vm5, %v5120_v53, %v832_v52 }
  0x6d   : > { %9225 = vst [vmem:[#allocation12_spill] sm:$0xff] %v7386_v35  ;;  %v520_v51 = vrot.slane %v518_v2, 5  ;;  %3391 = vmatprep.mubr.bf16.mxu0 %v5311_v29  ;;  %v5344_v45 = vcombine.low %v5143_v4, %v7386_v35  ;;  %v526_v1 = vshll.u32 %v7390_v30, 16  ;;  %v7411_v2 = vld [vmem:[%s6990_s17 + $0x6c] sm:$0xf]  ;;  %v536_v29 = vshrl.u32 %v7393_v10, 16 }
  0x6e   : > { %v505_v22 = vor.u32 %v504_v60, %v501_v54  ;;  %v523_v54 = vshrl.u32 %v7390_v30, 16  ;;  %v1135_v40 = vshrl.u32 %v7411_v2, 16  ;;  %v7641_v35 = vld [vmem:[%s6990_s17 + $0xa8] sm:$0xf] }
  0x6f   : > { %v521_v60 = vsel %vm7021_vm4, %v516_v36, %v520_v51  ;;  %v528_v15 = vrot.slane %v526_v1, 5  ;;  %v5296_v51 = vcombine.low %v7339_v16, %v7345_v39  ;;  %v722_v36 = vld [vmem:[%s6990_s17 + $0x60] sm:$0xe]  ;;  %v1138_v39 = vshll.u32 %v7411_v2, 16 }
  0x70   : > { %v506_v25 = vrot.slane %v505_v22, 4  ;;  %v525_v26 = vrot.slane %v523_v54, 4  ;;  %v7418_v22 = vld [vmem:[%s6990_s17 + $0x70] sm:$0xf]  ;;  %v538_v54 = vrot.slane %v536_v29, 4  ;;  %v7481_v42 = vrot.slane %v1135_v40, 4 }
  0x71   : > { %9226 = vst [vmem:[#allocation13_spill] sm:$0xff] %v7418_v22  ;;  %v5345_v1 = vcombine.low %v7411_v2, %v7418_v22  ;;  %v320_v29 = vld [vmem:[%s6990_s17 + $0x74] sm:$0x1]  ;;  %v7554_v22 = vld [vmem:[%s6990_s17 + $0x90] sm:$0xf] }
  0x72   : > { %3392 = vmatmul.mubr.bf16.gmra.mxu0 %v5295_v19  ;;  %v511_v59 = vsel %vm7021_vm4, %v506_v25, %v510_v62  ;;  %v532_v19 = vshll.u32 %v7393_v10, 16  ;;  %v836_v25 = vsel %vm7030_vm5, %v834_v5, %v835_v57  ;;  %v529_v52 = vor.u32 %v528_v15, %v525_v26  ;;  %v7449_v26 = vld [vmem:[%s9189_s2 + $0x38] sm:$0xff]   ;;  %9228 = vst [vmem:[#allocation15_spill] sm:$0xff] %v7481_v42 }
  0x73   : > { %3553 = vmatmul.mubr.bf16.gmra.mxu1 %v5327_v44  ;;  %v5312_v4 = vcombine.low %v511_v59, %v521_v60  ;;  %v542_v44 = vshll.u32 %v7398_v37, 16  ;;  %v5328_v53 = vcombine.low %v833_v48, %v836_v25  ;;  %v7435_v59 = vld [vmem:[%s6990_s17 + $0x6c] sm:$0xf]  ;;  %v7438_v60 = vld [vmem:[%s6990_s17 + $0x70] sm:$0xf]  ;;  %v5121_v48 = vrot.slane %v722_v36, 9  ;;  %6389 = vmatprep.subr.bf16.mxu1 %v7449_v26 }
  0x74   : > { %3560 = vmatprep.mubr.bf16.mxu1 %v5344_v45  ;;  %v534_v62 = vrot.slane %v532_v19, 5  ;;  %v7431_v45 = vld [vmem:[%s9219_s1 + $0x238] sm:$0xff]   ;;  %v530_v19 = vrot.slane %v529_v52, 4  ;;  %v839_v5 = vrot.slane %v7393_v10, 5  ;;  %v842_v15 = vrot.slane %v7398_v37, 5 }
  0x75   : > { %3399 = vmatprep.mubr.bf16.mxu0 %v5312_v4  ;;  %v544_v16 = vrot.slane %v542_v44, 5  ;;  %6341 = vmatprep.subr.bf16.mxu0 %v7431_v45  ;;  %v547_v44 = vshrl.u32 %v7435_v59, 16  ;;  %v550_v25 = vshll.u32 %v7435_v59, 16  ;;  %v556_v36 = vshll.u32 %v7438_v60, 16  ;;  %v7461_v57 = vld [vmem:[%s6990_s17 + $0x78] sm:$0xf] }
  0x76   : > { %v539_v4 = vor.u32 %v538_v54, %v534_v62  ;;  %v535_v52 = vsel %vm7021_vm4, %v530_v19, %v534_v62  ;;  %v7464_v37 = vld [vmem:[%s6990_s17 + $0x7c] sm:$0xf]  ;;  %v560_v62 = vshrl.u32 %v7438_v60, 16  ;;  %v723_v19 = vld [vmem:[%s6990_s17 + $0x6c] sm:$0xe]  ;;  %v1159_v17 = vshrl.u32 %v7461_v57, 16 }
  0x77   : > { %9227 = vst [vmem:[#allocation14_spill] sm:$0xff] %v7464_v37  ;;  %v549_v50 = vrot.slane %v547_v44, 4  ;;  %v552_v6 = vrot.slane %v550_v25, 5  ;;  %v558_v61 = vrot.slane %v556_v36, 5  ;;  %v7479_v36 = vld [vmem:[%s6990_s17 + $0x7c] sm:$0xf] }
  0x78   : > { %v540_v54 = vrot.slane %v539_v4, 4  ;;  %v5297_v4 = vcombine.low %v7390_v30, %v7393_v10  ;;  %v562_v28 = vrot.slane %v560_v62, 4 }
  0x79   : > { %v553_v25 = vor.u32 %v552_v6, %v549_v50  ;;  %v5122_v6 = vrot.slane %v723_v19, 9  ;;  %v846_v50 = vrot.slane %v7438_v60, 5  ;;  %v580_v19 = vshll.u32 %v7479_v36, 16 }
  0x7a   : > { %3400 = vmatmul.mubr.bf16.gmra.mxu0 %v5296_v51  ;;  %v840_v51 = vsel %vm7030_vm5, %v5121_v48, %v839_v5  ;;  %v563_v10 = vor.u32 %v562_v28, %v558_v61  ;;  %v571_v28 = vshrl.u32 %v7476_v8, 16 }
  0x7b   : > { %3561 = vmatmul.mubr.bf16.gmra.mxu1 %v5328_v53  ;;  %v841_v53 = vrot.slane %v839_v5, 4  ;;  %v566_v5 = vshll.u32 %v320_v29, 16  ;;  %v554_v30 = vrot.slane %v553_v25, 4  ;;  %v848_v62 = vrot.slane %v846_v50, 4 }
  0x7c   : > { %3568 = vmatprep.mubr.bf16.mxu1 %v5345_v1  ;;  %v545_v1 = vsel %vm7021_vm4, %v540_v54, %v544_v16  ;;  %v7485_v16 = vld [vmem:[%s6990_s17 + $0x80] sm:$0x1] }
  0x7d   : > { %v843_v48 = vsel %vm7030_vm5, %v841_v53, %v842_v15  ;;  %v5313_v14 = vcombine.low %v535_v52, %v545_v1  ;;  %v568_v54 = vrot.slane %v566_v5, 5  ;;  %v5346_v15 = vcombine.low %v7461_v57, %v7464_v37  ;;  %v7500_v1 = vld [vmem:[%s6990_s17 + $0x84] sm:$0xf] }
  0x7e   : > { %v5329_v44 = vcombine.low %v840_v51, %v843_v48  ;;  %v1162_v52 = vshll.u32 %v7461_v57, 16  ;;  %v849_v51 = vrot.slane %v320_v29, 5  ;;  %v559_v40 = vsel %vm7021_vm4, %v554_v30, %v558_v61 }
  0x7f   : > { %3407 = vmatprep.mubr.bf16.mxu0 %v5313_v14  ;;  %v564_v14 = vrot.slane %v563_v10, 4  ;;  %v574_v53 = vshll.u32 %v7476_v8, 16  ;;  %v847_v57 = vsel %vm7030_vm5, %v5122_v6, %v846_v50  ;;  %v584_v29 = vshrl.u32 %v7479_v36, 16  ;;  %v724_v6 = vld [vmem:[%s6990_s17 + $0x78] sm:$0xe] }
  0x80   : > { %v590_v5 = vshll.u32 %v7485_v16, 16  ;;  %v850_v30 = vsel %vm7030_vm5, %v848_v62, %v849_v51  ;;  %v582_v10 = vrot.slane %v580_v19, 5  ;;  %v7513_v50 = vrot.slane %v1138_v39, 5  ;;  %v7522_v62 = vld [vmem:[%s6990_s17 + $0x84] sm:$0xf] }
  0x81   : > { %v569_v61 = vsel %vm7021_vm4, %v564_v14, %v568_v54  ;;  %v576_v48 = vrot.slane %v574_v53, 5  ;;  %v5298_v54 = vcombine.low %v7435_v59, %v7438_v60  ;;  %v5330_v14 = vcombine.low %v847_v57, %v850_v30  ;;  %v7525_v19 = vld [vmem:[%s6990_s17 + $0x88] sm:$0xf] }
  0x82   : > { %3408 = vmatmul.mubr.bf16.gmra.mxu0 %v5297_v4  ;;  %v573_v4 = vrot.slane %v571_v28, 4  ;;  %v5314_v25 = vcombine.low %v559_v40, %v569_v61  ;;  %9230 = vst [vmem:[#allocation17_spill] sm:$0xff] %v7513_v50  ;;  %v7517_v53 = vrot.slane %v1159_v17, 4  ;;  %v592_v61 = vrot.slane %v590_v5, 5 }
  0x83   : > { %3569 = vmatmul.mubr.bf16.gmra.mxu1 %v5329_v44  ;;  %v7506_v44 = vld [vmem:[%s6990_s17 + $0x88] sm:$0xf]  ;;  %v7527_v2 = vrot.slane %v1162_v52, 5  ;;  %v5123_v39 = vrot.slane %v724_v6, 9  ;;  %v1183_v17 = vshrl.u32 %v7500_v1, 16  ;;  %v595_v5 = vshrl.u32 %v7522_v62, 16 }
  0x84   : > { %3576 = vmatprep.mubr.bf16.mxu1 %v5346_v15  ;;  %9229 = vst [vmem:[#allocation16_spill] sm:$0xff] %v7506_v44  ;;  %v586_v15 = vrot.slane %v584_v29, 4  ;;  %v577_v28 = vor.u32 %v576_v48, %v573_v4  ;;  %3415 = vmatprep.mubr.bf16.mxu0 %v5314_v25  ;;  %9231 = vst [vmem:[#allocation18_spill] sm:$0xff] %v7517_v53  ;;  %v5347_v51 = vcombine.low %v7500_v1, %v7506_v44  ;;  %v322_v48 = vld [vmem:[%s6990_s17 + $0x8c] sm:$0x1] }
  0x85   : > { %9232 = vst [vmem:[#allocation19_spill] sm:$0xff] %v7527_v2  ;;  %v853_v29 = vrot.slane %v7479_v36, 5  ;;  %v856_v4 = vrot.slane %v7485_v16, 5  ;;  %v598_v25 = vshll.u32 %v7522_v62, 16  ;;  %v604_v30 = vshll.u32 %v7525_v19, 16 }
  0x86   : > { %v587_v40 = vor.u32 %v586_v15, %v582_v10  ;;  %v578_v60 = vrot.slane %v577_v28, 4  ;;  %v7540_v15 = vld [vmem:[%s6990_s17 + $0x90] sm:$0xf]  ;;  %v7543_v6 = vld [vmem:[%s6990_s17 + $0x94] sm:$0xf]  ;;  %v614_v53 = vshll.u32 %v322_v48, 16 }
  0x87   : > { %9233 = vst [vmem:[#allocation20_spill] sm:$0xff] %v7543_v6  ;;  %v725_v28 = vld [vmem:[%s6990_s17 + $0x84] sm:$0xe]  ;;  %v600_v59 = vrot.slane %v598_v25, 5  ;;  %v606_v3 = vrot.slane %v604_v30, 5  ;;  %v7564_v25 = vrot.slane %v1183_v17, 4 }
  0x88   : > { %v588_v57 = vrot.slane %v587_v40, 4  ;;  %v583_v52 = vsel %vm7021_vm4, %v578_v60, %v582_v10  ;;  %v855_v10 = vrot.slane %v853_v29, 4  ;;  %v597_v60 = vrot.slane %v595_v5, 4  ;;  %v7586_v30 = vld [vmem:[%s6990_s17 + $0xa0] sm:$0xf] }
  0x89   : > { %v616_v5 = vrot.slane %v614_v53, 5  ;;  %9234 = vst [vmem:[#allocation21_spill] sm:$0xff] %v7564_v25  ;;  %v7572_v53 = vld [vmem:[%s6990_s17 + $0x98] sm:$0x1] }
  0x8a   : > { %3416 = vmatmul.mubr.bf16.gmra.mxu0 %v5298_v54  ;;  %v593_v16 = vsel %vm7021_vm4, %v588_v57, %v592_v61  ;;  %v854_v54 = vsel %vm7030_vm5, %v5123_v39, %v853_v29  ;;  %v857_v37 = vsel %vm7030_vm5, %v855_v10, %v856_v4  ;;  %v5299_v61 = vcombine.low %v7476_v8, %v7479_v36  ;;  %v7559_v57 = vld [vmem:[%s6990_s17 + $0x94] sm:$0xf] }
  0x8b   : > { %3577 = vmatmul.mubr.bf16.gmra.mxu1 %v5330_v14  ;;  %v608_v14 = vshrl.u32 %v7525_v19, 16  ;;  %v5315_v40 = vcombine.low %v583_v52, %v593_v16  ;;  %v601_v39 = vor.u32 %v600_v59, %v597_v60  ;;  %v1186_v29 = vshll.u32 %v7500_v1, 16 }
  0x8c   : > { %3584 = vmatprep.mubr.bf16.mxu1 %v5347_v51  ;;  %v5331_v51 = vcombine.low %v854_v54, %v857_v37  ;;  %v5348_v4 = vcombine.low %v7540_v15, %v7543_v6  ;;  %v5124_v10 = vrot.slane %v725_v28, 9  ;;  %v860_v8 = vrot.slane %v7525_v19, 5 }
  0x8d   : > { %v610_v2 = vrot.slane %v608_v14, 4  ;;  %3423 = vmatprep.mubr.bf16.mxu0 %v5315_v40  ;;  %v602_v16 = vrot.slane %v601_v39, 4  ;;  %v863_v37 = vrot.slane %v322_v48, 5  ;;  %v619_v36 = vshrl.u32 %v7554_v22, 16  ;;  %v5153_v39 = vld [vmem:[%s6990_s17 + $0x9c] sm:$0xf] }
  0x8e   : > { %v628_v59 = vshll.u32 %v7559_v57, 16  ;;  %v632_v17 = vshrl.u32 %v7559_v57, 16  ;;  %v861_v54 = vsel %vm7030_vm5, %v5124_v10, %v860_v8  ;;  %v862_v28 = vrot.slane %v860_v8, 4 }
  0x8f   : > { %v611_v52 = vor.u32 %v610_v2, %v606_v3  ;;  %v607_v1 = vsel %vm7021_vm4, %v602_v16, %v606_v3  ;;  %v622_v2 = vshll.u32 %v7554_v22, 16  ;;  %v621_v40 = vrot.slane %v619_v36, 4 }
  0x90   : > { %v638_v16 = vshll.u32 %v7572_v53, 16  ;;  %v5300_v10 = vcombine.low %v7522_v62, %v7525_v19  ;;  %v5349_v62 = vcombine.low %v5153_v39, %v7586_v30  ;;  %v7601_v19 = vld [vmem:[%s6990_s17 + $0xa0] sm:$0xf] }
  0x91   : > { %v612_v14 = vrot.slane %v611_v52, 4  ;;  %v624_v60 = vrot.slane %v622_v2, 5  ;;  %v864_v52 = vsel %vm7030_vm5, %v862_v28, %v863_v37  ;;  %v7591_v2 = vrot.slane %v1186_v29, 5 }
  0x92   : > { %3424 = vmatmul.mubr.bf16.gmra.mxu0 %v5299_v61  ;;  %v630_v61 = vrot.slane %v628_v59, 5  ;;  %v1207_v37 = vshrl.u32 %v7540_v15, 16  ;;  %v1210_v59 = vshll.u32 %v7540_v15, 16  ;;  %v7609_v15 = vld [vmem:[%s6990_s17 + $0xa4] sm:$0x1] }
  0x93   : > { %3585 = vmatmul.mubr.bf16.gmra.mxu1 %v5331_v51  ;;  %v617_v48 = vsel %vm7021_vm4, %v612_v14, %v616_v5  ;;  %v634_v51 = vrot.slane %v632_v17, 4  ;;  %v1231_v5 = vshrl.u32 %v5153_v39, 16  ;;  %v5332_v14 = vcombine.low %v861_v54, %v864_v52  ;;  %9235 = vst [vmem:[#allocation22_spill] sm:$0xff] %v7591_v2 }
  0x94   : > { %3592 = vmatprep.mubr.bf16.mxu1 %v5348_v4  ;;  %v5316_v3 = vcombine.low %v607_v1, %v617_v48  ;;  %v1234_v4 = vshll.u32 %v5153_v39, 16  ;;  %v625_v8 = vor.u32 %v624_v60, %v621_v40  ;;  %v726_v1 = vld [vmem:[%s6990_s17 + $0x90] sm:$0xe]  ;;  %v640_v17 = vrot.slane %v638_v16, 5  ;;  %v7596_v48 = vld [vmem:[%s6990_s17 + $0x9c] sm:$0xf] }
  0x95   : > { %v635_v36 = vor.u32 %v634_v51, %v630_v61  ;;  %v7603_v54 = vrot.slane %v1231_v5, 4  ;;  %v1244_v40 = vshrl.u32 %v7586_v30, 16  ;;  %v5125_v60 = vrot.slane %v726_v1, 9  ;;  %v7627_v1 = vld [vmem:[%s6990_s17 + $0xac] sm:$0xf] }
  0x96   : > { %3431 = vmatprep.mubr.bf16.mxu0 %v5316_v3  ;;  %v626_v28 = vrot.slane %v625_v8, 4  ;;  %v1240_v3 = vshll.u32 %v7586_v30, 16  ;;  %v7605_v29 = vrot.slane %v1234_v4, 5  ;;  %v867_v52 = vrot.slane %v7559_v57, 5 }
  0x97   : > { %v636_v44 = vrot.slane %v635_v36, 4  ;;  %v870_v16 = vrot.slane %v7572_v53, 5  ;;  %v5301_v30 = vcombine.low %v7554_v22, %v7559_v57  ;;  %v643_v4 = vshrl.u32 %v7596_v48, 16  ;;  %v727_v53 = vld [vmem:[%s6990_s17 + $0x9c] sm:$0xe] }
  0x98   : > { %v631_v51 = vsel %vm7021_vm4, %v626_v28, %v630_v61  ;;  %v868_v61 = vsel %vm7030_vm5, %v5125_v60, %v867_v52  ;;  %v869_v8 = vrot.slane %v867_v52, 4  ;;  %v656_v36 = vshrl.u32 %v7601_v19, 16 }
  0x99   : > { %v641_v39 = vsel %vm7021_vm4, %v636_v44, %v640_v17  ;;  %v652_v44 = vshll.u32 %v7601_v19, 16  ;;  %v645_v17 = vrot.slane %v643_v4, 4  ;;  %v662_v57 = vshll.u32 %v7609_v15, 16 }
  0x9a   : > { %3432 = vmatmul.mubr.bf16.gmra.mxu0 %v5300_v10  ;;  %v5317_v5 = vcombine.low %v631_v51, %v641_v39  ;;  %v646_v10 = vshll.u32 %v7596_v48, 16  ;;  %v658_v60 = vrot.slane %v656_v36, 4  ;;  %v7633_v52 = vrot.slane %v1207_v37, 4  ;;  %v7647_v36 = vld [vmem:[%s6990_s17 + $0xac] sm:$0xf] }
  0x9b   : > { %3593 = vmatmul.mubr.bf16.gmra.mxu1 %v5332_v14  ;;  %v5155_v14 = vld [vmem:[%s6990_s17 + $0xa8] sm:$0xf]  ;;  %v654_v51 = vrot.slane %v652_v44, 5  ;;  %v7638_v4 = vrot.slane %v1240_v3, 5  ;;  %v664_v42 = vrot.slane %v662_v57, 5  ;;  %v5126_v44 = vrot.slane %v727_v53, 9 }
  0x9c   : > { %3600 = vmatprep.mubr.bf16.mxu1 %v5349_v62  ;;  %3439 = vmatprep.mubr.bf16.mxu0 %v5317_v5  ;;  %v648_v22 = vrot.slane %v646_v10, 5  ;;  %v1255_v28 = vshrl.u32 %v5155_v14, 16  ;;  %v871_v62 = vsel %vm7030_vm5, %v869_v8, %v870_v16  ;;  %v1258_v39 = vshll.u32 %v5155_v14, 16  ;;  %v325_v53 = vld [vmem:[%s6990_s17 + $0xb0] sm:$0x1] }
  0x9d   : > { %v5333_v25 = vcombine.low %v868_v61, %v871_v62  ;;  %v7636_v5 = vrot.slane %v1210_v59, 5  ;;  %9236 = vst [vmem:[#allocation23_spill] sm:$0xff] %v7638_v4  ;;  %v659_v10 = vor.u32 %v658_v60, %v654_v51  ;;  %v5350_v37 = vcombine.low %v5155_v14, %v7627_v1 }
  0x9e   : > { %v649_v50 = vor.u32 %v648_v22, %v645_v17  ;;  %v7649_v61 = vrot.slane %v1244_v40, 4  ;;  %v7651_v3 = vrot.slane %v1255_v28, 4  ;;  %v7653_v17 = vrot.slane %v1258_v39, 5  ;;  %v5157_v39 = vld [vmem:[%s6990_s17 + $0xb4] sm:$0xf] }
  0x9f   : > { %v660_v59 = vrot.slane %v659_v10, 4  ;;  %v877_v14 = vrot.slane %v7609_v15, 5  ;;  %v667_v40 = vshrl.u32 %v7641_v35, 16  ;;  %v670_v57 = vshll.u32 %v7641_v35, 16 }
  0xa0   : > { %v650_v8 = vrot.slane %v649_v50, 4  ;;  %9237 = vst [vmem:[#allocation24_spill] sm:$0xff] %v7649_v61  ;;  %v874_v50 = vrot.slane %v7601_v19, 5  ;;  %v676_v28 = vshll.u32 %v7647_v36, 16  ;;  %v1261_v16 = vor.u32 %v7653_v17, %v7651_v3  ;;  %v7691_v17 = vld [vmem:[%s6990_s17 + $0xb8] sm:$0xf] }
  0xa1   : > { %v669_v60 = vrot.slane %v667_v40, 4  ;;  %v672_v10 = vrot.slane %v670_v57, 5  ;;  %v881_v3 = vrot.slane %v7647_v36, 5 }
  0xa2   : > { %3440 = vmatmul.mubr.bf16.gmra.mxu0 %v5301_v30  ;;  %v655_v22 = vsel %vm7021_vm4, %v650_v8, %v654_v51  ;;  %v5302_v30 = vcombine.low %v7596_v48, %v7601_v19  ;;  %v875_v51 = vsel %vm7030_vm5, %v5126_v44, %v874_v50  ;;  %v876_v15 = vrot.slane %v874_v50, 4  ;;  %v728_v44 = vld [vmem:[%s6990_s17 + $0xa8] sm:$0xe] }
  0xa3   : > { %3601 = vmatmul.mubr.bf16.gmra.mxu1 %v5333_v25  ;;  %v665_v25 = vsel %vm7021_vm4, %v660_v59, %v664_v42  ;;  %v678_v8 = vrot.slane %v676_v28, 5  ;;  %v680_v42 = vshrl.u32 %v7647_v36, 16  ;;  %v7672_v59 = vld [vmem:[%s6990_s17 + $0xb8] sm:$0xf]  ;;  %v1264_v48 = vshll.u32 %v7627_v1, 16 }
  0xa4   : > { %3608 = vmatprep.mubr.bf16.mxu1 %v5350_v37  ;;  %v5318_v62 = vcombine.low %v655_v22, %v665_v25  ;;  %v686_v37 = vshll.u32 %v325_v53, 16  ;;  %v878_v19 = vsel %vm7030_vm5, %v876_v15, %v877_v14  ;;  %v1279_v22 = vshrl.u32 %v5157_v39, 16  ;;  %v7680_v28 = vld [vmem:[%s6990_s17 + $0xb4] sm:$0xf] }
  0xa5   : > { %v1282_v25 = vshll.u32 %v5157_v39, 16  ;;  %v1268_v50 = vshrl.u32 %v7627_v1, 16  ;;  %v5334_v40 = vcombine.low %v875_v51, %v878_v19  ;;  %v673_v2 = vor.u32 %v672_v10, %v669_v60 }
  0xa6   : > { %3447 = vmatprep.mubr.bf16.mxu0 %v5318_v62  ;;  %v682_v57 = vrot.slane %v680_v42, 4  ;;  %v1281_v62 = vrot.slane %v1279_v22, 4  ;;  %v1288_v4 = vshll.u32 %v7672_v59, 16  ;;  %v688_v6 = vrot.slane %v686_v37, 5  ;;  %v326_v37 = vld [vmem:[%s6990_s17 + $0xbc] sm:$0x1] }
  0xa7   : > { %v1284_v61 = vrot.slane %v1282_v25, 5  ;;  %v674_v14 = vrot.slane %v673_v2, 4  ;;  %v5351_v1 = vcombine.low %v5157_v39, %v7672_v59  ;;  %v1292_v51 = vshrl.u32 %v7672_v59, 16 }
  0xa8   : > { %v683_v15 = vor.u32 %v682_v57, %v678_v8  ;;  %v5303_v60 = vcombine.low %v7641_v35, %v7647_v36  ;;  %v5127_v10 = vrot.slane %v728_v44, 9  ;;  %v884_v2 = vrot.slane %v325_v53, 5 }
  0xa9   : > { %v679_v42 = vsel %vm7021_vm4, %v674_v14, %v678_v8  ;;  %v691_v39 = vshrl.u32 %v7680_v28, 16  ;;  %v1285_v59 = vor.u32 %v1284_v61, %v1281_v62  ;;  %v883_v19 = vrot.slane %v881_v3, 4  ;;  %v7707_v62 = vld [vmem:[%s6990_s17 + $0xc0] sm:$0xf]  ;;  %v7710_v14 = vld [vmem:[%s6990_s17 + $0xc4] sm:$0xf] }
  0xaa   : > { %3448 = vmatmul.mubr.bf16.gmra.mxu0 %v5302_v30  ;;  %v684_v30 = vrot.slane %v683_v15, 4  ;;  %v882_v35 = vsel %vm7030_vm5, %v5127_v10, %v881_v3  ;;  %v694_v36 = vshll.u32 %v7680_v28, 16  ;;  %v700_v8 = vshll.u32 %v7691_v17, 16 }
  0xab   : > { %3609 = vmatmul.mubr.bf16.gmra.mxu1 %v5334_v40  ;;  %v693_v25 = vrot.slane %v691_v39, 4  ;;  %v704_v44 = vshrl.u32 %v7691_v17, 16  ;;  %v885_v40 = vsel %vm7030_vm5, %v883_v19, %v884_v2  ;;  %v710_v57 = vshll.u32 %v326_v37, 16  ;;  %v729_v19 = vld [vmem:[%s6990_s17 + $0xb4] sm:$0xe] }
  0xac   : > { %3616 = vmatprep.mubr.bf16.mxu1 %v5351_v1  ;;  %v689_v22 = vsel %vm7021_vm4, %v684_v30, %v688_v6  ;;  %v696_v61 = vrot.slane %v694_v36, 5  ;;  %v9238_v15 = vor.u32 %v7605_v29, %v7603_v54  ;;  %v5335_v1 = vcombine.low %v882_v35, %v885_v40 }
  0xad   : > { %v5319_v53 = vcombine.low %v679_v42, %v689_v22  ;;  %v702_v10 = vrot.slane %v700_v8, 5  ;;  %v706_v3 = vrot.slane %v704_v44, 4  ;;  %v7717_v42 = vrot.slane %v1261_v16, 4  ;;  %v5161_v22 = vld [vmem:[%s6990_s17 + $0x14] sm:$0x1] }
  0xae   : > { %v7715_v6 = vrot.slane %v9238_v15, 4  ;;  %v7719_v30 = vrot.slane %v1264_v48, 5  ;;  %v7721_v2 = vrot.slane %v1268_v50, 4  ;;  %v697_v39 = vor.u32 %v696_v61, %v693_v25  ;;  %v5177_v16 = vld [vmem:[%s6990_s17 + $0xc] sm:$0xe] }
  0xaf   : > { %3455 = vmatprep.mubr.bf16.mxu0 %v5319_v53  ;;  %v7724_v36 = vrot.slane %v1288_v4, 5  ;;  %v707_v54 = vor.u32 %v706_v3, %v702_v10  ;;  %v712_v29 = vrot.slane %v710_v57, 5  ;;  %v5352_v35 = vcombine.low %v7707_v62, %v7710_v14  ;;  %v7736_v44 = vld [vmem:[%s6990_s17 + $0x18] sm:$0xf] }
  0xb0   : > { %v7730_v8 = vrot.slane %v1285_v59, 4  ;;  %v7732_v48 = vrot.slane %v1292_v51, 4  ;;  %v698_v50 = vrot.slane %v697_v39, 4  ;;  %v1303_v25 = vshrl.u32 %v7707_v62, 16 }
  0xb1   : > { %v708_v4 = vrot.slane %v707_v54, 4  ;;  %v5128_v53 = vrot.slane %v729_v19, 9  ;;  %v888_v40 = vrot.slane %v7691_v17, 5  ;;  %v5304_v51 = vcombine.low %v7680_v28, %v7691_v17  ;;  %v7749_v19 = vld [vmem:[%s6990_s17 + $0x1c] sm:$0xf] }
  0xb2   : > { %3456 = vmatmul.mubr.bf16.gmra.mxu0 %v5303_v60  ;;  %v703_v59 = vsel %vm7021_vm4, %v698_v50, %v702_v10  ;;  %v891_v61 = vrot.slane %v326_v37, 5  ;;  %v962_v57 = vshll.u32 %v5161_v22, 16  ;;  %v5193_v39 = vrot.slane %v5177_v16, 9  ;;  %v5241_v17 = vld [vmem:[%s6990_s17 + $0x20] sm:$0x1] }
  0xb3   : > { %3617 = vmatmul.mubr.bf16.gmra.mxu1 %v5335_v1  ;;  %v713_v15 = vsel %vm7021_vm4, %v708_v4, %v712_v29  ;;  %v889_v1 = vsel %vm7030_vm5, %v5128_v53, %v888_v40  ;;  %v890_v3 = vrot.slane %v888_v40, 4  ;;  %v9239_v50 = vrot.slane %v7011_v43, 5 }
  0xb4   : > { %3624 = vmatprep.mubr.bf16.mxu1 %v5352_v35  ;;  %v5320_v54 = vcombine.low %v703_v59, %v713_v15  ;;  %v964_v10 = vrot.slane %v962_v57, 5  ;;  %v1395_v4 = vrot.slane %v5161_v22, 5  ;;  %v1552_v53 = vshrl.u32 %v7736_v44, 16  ;;  %v7778_v35 = vld [vmem:[%s6990_s17 + $0x28] sm:$0xf] }
  0xb5   : > { %v1394_v28 = vrot.slane %v9239_v50, 4  ;;  %v892_v37 = vsel %vm7030_vm5, %v890_v3, %v891_v61  ;;  %v9240_v29 = vmov %v9239_v50  ;;  %v1555_v59 = vshll.u32 %v7736_v44, 16  ;;  %v5178_v50 = vld [vmem:[%s6990_s17 + $0x18] sm:$0xe] }
  0xb6   : > { %v1393_v16 = vsel %vm7030_vm5, %v5193_v39, %v9240_v29  ;;  %3463 = vmatprep.mubr.bf16.mxu0 %v5320_v54  ;;  %v5336_v40 = vcombine.low %v889_v1, %v892_v37  ;;  %v1561_v57 = vshll.u32 %v7749_v19, 16  ;;  %v1565_v15 = vshrl.u32 %v7749_v19, 16  ;;  %v7772_v1 = vld [vmem:[%s6990_s17 + $0x20] sm:$0x1]  ;;  %v7775_v39 = vld [vmem:[%s6990_s17 + $0x24] sm:$0xf] }
  0xb7   : > { %v1396_v43 = vsel %vm7030_vm5, %v1394_v28, %v1395_v4  ;;  %v1554_v61 = vrot.slane %v1552_v53, 4  ;;  %v1571_v3 = vshll.u32 %v5241_v17, 16  ;;  %v965_v22 = vsel %vm7021_vm4, %v7063_v18, %v964_v10  ;;  %v5242_v53 = vld [vmem:[%s6990_s17 + $0x2c] sm:$0x1] }
  0xb8   : > { %v5369_v54 = vcombine.low %v1393_v16, %v1396_v43  ;;  %v1557_v37 = vrot.slane %v1555_v59, 5  ;;  %v1563_v29 = vrot.slane %v1561_v57, 5  ;;  %v9241_v17 = vsel %vm7021_vm4, %v7041_v7, %v7025_v58  ;;  %v6622_v59 = vld [vmem:[%s6990_s17 + $0x1c] sm:$0xf] }
  0xb9   : > { %v1573_v28 = vrot.slane %v1571_v3, 5  ;;  %v7785_v4 = vcombine.low %v9241_v17, %v965_v22  ;;  %v5385_v18 = vcombine.low %v7736_v44, %v7749_v19  ;;  %v5194_v10 = vrot.slane %v5178_v50, 9 }
  0xba   : > { %3464 = vmatmul.mubr.bf16.gmra.mxu0 %v5304_v51  ;;  %v1567_v51 = vrot.slane %v1565_v15, 4  ;;  %v1558_v16 = vor.u32 %v1557_v37, %v1554_v61  ;;  %v1399_v57 = vrot.slane %v6622_v59, 5  ;;  %v1402_v15 = vrot.slane %v7772_v1, 5 }
  0xbb   : > { %3625 = vmatmul.mubr.bf16.gmra.mxu1 %v5336_v40  ;;  %3665 = vmatprep.mubr.bf16.mxu0 %v5369_v54  ;;  %v1576_v43 = vshrl.u32 %v7775_v39, 16  ;;  %v1579_v3 = vshll.u32 %v7775_v39, 16  ;;  %v1585_v58 = vshll.u32 %v7778_v35, 16  ;;  %v1589_v7 = vshrl.u32 %v7778_v35, 16 }
  0xbc   : > { %v1568_v40 = vor.u32 %v1567_v51, %v1563_v29  ;;  %v1559_v22 = vrot.slane %v1558_v16, 4  ;;  %v1400_v44 = vsel %vm7030_vm5, %v5194_v10, %v1399_v57  ;;  %v1401_v19 = vrot.slane %v1399_v57, 4  ;;  %v6595_v10 = vld [vmem:[%s9219_s1 + $0x230] sm:$0xff]  }
  0xbd   : > { %v1578_v50 = vrot.slane %v1576_v43, 4  ;;  %v1581_v61 = vrot.slane %v1579_v3, 5  ;;  %v1587_v54 = vrot.slane %v1585_v58, 5  ;;  %v1591_v37 = vrot.slane %v1589_v7, 4 }
  0xbe   : > { %v1569_v17 = vrot.slane %v1568_v40, 4  ;;  %v1564_v51 = vsel %vm7021_vm4, %v1559_v22, %v1563_v29  ;;  %v1403_v16 = vsel %vm7030_vm5, %v1401_v19, %v1402_v15  ;;  %v1595_v40 = vshll.u32 %v5242_v53, 16  ;;  %v5179_v29 = vld [vmem:[%s6990_s17 + $0x24] sm:$0xe]  ;;  %v6599_v19 = vld [vmem:[%s9219_s1 + $0x228] sm:$0xff]  }
  0xbf   : > { %v5370_v43 = vcombine.low %v1400_v44, %v1403_v16  ;;  %v1582_v3 = vor.u32 %v1581_v61, %v1578_v50  ;;  %v1592_v58 = vor.u32 %v1591_v37, %v1587_v54  ;;  %v9200_v7 = vrot.slane %v7778_v35, 5  ;;  %v7820_v44 = vld [vmem:[%s6990_s17 + $0x30] sm:$0xf] }
  0xc0   : > { %v1574_v60 = vsel %vm7021_vm4, %v1569_v17, %v1573_v28  ;;  %v6596_v28 = vld [vmem:[%s9189_s2 + $0x30] sm:$0xff]   ;;  %v1597_v15 = vrot.slane %v1595_v40, 5  ;;  %v2011_v22 = vrot.slane %v5242_v53, 5  ;;  %v7817_v17 = vld [vmem:[%s6990_s17 + $0x2c] sm:$0x1]  ;;  %v976_v61 = vshll.u32 %v6622_v59, 16 }
  0xc1   : > { %v5401_v57 = vcombine.low %v1564_v51, %v1574_v60  ;;  %v973_v60 = vor.u32 %v7102_v49, %v7092_v41  ;;  %v1583_v50 = vrot.slane %v1582_v3, 4  ;;  %v9242_v37 = vshrl.u32 %v7083_v31, 16  ;;  %v7828_v51 = vld [vmem:[%s6990_s17 + $0x34] sm:$0xf]  ;;  %v6600_v31 = vld [vmem:[%s9189_s2 + $0x28] sm:$0xff]  }
  0xc2   : > { %3666 = vmatmul.mubr.bf16.vlgmr.msra.gmra.mxu0 %v7785_v4  ;;  %v2010_v41 = vrot.slane %v9200_v7, 4  ;;  %v986_v16 = vshll.u32 %v7772_v1, 16  ;;  %v5386_v40 = vcombine.low %v7775_v39, %v7778_v35  ;;  %v5195_v3 = vrot.slane %v5179_v29, 9  ;;  %v6603_v29 = vld [vmem:[%s9219_s1 + $0x220] sm:$0xff]  }
  0xc3   : > { %6342 = vmatpush3.bf16.msra.mxu0 %v7431_v45  ;;  %3826 = vmatprep.mubr.bf16.mxu1 %v5401_v57  ;;  %v1593_v45 = vrot.slane %v1592_v58, 4  ;;  %v982_v53 = vrot.slane %v9242_v37, 4  ;;  %v974_v49 = vrot.slane %v973_v60, 4  ;;  %v5243_v57 = vld [vmem:[%s6990_s17 + $0x38] sm:$0x1] }
  0xc4   : > { %3673 = vmatprep.mubr.bf16.mxu0 %v5370_v43  ;;  %3827 = vmatmul.mubr.bf16.vlgmr.msra.gmra.mxu1 %v5385_v18  ;;  %v1588_v18 = vsel %vm7021_vm4, %v1583_v50, %v1587_v54  ;;  %v978_v43 = vrot.slane %v976_v61, 5  ;;  %v7846_v1 = vsel %vm7030_vm5, %v2010_v41, %v2011_v22  ;;  %v988_v58 = vrot.slane %v986_v16, 5  ;;  %v6623_v60 = vld [vmem:[%s6990_s17 + $0x28] sm:$0xf] }
  0xc5   : > { %6343 = vmatprep.subr.bf16.mxu0 %v6595_v10  ;;  %6390 = vmatpush3.bf16.msra.mxu1 %v7449_v26  ;;  %v1598_v59 = vsel %vm7021_vm4, %v1593_v45, %v1597_v15  ;;  %v1406_v37 = vrot.slane %v6623_v60, 5  ;;  %v1409_v54 = vrot.slane %v7817_v17, 5  ;;  %v1600_v15 = vshrl.u32 %v7820_v44, 16 }
  0xc6   : > { %v5402_v39 = vcombine.low %v1588_v18, %v1598_v59  ;;  %6391 = vmatprep.subr.bf16.mxu1 %v6596_v28  ;;  %v979_v26 = vsel %vm7021_vm4, %v974_v49, %v978_v43  ;;  %v983_v7 = vor.u32 %v982_v53, %v978_v43  ;;  %v1609_v45 = vshll.u32 %v7828_v51, 16 }
  0xc7   : > { %6344 = vmatpush3.bf16.msra.mxu0 %v6595_v10  ;;  %v1407_v22 = vsel %vm7030_vm5, %v5195_v3, %v1406_v37  ;;  %v1408_v50 = vrot.slane %v1406_v37, 4  ;;  %v1603_v10 = vshll.u32 %v7820_v44, 16  ;;  %v1602_v53 = vrot.slane %v1600_v15, 4  ;;  %v5180_v37 = vld [vmem:[%s6990_s17 + $0x30] sm:$0xe] }
  0xc8   : > { %6345 = vmatprep.subr.bf16.mxu0 %v6599_v19  ;;  %3834 = vmatprep.mubr.bf16.mxu1 %v5402_v39  ;;  %v984_v61 = vrot.slane %v983_v7, 4  ;;  %v1613_v41 = vshrl.u32 %v7828_v51, 16  ;;  %v1619_v49 = vshll.u32 %v5243_v57, 16  ;;  %v1611_v59 = vrot.slane %v1609_v45, 5  ;;  %v6604_v7 = vld [vmem:[%s9189_s2 + $0x20] sm:$0xff]  }
  0xc9   : > { %6392 = vmatpush3.bf16.msra.mxu1 %v6596_v28  ;;  %v1410_v16 = vsel %vm7030_vm5, %v1408_v50, %v1409_v54  ;;  %v1605_v18 = vrot.slane %v1603_v10, 5  ;;  %v997_v43 = vor.u32 %v7145_v33, %v7143_v32  ;;  %v6607_v32 = vld [vmem:[%s9219_s1 + $0x218] sm:$0xff]   ;;  %v1000_v15 = vshll.u32 %v6623_v60, 16 }
  0xca   : > { %6393 = vmatprep.subr.bf16.mxu1 %v6600_v31  ;;  %v989_v57 = vsel %vm7021_vm4, %v984_v61, %v988_v58  ;;  %v5371_v28 = vcombine.low %v1407_v22, %v1410_v16  ;;  %v1615_v3 = vrot.slane %v1613_v41, 4  ;;  %v1621_v39 = vrot.slane %v1619_v49, 5  ;;  %v7877_v50 = vld [vmem:[%s6990_s17 + $0x38] sm:$0x1]  ;;  %v7880_v58 = vld [vmem:[%s6990_s17 + $0x3c] sm:$0xf] }
  0xcb   : > { %6346 = vmatpush3.bf16.msra.mxu0 %v6599_v19  ;;  %v7874_v33 = vcombine.low %v979_v26, %v989_v57  ;;  %v1606_v19 = vor.u32 %v1605_v18, %v1602_v53  ;;  %v998_v54 = vrot.slane %v997_v43, 4  ;;  %v6608_v22 = vld [vmem:[%s9189_s2 + $0x18] sm:$0xff]   ;;  %v9243_v45 = vshrl.u32 %v7128_v9, 16  ;;  %v7891_v53 = vld [vmem:[%s6990_s17 + $0x40] sm:$0xf] }
  0xcc   : > { %6347 = vmatprep.subr.bf16.mxu0 %v6603_v29  ;;  %3835 = vmatmul.mubr.bf16.gmra.mxu1 %v5386_v40  ;;  %v1616_v10 = vor.u32 %v1615_v3, %v1611_v59  ;;  %v1010_v26 = vshll.u32 %v7817_v17, 16  ;;  %v5387_v40 = vcombine.low %v7820_v44, %v7828_v51  ;;  %v1002_v41 = vrot.slane %v1000_v15, 5  ;;  %v7895_v16 = vld [vmem:[%s6990_s17 + $0x34] sm:$0xf] }
  0xcd   : > { %v1006_v61 = vrot.slane %v9243_v45, 4  ;;  %6394 = vmatpush3.bf16.msra.mxu1 %v6600_v31  ;;  %3674 = vmatmul.mubr.bf16.gmra.mxu0 %v7874_v33  ;;  %v1607_v60 = vrot.slane %v1606_v19, 4  ;;  %v5196_v49 = vrot.slane %v5180_v37, 9  ;;  %v1413_v18 = vrot.slane %v7895_v16, 5  ;;  %v5244_v37 = vld [vmem:[%s6990_s17 + $0x44] sm:$0x1] }
  0xce   : > { %6395 = vmatprep.subr.bf16.mxu1 %v6604_v7  ;;  %3681 = vmatprep.mubr.bf16.mxu0 %v5371_v28  ;;  %v1617_v9 = vrot.slane %v1616_v10, 4  ;;  %v1012_v17 = vrot.slane %v1010_v26, 5  ;;  %v1416_v43 = vrot.slane %v7877_v50, 5  ;;  %v1624_v44 = vshrl.u32 %v7880_v58, 16  ;;  %v6611_v28 = vld [vmem:[%s9219_s1 + $0x210] sm:$0xff]  }
  0xcf   : > { %6348 = vmatpush3.bf16.msra.mxu0 %v6603_v29  ;;  %v1612_v51 = vsel %vm7021_vm4, %v1607_v60, %v1611_v59  ;;  %v1003_v31 = vsel %vm7021_vm4, %v998_v54, %v1002_v41  ;;  %v1007_v57 = vor.u32 %v1006_v61, %v1002_v41  ;;  %v1414_v3 = vsel %vm7030_vm5, %v5196_v49, %v1413_v18 }
  0xd0   : > { %6349 = vmatprep.subr.bf16.mxu0 %v6607_v32  ;;  %v1622_v19 = vsel %vm7021_vm4, %v1617_v9, %v1621_v39  ;;  %v1415_v29 = vrot.slane %v1413_v18, 4  ;;  %v1626_v15 = vrot.slane %v1624_v44, 4  ;;  %v1627_v59 = vshll.u32 %v7880_v58, 16  ;;  %v5181_v44 = vld [vmem:[%s6990_s17 + $0x3c] sm:$0xe] }
  0xd1   : > { %6396 = vmatpush3.bf16.msra.mxu1 %v6604_v7  ;;  %v5403_v10 = vcombine.low %v1612_v51, %v1622_v19  ;;  %v1008_v54 = vrot.slane %v1007_v57, 4  ;;  %v1633_v45 = vshll.u32 %v7891_v53, 16  ;;  %v1637_v61 = vshrl.u32 %v7891_v53, 16  ;;  %v6612_v7 = vld [vmem:[%s9189_s2 + $0x10] sm:$0xff]   ;;  %v7935_v19 = vld [vmem:[%s6990_s17 + $0x48] sm:$0xf] }
  0xd2   : > { %6397 = vmatprep.subr.bf16.mxu1 %v6608_v22  ;;  %v7917_v26 = vrot.slane %v1303_v25, 4  ;;  %v1417_v39 = vsel %vm7030_vm5, %v1415_v29, %v1416_v43  ;;  %v1629_v60 = vrot.slane %v1627_v59, 5  ;;  %v1643_v41 = vshll.u32 %v5244_v37, 16  ;;  %v7932_v37 = vld [vmem:[%s6990_s17 + $0x44] sm:$0x1] }
  0xd3   : > { %6350 = vmatpush3.bf16.msra.mxu0 %v6607_v32  ;;  %3842 = vmatprep.mubr.bf16.mxu1 %v5403_v10  ;;  %v1013_v49 = vsel %vm7021_vm4, %v1008_v54, %v1012_v17  ;;  %v5372_v18 = vcombine.low %v1414_v3, %v1417_v39  ;;  %v1635_v9 = vrot.slane %v1633_v45, 5  ;;  %v1639_v25 = vrot.slane %v1637_v61, 4  ;;  %v6615_v17 = vld [vmem:[%s9219_s1 + $0x208] sm:$0xff]   ;;  %v5245_v45 = vld [vmem:[%s6990_s17 + $0x50] sm:$0x1] }
  0xd4   : > { %6351 = vmatprep.subr.bf16.mxu0 %v6611_v28  ;;  %v7927_v51 = vcombine.low %v1003_v31, %v1013_v49  ;;  %3843 = vmatmul.mubr.bf16.gmra.mxu1 %v5387_v40  ;;  %v1630_v43 = vor.u32 %v1629_v60, %v1626_v15  ;;  %v1645_v57 = vrot.slane %v1643_v41, 5  ;;  %v1021_v32 = vor.u32 %v7200_v24, %v7194_v20  ;;  %v7948_v54 = vld [vmem:[%s6990_s17 + $0x4c] sm:$0xf]  ;;  %v6625_v61 = vld [vmem:[%s6990_s17 + $0x40] sm:$0xf] }
  0xd5   : > { %v1640_v3 = vor.u32 %v1639_v25, %v1635_v9  ;;  %v1024_v31 = vshll.u32 %v7895_v16, 16  ;;  %v9244_v40 = vshrl.u32 %v7178_v63, 16  ;;  %v1034_v15 = vshll.u32 %v7877_v50, 16  ;;  %6398 = vmatpush3.bf16.msra.mxu1 %v6608_v22  ;;  %v6616_v63 = vld [vmem:[%s9189_s2 + $0x8] sm:$0xff]   ;;  %v6619_v49 = vld [vmem:[%s9219_s1 + $0x200] sm:$0xff]  }
  0xd6   : > { %3682 = vmatmul.mubr.bf16.gmra.mxu0 %v7927_v51  ;;  %v1631_v20 = vrot.slane %v1630_v43, 4  ;;  %v1022_v24 = vrot.slane %v1021_v32, 4  ;;  %v5388_v59 = vcombine.low %v7880_v58, %v7891_v53  ;;  %v5197_v10 = vrot.slane %v5181_v44, 9  ;;  %6399 = vmatprep.subr.bf16.mxu1 %v6612_v7 }
  0xd7   : > { %v1030_v29 = vrot.slane %v9244_v40, 4  ;;  %3689 = vmatprep.mubr.bf16.mxu0 %v5372_v18  ;;  %v1641_v16 = vrot.slane %v1640_v3, 4  ;;  %v1026_v50 = vrot.slane %v1024_v31, 5  ;;  %v1036_v22 = vrot.slane %v1034_v15, 5  ;;  %6352 = vmatpush3.bf16.msra.mxu0 %v6611_v28 }
  0xd8   : > { %v1420_v39 = vrot.slane %v6625_v61, 5  ;;  %v1636_v60 = vsel %vm7021_vm4, %v1631_v20, %v1635_v9  ;;  %v1423_v58 = vrot.slane %v7932_v37, 5  ;;  %v1648_v53 = vshrl.u32 %v7935_v19, 16  ;;  %6353 = vmatprep.subr.bf16.mxu0 %v6615_v17 }
  0xd9   : > { %v1651_v41 = vshll.u32 %v7935_v19, 16  ;;  %v1646_v18 = vsel %vm7021_vm4, %v1641_v16, %v1645_v57  ;;  %v1027_v28 = vsel %vm7021_vm4, %v1022_v24, %v1026_v50  ;;  %v1031_v25 = vor.u32 %v1030_v29, %v1026_v50  ;;  %6400 = vmatpush3.bf16.msra.mxu1 %v6612_v7  ;;  %v6620_v29 = vld [vmem:[%s9189_s2] sm:$0xff]  }
  0xda   : > { %v1421_v9 = vsel %vm7030_vm5, %v5197_v10, %v1420_v39  ;;  %v5404_v44 = vcombine.low %v1636_v60, %v1646_v18  ;;  %v1422_v43 = vrot.slane %v1420_v39, 4  ;;  %v1650_v32 = vrot.slane %v1648_v53, 4  ;;  %6401 = vmatprep.subr.bf16.mxu1 %v6616_v63  ;;  %v7981_v39 = vld [vmem:[%s6990_s17 + $0x50] sm:$0x1]  ;;  %v5182_v60 = vld [vmem:[%s6990_s17 + $0x48] sm:$0xe] }
  0xdb   : > { %v1653_v3 = vrot.slane %v1651_v41, 5  ;;  %v1032_v31 = vrot.slane %v1031_v25, 4  ;;  %v1657_v40 = vshll.u32 %v7948_v54, 16  ;;  %v1661_v15 = vshrl.u32 %v7948_v54, 16  ;;  %6354 = vmatpush3.bf16.msra.mxu0 %v6615_v17  ;;  %v7985_v53 = vld [vmem:[%s6990_s17 + $0x54] sm:$0xf] }
  0xdc   : > { %v1667_v57 = vshll.u32 %v5245_v45, 16  ;;  %3850 = vmatprep.mubr.bf16.mxu1 %v5404_v44  ;;  %v1424_v7 = vsel %vm7030_vm5, %v1422_v43, %v1423_v58  ;;  %v1045_v24 = vor.u32 %v7245_v13, %v7243_v12  ;;  %v1048_v10 = vshll.u32 %v6625_v61, 16  ;;  %6355 = vmatprep.subr.bf16.mxu0 %v6619_v49  ;;  %v7990_v13 = vld [vmem:[%s6990_s17 + $0x58] sm:$0xf] }
  0xdd   : > { %v1654_v20 = vor.u32 %v1653_v3, %v1650_v32  ;;  %v1037_v45 = vsel %vm7021_vm4, %v1032_v31, %v1036_v22  ;;  %3851 = vmatmul.mubr.bf16.gmra.mxu1 %v5388_v59  ;;  %v5373_v17 = vcombine.low %v1421_v9, %v1424_v7  ;;  %v1659_v16 = vrot.slane %v1657_v40, 5  ;;  %v5246_v7 = vld [vmem:[%s6990_s17 + $0x5c] sm:$0x1] }
  0xde   : > { %v1663_v50 = vrot.slane %v1661_v15, 4  ;;  %v7987_v58 = vcombine.low %v1027_v28, %v1037_v45  ;;  %v1669_v18 = vrot.slane %v1667_v57, 5  ;;  %v1046_v12 = vrot.slane %v1045_v24, 4  ;;  %6402 = vmatpush3.bf16.msra.mxu1 %v6616_v63  ;;  %v6626_v63 = vld [vmem:[%s6990_s17 + $0x4c] sm:$0xf] }
  0xdf   : > { %v1655_v41 = vrot.slane %v1654_v20, 4  ;;  %v1050_v22 = vrot.slane %v1048_v10, 5  ;;  %v9245_v59 = vshrl.u32 %v7220_v47, 16  ;;  %v1058_v9 = vshll.u32 %v7932_v37, 16  ;;  %6356 = vmatpush3.bf16.msra.mxu0 %v6619_v49  ;;  %6403 = vmatprep.subr.bf16.mxu1 %v6620_v29 }
  0xe0   : > { %v1664_v61 = vor.u32 %v1663_v50, %v1659_v16  ;;  %3690 = vmatmul.mubr.bf16.gmra.mxu0 %v7987_v58  ;;  %v5389_v44 = vcombine.low %v7935_v19, %v7948_v54  ;;  %v5198_v43 = vrot.slane %v5182_v60, 9  ;;  %v1427_v32 = vrot.slane %v6626_v63, 5 }
  0xe1   : > { %v1054_v25 = vrot.slane %v9245_v59, 4  ;;  %v1660_v28 = vsel %vm7021_vm4, %v1655_v41, %v1659_v16  ;;  %3697 = vmatprep.mubr.bf16.mxu0 %v5373_v17  ;;  %v1051_v47 = vsel %vm7021_vm4, %v1046_v12, %v1050_v22  ;;  %v1060_v49 = vrot.slane %v1058_v9, 5  ;;  %v5183_v59 = vld [vmem:[%s6990_s17 + $0x54] sm:$0xe] }
  0xe2   : > { %v1665_v3 = vrot.slane %v1664_v61, 4  ;;  %v1428_v31 = vsel %vm7030_vm5, %v5198_v43, %v1427_v32  ;;  %v1429_v40 = vrot.slane %v1427_v32, 4  ;;  %v1430_v15 = vrot.slane %v7981_v39, 5  ;;  %6404 = vmatpush3.bf16.msra.mxu1 %v6620_v29 }
  0xe3   : > { %v1055_v37 = vor.u32 %v1054_v25, %v1050_v22  ;;  %v1672_v57 = vshrl.u32 %v7985_v53, 16  ;;  %v1675_v20 = vshll.u32 %v7985_v53, 16  ;;  %v1681_v24 = vshll.u32 %v7990_v13, 16 }
  0xe4   : > { %v1670_v19 = vsel %vm7021_vm4, %v1665_v3, %v1669_v18  ;;  %v1431_v45 = vsel %vm7030_vm5, %v1429_v40, %v1430_v15  ;;  %v1685_v16 = vshrl.u32 %v7990_v13, 16  ;;  %v1691_v22 = vshll.u32 %v5246_v7, 16  ;;  %v5167_v3 = vld [vmem:[%s6990_s17 + $0x5c] sm:$0x1]  ;;  %v8034_v40 = vld [vmem:[%s6990_s17 + $0x64] sm:$0xf] }
  0xe5   : > { %v1056_v54 = vrot.slane %v1055_v37, 4  ;;  %v5405_v10 = vcombine.low %v1660_v28, %v1670_v19  ;;  %v1674_v17 = vrot.slane %v1672_v57, 4  ;;  %v5374_v50 = vcombine.low %v1428_v31, %v1431_v45  ;;  %v8027_v37 = vld [vmem:[%s6990_s17 + $0x60] sm:$0xf]  ;;  %v6627_v19 = vld [vmem:[%s6990_s17 + $0x58] sm:$0xf] }
  0xe6   : > { %v1677_v60 = vrot.slane %v1675_v20, 5  ;;  %v1683_v41 = vrot.slane %v1681_v24, 5  ;;  %v1687_v61 = vrot.slane %v1685_v16, 4  ;;  %v1069_v9 = vor.u32 %v7300_v23, %v7298_v21 }
  0xe7   : > { %v1061_v29 = vsel %vm7021_vm4, %v1056_v54, %v1060_v49  ;;  %3858 = vmatprep.mubr.bf16.mxu1 %v5405_v10  ;;  %v1072_v28 = vshll.u32 %v6626_v63, 16  ;;  %v9246_v43 = vshrl.u32 %v7280_v56, 16  ;;  %v1693_v49 = vrot.slane %v1691_v22, 5 }
  0xe8   : > { %v8018_v12 = vcombine.low %v1051_v47, %v1061_v29  ;;  %3859 = vmatmul.mubr.bf16.gmra.mxu1 %v5389_v44  ;;  %v1678_v25 = vor.u32 %v1677_v60, %v1674_v17  ;;  %v1688_v47 = vor.u32 %v1687_v61, %v1683_v41  ;;  %v1082_v31 = vshll.u32 %v7981_v39, 16 }
  0xe9   : > { %v1078_v32 = vrot.slane %v9246_v43, 4  ;;  %v5390_v44 = vcombine.low %v7985_v53, %v7990_v13  ;;  %v1070_v56 = vrot.slane %v1069_v9, 4  ;;  %v1074_v23 = vrot.slane %v1072_v28, 5  ;;  %v5247_v53 = vld [vmem:[%s6990_s17 + $0x68] sm:$0x1] }
  0xea   : > { %3698 = vmatmul.mubr.bf16.gmra.mxu0 %v8018_v12  ;;  %v1679_v21 = vrot.slane %v1678_v25, 4  ;;  %v5199_v63 = vrot.slane %v5183_v59, 9  ;;  %v1689_v15 = vrot.slane %v1688_v47, 4  ;;  %v1084_v57 = vrot.slane %v1082_v31, 5  ;;  %v5184_v47 = vld [vmem:[%s6990_s17 + $0x60] sm:$0xe] }
  0xeb   : > { %3705 = vmatprep.mubr.bf16.mxu0 %v5374_v50  ;;  %v1434_v54 = vrot.slane %v6627_v19, 5  ;;  %v1437_v7 = vrot.slane %v5167_v3, 5  ;;  %v1075_v39 = vsel %vm7021_vm4, %v1070_v56, %v1074_v23  ;;  %v1079_v24 = vor.u32 %v1078_v32, %v1074_v23  ;;  %v8060_v23 = vld [vmem:[%s6990_s17 + $0x68] sm:$0x1] }
  0xec   : > { %v1684_v20 = vsel %vm7021_vm4, %v1679_v21, %v1683_v41  ;;  %v1696_v13 = vshrl.u32 %v8027_v37, 16  ;;  %v1694_v10 = vsel %vm7021_vm4, %v1689_v15, %v1693_v49  ;;  %v1699_v16 = vshll.u32 %v8027_v37, 16 }
  0xed   : > { %v1435_v45 = vsel %vm7030_vm5, %v5199_v63, %v1434_v54  ;;  %v1436_v17 = vrot.slane %v1434_v54, 4  ;;  %v5406_v29 = vcombine.low %v1684_v20, %v1694_v10  ;;  %v1080_v50 = vrot.slane %v1079_v24, 4  ;;  %v8065_v20 = vld [vmem:[%s6990_s17 + $0x6c] sm:$0xf]  ;;  %v8073_v10 = vld [vmem:[%s6990_s17 + $0x70] sm:$0xf] }
  0xee   : > { %v1698_v60 = vrot.slane %v1696_v13, 4  ;;  %v1705_v41 = vshll.u32 %v8034_v40, 16  ;;  %v1701_v22 = vrot.slane %v1699_v16, 5  ;;  %v1709_v59 = vshrl.u32 %v8034_v40, 16  ;;  %v6628_v13 = vld [vmem:[%s6990_s17 + $0x64] sm:$0xf] }
  0xef   : > { %v1438_v61 = vsel %vm7030_vm5, %v1436_v17, %v1437_v7  ;;  %v1715_v25 = vshll.u32 %v5247_v53, 16  ;;  %3866 = vmatprep.mubr.bf16.mxu1 %v5406_v29  ;;  %v1085_v9 = vsel %vm7021_vm4, %v1080_v50, %v1084_v57  ;;  %v1093_v32 = vor.u32 %v7350_v46, %v7341_v38 }
  0xf0   : > { %v5375_v28 = vcombine.low %v1435_v45, %v1438_v61  ;;  %v1707_v43 = vrot.slane %v1705_v41, 5  ;;  %v8057_v49 = vcombine.low %v1075_v39, %v1085_v9  ;;  %3867 = vmatmul.mubr.bf16.gmra.mxu1 %v5390_v44  ;;  %v1702_v31 = vor.u32 %v1701_v22, %v1698_v60  ;;  %v5248_v60 = vld [vmem:[%s6990_s17 + $0x74] sm:$0x1] }
  0xf1   : > { %v1711_v21 = vrot.slane %v1709_v59, 4  ;;  %v1717_v56 = vrot.slane %v1715_v25, 5  ;;  %v1094_v63 = vrot.slane %v1093_v32, 4  ;;  %v1096_v15 = vshll.u32 %v6627_v19, 16 }
  0xf2   : > { %9247 = vst [vmem:[#allocation25_spill] sm:$0xff] %v8057_v49  ;;  %v9248_v57 = vshrl.u32 %v7315_v27, 16  ;;  %v1106_v7 = vshll.u32 %v5167_v3, 16  ;;  %3706 = vmatmul.mubr.bf16.gmra.mxu0 %v8057_v49  ;;  %v1703_v38 = vrot.slane %v1702_v31, 4  ;;  %v5391_v44 = vcombine.low %v8027_v37, %v8034_v40  ;;  %v5191_v49 = vld [vmem:[%s6990_s17 + $0xb4] sm:$0xe] }
  0xf3   : > { %v1712_v46 = vor.u32 %v1711_v21, %v1707_v43  ;;  %v5200_v39 = vrot.slane %v5184_v47, 9  ;;  %3713 = vmatprep.mubr.bf16.mxu0 %v5375_v28  ;;  %v1098_v24 = vrot.slane %v1096_v15, 5  ;;  %v1441_v19 = vrot.slane %v6628_v13, 5 }
  0xf4   : > { %v1102_v54 = vrot.slane %v9248_v57, 4  ;;  %v1108_v53 = vrot.slane %v1106_v7, 5  ;;  %v1444_v27 = vrot.slane %v8060_v23, 5  ;;  %v1708_v3 = vsel %vm7021_vm4, %v1703_v38, %v1707_v43  ;;  %v5185_v7 = vld [vmem:[%s6990_s17 + $0x6c] sm:$0xe] }
  0xf5   : > { %v1713_v45 = vrot.slane %v1712_v46, 4  ;;  %v1720_v17 = vshrl.u32 %v8065_v20, 16  ;;  %v1723_v16 = vshll.u32 %v8065_v20, 16  ;;  %v1099_v37 = vsel %vm7021_vm4, %v1094_v63, %v1098_v24 }
  0xf6   : > { %v1103_v40 = vor.u32 %v1102_v54, %v1098_v24  ;;  %v1442_v29 = vsel %vm7030_vm5, %v5200_v39, %v1441_v19  ;;  %v1443_v50 = vrot.slane %v1441_v19, 4  ;;  %v1729_v59 = vshll.u32 %v8073_v10, 16  ;;  %v8102_v24 = vld [vmem:[%s6990_s17 + $0x74] sm:$0x1] }
  0xf7   : > { %v1718_v41 = vsel %vm7021_vm4, %v1713_v45, %v1717_v56  ;;  %v1722_v61 = vrot.slane %v1720_v17, 4  ;;  %v1725_v22 = vrot.slane %v1723_v16, 5  ;;  %v1733_v43 = vshrl.u32 %v8073_v10, 16 }
  0xf8   : > { %v5407_v25 = vcombine.low %v1708_v3, %v1718_v41  ;;  %v1104_v9 = vrot.slane %v1103_v40, 4  ;;  %v1445_v28 = vsel %vm7030_vm5, %v1443_v50, %v1444_v27  ;;  %v9249_v32 = vshll.u32 %v7707_v62, 16  ;;  %v9251_v3 = vld [vmem:[#allocation12_spill] sm:$0xff]  ;;  %v6629_v50 = vld [vmem:[%s6990_s17 + $0x70] sm:$0xf] }
  0xf9   : > { %v1726_v31 = vor.u32 %v1725_v22, %v1722_v61  ;;  %v1731_v21 = vrot.slane %v1729_v59, 5  ;;  %v1739_v56 = vshll.u32 %v5248_v60, 16  ;;  %v5376_v15 = vcombine.low %v1442_v29, %v1445_v28  ;;  %v5249_v22 = vld [vmem:[%s6990_s17 + $0x80] sm:$0x1] }
  0xfa   : > { %v8092_v47 = vrot.slane %v9249_v32, 5  ;;  %3874 = vmatprep.mubr.bf16.mxu1 %v5407_v25  ;;  %v1109_v63 = vsel %vm7021_vm4, %v1104_v9, %v1108_v53  ;;  %v1735_v57 = vrot.slane %v1733_v43, 4  ;;  %v1117_v54 = vor.u32 %v7420_v34, %v7395_v11  ;;  %v8108_v11 = vld [vmem:[%s6990_s17 + $0x78] sm:$0xf] }
  0xfb   : > { %v8099_v38 = vcombine.low %v1099_v37, %v1109_v63  ;;  %3875 = vmatmul.mubr.bf16.gmra.mxu1 %v5391_v44  ;;  %v1727_v62 = vrot.slane %v1726_v31, 4  ;;  %v1741_v46 = vrot.slane %v1739_v56, 5  ;;  %v1120_v39 = vshll.u32 %v6628_v13, 16  ;;  %v8116_v37 = vld [vmem:[%s6990_s17 + $0x7c] sm:$0xf] }
  0xfc   : > { %v1736_v19 = vor.u32 %v1735_v57, %v1731_v21  ;;  %v1118_v27 = vrot.slane %v1117_v54, 4  ;;  %v9252_v53 = vshrl.u32 %v9251_v3, 16  ;;  %v1130_v17 = vshll.u32 %v8060_v23, 16  ;;  %v9253_v3 = vld [vmem:[#allocation15_spill] sm:$0xff] }
  0xfd   : > { %9250 = vst [vmem:[#allocation26_spill] sm:$0xff] %v8099_v38  ;;  %3714 = vmatmul.mubr.bf16.gmra.mxu0 %v8099_v38  ;;  %v1732_v34 = vsel %vm7021_vm4, %v1727_v62, %v1731_v21  ;;  %v1122_v44 = vrot.slane %v1120_v39, 5  ;;  %v5392_v13 = vcombine.low %v8065_v20, %v8073_v10  ;;  %v5201_v16 = vrot.slane %v5185_v7, 9 }
  0xfe   : > { %v1126_v45 = vrot.slane %v9252_v53, 4  ;;  %3721 = vmatprep.mubr.bf16.mxu0 %v5376_v15  ;;  %v1737_v40 = vrot.slane %v1736_v19, 4  ;;  %v1132_v29 = vrot.slane %v1130_v17, 5  ;;  %v1448_v23 = vrot.slane %v6629_v50, 5  ;;  %v9254_v53 = vld [vmem:[#allocation17_spill] sm:$0xff] }
  0xff   : > { %v1451_v60 = vrot.slane %v8102_v24, 5  ;;  %v1123_v41 = vsel %vm7021_vm4, %v1118_v27, %v1122_v44  ;;  %v1744_v59 = vshrl.u32 %v8108_v11, 16  ;;  %v1747_v25 = vshll.u32 %v8108_v11, 16 }
 0x100   : > { %v1127_v61 = vor.u32 %v1126_v45, %v1122_v44  ;;  %v1742_v10 = vsel %vm7021_vm4, %v1737_v40, %v1741_v46  ;;  %v1449_v9 = vsel %vm7030_vm5, %v5201_v16, %v1448_v23  ;;  %v1450_v28 = vrot.slane %v1448_v23, 4 }
 0x101   : > { %v1753_v43 = vshll.u32 %v8116_v37, 16  ;;  %v5408_v31 = vcombine.low %v1732_v34, %v1742_v10  ;;  %v1746_v56 = vrot.slane %v1744_v59, 4  ;;  %v1749_v63 = vrot.slane %v1747_v25, 5 }
 0x102   : > { %v5861_v20 = vpop.f32.mrf.mxu0  ;;  %v1128_v21 = vrot.slane %v1127_v61, 4  ;;  %v1452_v57 = vsel %vm7030_vm5, %v1450_v28, %v1451_v60  ;;  %v1757_v7 = vshrl.u32 %v8116_v37, 16  ;;  %v1763_v62 = vshll.u32 %v5249_v22, 16  ;;  %v9256_v22 = vld [vmem:[#allocation13_spill] sm:$0xff] }
 0x103   : > { %v5973_v32 = vpop.f32.mrf.mxu1  ;;  %v1755_v54 = vrot.slane %v1753_v43, 5  ;;  %3882 = vmatprep.mubr.bf16.mxu1 %v5408_v31  ;;  %v5377_v19 = vcombine.low %v1449_v9, %v1452_v57  ;;  %v1750_v27 = vor.u32 %v1749_v63, %v1746_v56  ;;  %v1141_v45 = vor.u32 %v9254_v53, %v9253_v3  ;;  %v8146_v43 = vld [vmem:[%s6990_s17 + $0x80] sm:$0x1]  ;;  %v5186_v31 = vld [vmem:[%s6990_s17 + $0x78] sm:$0xe] }
 0x104   : > { %v5862_v15 = vpop.f32.mrf.mxu0  ;;  %v1133_v39 = vsel %vm7021_vm4, %v1128_v21, %v1132_v29  ;;  %3883 = vmatmul.mubr.bf16.gmra.mxu1 %v5392_v13  ;;  %v1759_v44 = vrot.slane %v1757_v7, 4  ;;  %v1765_v16 = vrot.slane %v1763_v62, 5  ;;  %v1144_v40 = vshll.u32 %v6629_v50, 16  ;;  %v8152_v57 = vld [vmem:[%s6990_s17 + $0x84] sm:$0xf] }
 0x105   : > { %v5974_v46 = vpop.f32.mrf.mxu1  ;;  %v8137_v34 = vcombine.low %v1123_v41, %v1133_v39  ;;  %v1751_v60 = vrot.slane %v1750_v27, 4  ;;  %v1142_v61 = vrot.slane %v1141_v45, 4  ;;  %v9257_v59 = vshrl.u32 %v9256_v22, 16  ;;  %v6630_v39 = vld [vmem:[%s6990_s17 + $0x7c] sm:$0xf] }
 0x106   : > { %v5864_v17 = vpop.f32.mrf.mxu0  ;;  %v1154_v25 = vshll.u32 %v8102_v24, 16  ;;  %v1760_v41 = vor.u32 %v1759_v44, %v1755_v54  ;;  %v1146_v9 = vrot.slane %v1144_v40, 5  ;;  %v5393_v13 = vcombine.low %v8108_v11, %v8116_v37 }
 0x107   : > { %9255 = vst [vmem:[#allocation12_spill] sm:$0xff] %v8137_v34  ;;  %v5976_v23 = vpop.f32.mrf.mxu1  ;;  %v1150_v29 = vrot.slane %v9257_v59, 4  ;;  %3722 = vmatmul.mubr.bf16.gmra.mxu0 %v8137_v34  ;;  %v5863_v28 = vadd.f32 %v5862_v15, %v5861_v20  ;;  %v1756_v21 = vsel %vm7021_vm4, %v1751_v60, %v1755_v54  ;;  %v5975_v56 = vadd.f32 %v5974_v46, %v5973_v32  ;;  %v8161_v54 = vld [vmem:[%s6990_s17 + $0x88] sm:$0xf] }
 0x108   : > { %v5865_v10 = vpop.f32.mrf.mxu0  ;;  %3729 = vmatprep.mubr.bf16.mxu0 %v5377_v19  ;;  %v1156_v24 = vrot.slane %v1154_v25, 5  ;;  %v1761_v7 = vrot.slane %v1760_v41, 4  ;;  %v1147_v11 = vsel %vm7021_vm4, %v1142_v61, %v1146_v9  ;;  %v5202_v62 = vrot.slane %v5186_v31, 9 }
 0x109   : > { %v5977_v50 = vpop.f32.mrf.mxu1  ;;  %v5866_v63 = vadd.f32 %v5865_v10, %v5864_v17  ;;  %v1151_v37 = vor.u32 %v1150_v29, %v1146_v9  ;;  %v8156_v15 = vadd.f32 %v5975_v56, %v5863_v28  ;;  %v1455_v19 = vrot.slane %v6630_v39, 5  ;;  %v5250_v17 = vld [vmem:[%s6990_s17 + $0x8c] sm:$0x1] }
 0x10a   : > { %v5978_v20 = vadd.f32 %v5977_v50, %v5976_v23  ;;  %v1458_v27 = vrot.slane %v8146_v43, 5  ;;  %v5867_v32 = vpop.f32.mrf.mxu0  ;;  %v1766_v3 = vsel %vm7021_vm4, %v1761_v7, %v1765_v16  ;;  %v1768_v44 = vshrl.u32 %v8152_v57, 16 }
 0x10b   : > { %9258 = vst [vmem:[#allocation15_spill] sm:$0xff] %v8156_v15  ;;  %v5979_v46 = vpop.f32.mrf.mxu1  ;;  %v1152_v53 = vrot.slane %v1151_v37, 4  ;;  %v5409_v40 = vcombine.low %v1756_v21, %v1766_v3  ;;  %v1456_v23 = vsel %vm7030_vm5, %v5202_v62, %v1455_v19  ;;  %v1457_v60 = vrot.slane %v1455_v19, 4  ;;  %v9262_v62 = vld [vmem:[#allocation18_spill] sm:$0xff]  ;;  %v9263_v19 = vld [vmem:[#allocation19_spill] sm:$0xff] }
 0x10c   : > { %v8165_v45 = vadd.f32 %v5978_v20, %v5866_v63  ;;  %v1771_v61 = vshll.u32 %v8152_v57, 16  ;;  %v5868_v22 = vpop.f32.mrf.mxu0  ;;  %v1770_v25 = vrot.slane %v1768_v44, 4  ;;  %v1777_v16 = vshll.u32 %v8161_v54, 16 }
 0x10d   : > { %v5980_v59 = vpop.f32.mrf.mxu1  ;;  %v1157_v29 = vsel %vm7021_vm4, %v1152_v53, %v1156_v24  ;;  %v1781_v10 = vshrl.u32 %v8161_v54, 16  ;;  %3890 = vmatprep.mubr.bf16.mxu1 %v5409_v40  ;;  %v1459_v9 = vsel %vm7030_vm5, %v1457_v60, %v1458_v27  ;;  %v1787_v50 = vshll.u32 %v5250_v17, 16  ;;  %v9264_v40 = vld [vmem:[#allocation14_spill] sm:$0xff] }
 0x10e   : > { %9259 = vst [vmem:[#allocation17_spill] sm:$0xff] %v8165_v45  ;;  %v8176_v41 = vcombine.low %v1147_v11, %v1157_v29  ;;  %v1773_v28 = vrot.slane %v1771_v61, 5  ;;  %v5870_v31 = vpop.f32.mrf.mxu0  ;;  %v9261_v56 = vshll.u32 %v7710_v14, 16  ;;  %3891 = vmatmul.mubr.bf16.gmra.mxu1 %v5393_v13  ;;  %v5378_v24 = vcombine.low %v1456_v23, %v1459_v9  ;;  %v5187_v9 = vld [vmem:[%s6990_s17 + $0x84] sm:$0xe] }
 0x10f   : > { %v5982_v21 = vpop.f32.mrf.mxu1  ;;  %v1779_v7 = vrot.slane %v1777_v16, 5  ;;  %v1783_v37 = vrot.slane %v1781_v10, 4  ;;  %v1789_v20 = vrot.slane %v1787_v50, 5  ;;  %v1165_v27 = vor.u32 %v9263_v19, %v9262_v62 }
 0x110   : > { %9260 = vst [vmem:[#allocation13_spill] sm:$0xff] %v8176_v41  ;;  %v8182_v63 = vrot.slane %v9261_v56, 5  ;;  %3730 = vmatmul.mubr.bf16.gmra.mxu0 %v8176_v41  ;;  %v1774_v11 = vor.u32 %v1773_v28, %v1770_v25  ;;  %v1168_v3 = vshll.u32 %v6630_v39, 16  ;;  %v5871_v53 = vpop.f32.mrf.mxu0  ;;  %v9265_v60 = vshrl.u32 %v9264_v40, 16 }
 0x111   : > { %v5983_v17 = vpop.f32.mrf.mxu1  ;;  %3737 = vmatprep.mubr.bf16.mxu0 %v5378_v24  ;;  %v1784_v44 = vor.u32 %v1783_v37, %v1779_v7  ;;  %v1178_v23 = vshll.u32 %v8146_v43, 16  ;;  %v5394_v61 = vcombine.low %v8152_v57, %v8161_v54  ;;  %v1166_v25 = vrot.slane %v1165_v27, 4  ;;  %v5171_v43 = vld [vmem:[%s6990_s17 + $0x8c] sm:$0x1] }
 0x112   : > { %v1174_v13 = vrot.slane %v9265_v60, 4  ;;  %v1775_v29 = vrot.slane %v1774_v11, 4  ;;  %v1170_v16 = vrot.slane %v1168_v3, 5  ;;  %v5869_v10 = vadd.f32 %v5868_v22, %v5867_v32  ;;  %v5873_v39 = vpop.f32.mrf.mxu0  ;;  %v8201_v22 = vld [vmem:[%s6990_s17 + $0x90] sm:$0xf] }
 0x113   : > { %v8193_v28 = vpop.f32.mrf.mxu1  ;;  %v1785_v50 = vrot.slane %v1784_v44, 4  ;;  %v1180_v56 = vrot.slane %v1178_v23, 5  ;;  %v5981_v24 = vadd.f32 %v5980_v59, %v5979_v46  ;;  %v5872_v37 = vadd.f32 %v5871_v53, %v5870_v31  ;;  %v6631_v59 = vld [vmem:[%s6990_s17 + $0x88] sm:$0xf]  ;;  %v8209_v53 = vld [vmem:[%s6990_s17 + $0x94] sm:$0xf] }
 0x114   : > { %v1780_v57 = vsel %vm7021_vm4, %v1775_v29, %v1779_v7  ;;  %v1171_v54 = vsel %vm7021_vm4, %v1166_v25, %v1170_v16  ;;  %v1175_v11 = vor.u32 %v1174_v13, %v1170_v16  ;;  %v5984_v32 = vadd.f32 %v5983_v17, %v5982_v21  ;;  %v5874_v62 = vpop.f32.mrf.mxu0  ;;  %9267 = vst [vmem:[#allocation19_spill] sm:$0xff] %v8209_v53  ;;  %v5251_v7 = vld [vmem:[%s6990_s17 + $0x98] sm:$0x1] }
 0x115   : > { %v5986_v19 = vpop.f32.mrf.mxu1  ;;  %v1790_v27 = vsel %vm7021_vm4, %v1785_v50, %v1789_v20  ;;  %v8205_v3 = vadd.f32 %v5981_v24, %v5869_v10  ;;  %v5203_v46 = vrot.slane %v5187_v9, 9  ;;  %v1462_v31 = vrot.slane %v6631_v59, 5 }
 0x116   : > { %v5410_v44 = vcombine.low %v1780_v57, %v1790_v27  ;;  %v1176_v40 = vrot.slane %v1175_v11, 4  ;;  %v8212_v60 = vadd.f32 %v5984_v32, %v5872_v37  ;;  %v1465_v21 = vrot.slane %v5171_v43, 5  ;;  %v5876_v17 = vpop.f32.mrf.mxu0 }
 0x117   : > { %9266 = vst [vmem:[#allocation18_spill] sm:$0xff] %v8205_v3  ;;  %v5988_v13 = vpop.f32.mrf.mxu1  ;;  %v1463_v23 = vsel %vm7030_vm5, %v5203_v46, %v1462_v31  ;;  %v1464_v29 = vrot.slane %v1462_v31, 4  ;;  %v1792_v20 = vshrl.u32 %v8201_v22, 16  ;;  %v1795_v25 = vshll.u32 %v8201_v22, 16  ;;  %v9272_v3 = vld [vmem:[#allocation16_spill] sm:$0xff] }
 0x118   : > { %9268 = vst [vmem:[#allocation14_spill] sm:$0xff] %v8212_v60  ;;  %3898 = vmatprep.mubr.bf16.mxu1 %v5410_v44  ;;  %v1181_v16 = vsel %vm7021_vm4, %v1176_v40, %v1180_v56  ;;  %v1801_v10 = vshll.u32 %v8209_v53, 16  ;;  %v1805_v9 = vshrl.u32 %v8209_v53, 16  ;;  %v1811_v50 = vshll.u32 %v5251_v7, 16  ;;  %v5877_v24 = vpop.f32.mrf.mxu0 }
 0x119   : > { %v5989_v37 = vpop.f32.mrf.mxu1  ;;  %v8222_v57 = vcombine.low %v1171_v54, %v1181_v16  ;;  %3899 = vmatmul.mubr.bf16.gmra.mxu1 %v5394_v61  ;;  %v1466_v11 = vsel %vm7030_vm5, %v1464_v29, %v1465_v21  ;;  %v1794_v32 = vrot.slane %v1792_v20, 4  ;;  %v1797_v27 = vrot.slane %v1795_v25, 5  ;;  %v9270_v54 = vld [vmem:[#allocation21_spill] sm:$0xff]  ;;  %v9271_v16 = vld [vmem:[#allocation22_spill] sm:$0xff] }
 0x11a   : > { %v5379_v46 = vcombine.low %v1463_v23, %v1466_v11  ;;  %v1803_v31 = vrot.slane %v1801_v10, 5  ;;  %v1807_v44 = vrot.slane %v1805_v9, 4  ;;  %v1813_v18 = vrot.slane %v1811_v50, 5  ;;  %v8226_v56 = vpop.f32.mrf.mxu0 }
 0x11b   : > { %9269 = vst [vmem:[#allocation27_spill] sm:$0xff] %v8222_v57  ;;  %v8228_v40 = vpop.f32.mrf.mxu1  ;;  %3738 = vmatmul.mubr.bf16.gmra.mxu0 %v8222_v57  ;;  %v1798_v7 = vor.u32 %v1797_v27, %v1794_v32  ;;  %v1189_v61 = vor.u32 %v9271_v16, %v9270_v54  ;;  %v1192_v60 = vshll.u32 %v6631_v59, 16  ;;  %v9273_v21 = vshrl.u32 %v9272_v3, 16  ;;  %v5188_v27 = vld [vmem:[%s6990_s17 + $0x90] sm:$0xe] }
 0x11c   : > { %3745 = vmatprep.mubr.bf16.mxu0 %v5379_v46  ;;  %v1808_v23 = vor.u32 %v1807_v44, %v1803_v31  ;;  %v1202_v20 = vshll.u32 %v5171_v43, 16  ;;  %v5395_v25 = vcombine.low %v8201_v22, %v8209_v53  ;;  %v5875_v10 = vadd.f32 %v5874_v62, %v5873_v39  ;;  %v8237_v9 = vpop.f32.mrf.mxu0  ;;  %v8244_v16 = vld [vmem:[%s6990_s17 + $0x98] sm:$0x1]  ;;  %v8247_v39 = vld [vmem:[%s6990_s17 + $0x9c] sm:$0xf] }
 0x11d   : > { %v1198_v29 = vrot.slane %v9273_v21, 4  ;;  %v8239_v50 = vpop.f32.mrf.mxu1  ;;  %v1799_v11 = vrot.slane %v1798_v7, 4  ;;  %v1190_v32 = vrot.slane %v1189_v61, 4  ;;  %v1194_v59 = vrot.slane %v1192_v60, 5  ;;  %v6632_v61 = vld [vmem:[%s6990_s17 + $0x94] sm:$0xf] }
 0x11e   : > { %v5987_v3 = vadd.f32 %v5986_v19, %v8193_v28  ;;  %v1809_v46 = vrot.slane %v1808_v23, 4  ;;  %v1204_v44 = vrot.slane %v1202_v20, 5  ;;  %v5878_v54 = vadd.f32 %v5877_v24, %v5876_v17  ;;  %v8249_v22 = vpop.f32.mrf.mxu0  ;;  %v8260_v17 = vld [vmem:[%s6990_s17 + $0xa0] sm:$0xf]  ;;  %v8268_v23 = vld [vmem:[%s6990_s17 + $0xa4] sm:$0x1] }
 0x11f   : > { %v5990_v43 = vadd.f32 %v5989_v37, %v5988_v13  ;;  %v8251_v62 = vpop.f32.mrf.mxu1  ;;  %v1804_v60 = vsel %vm7021_vm4, %v1799_v11, %v1803_v31  ;;  %v1195_v28 = vsel %vm7021_vm4, %v1190_v32, %v1194_v59  ;;  %v1199_v19 = vor.u32 %v1198_v29, %v1194_v59  ;;  %9275 = vst [vmem:[#allocation22_spill] sm:$0xff] %v8260_v17 }
 0x120   : > { %v8257_v7 = vadd.f32 %v5987_v3, %v5875_v10  ;;  %v1814_v13 = vsel %vm7021_vm4, %v1809_v46, %v1813_v18  ;;  %v5204_v37 = vrot.slane %v5188_v27, 9  ;;  %v1469_v21 = vrot.slane %v6632_v61, 5  ;;  %9277 = vst [vmem:[#allocation28_spill] sm:$0xff] %v8268_v23  ;;  %v5883_v20 = vpop.f32.mrf.mxu0 }
 0x121   : > { %v8264_v24 = vadd.f32 %v5990_v43, %v5878_v54  ;;  %v5995_v31 = vpop.f32.mrf.mxu1  ;;  %v5411_v11 = vcombine.low %v1804_v60, %v1814_v13  ;;  %v1200_v45 = vrot.slane %v1199_v19, 4  ;;  %v1472_v29 = vrot.slane %v8244_v16, 5 }
 0x122   : > { %9274 = vst [vmem:[#allocation21_spill] sm:$0xff] %v8257_v7  ;;  %v1816_v10 = vshrl.u32 %v8247_v39, 16  ;;  %v1470_v32 = vsel %vm7030_vm5, %v5204_v37, %v1469_v21  ;;  %v1471_v59 = vrot.slane %v1469_v21, 4  ;;  %v1819_v18 = vshll.u32 %v8247_v39, 16  ;;  %v8276_v27 = vpop.f32.mrf.mxu0 }
 0x123   : > { %9276 = vst [vmem:[#allocation16_spill] sm:$0xff] %v8264_v24  ;;  %v1825_v3 = vshll.u32 %v8260_v17, 16  ;;  %v8278_v46 = vpop.f32.mrf.mxu1  ;;  %3906 = vmatprep.mubr.bf16.mxu1 %v5411_v11  ;;  %v1205_v54 = vsel %vm7021_vm4, %v1200_v45, %v1204_v44  ;;  %v1829_v60 = vshrl.u32 %v8260_v17, 16  ;;  %v1835_v19 = vshll.u32 %v8268_v23, 16 }
 0x124   : > { %v1818_v43 = vrot.slane %v1816_v10, 4  ;;  %v8284_v13 = vcombine.low %v1195_v28, %v1205_v54  ;;  %3907 = vmatmul.mubr.bf16.gmra.mxu1 %v5395_v25  ;;  %v1473_v37 = vsel %vm7030_vm5, %v1471_v59, %v1472_v29  ;;  %v1821_v21 = vrot.slane %v1819_v18, 5  ;;  %v8288_v7 = vpop.f32.mrf.mxu0  ;;  %v9280_v59 = vld [vmem:[#allocation20_spill] sm:$0xff] }
 0x125   : > { %v1827_v24 = vrot.slane %v1825_v3, 5  ;;  %v8290_v15 = vpop.f32.mrf.mxu1  ;;  %v9279_v11 = vshrl.u32 %v7710_v14, 16  ;;  %v5380_v44 = vcombine.low %v1470_v32, %v1473_v37  ;;  %v1831_v10 = vrot.slane %v1829_v60, 4 }
 0x126   : > { %9278 = vst [vmem:[#allocation29_spill] sm:$0xff] %v8284_v13  ;;  %v1837_v57 = vrot.slane %v1835_v19, 5  ;;  %3746 = vmatmul.mubr.bf16.gmra.mxu0 %v8284_v13  ;;  %v1822_v25 = vor.u32 %v1821_v21, %v1818_v43  ;;  %v1213_v28 = vor.u32 %v7636_v5, %v7633_v52  ;;  %v1216_v29 = vshll.u32 %v6632_v61, 16  ;;  %v8301_v54 = vpop.f32.mrf.mxu0  ;;  %v5173_v19 = vld [vmem:[%s6990_s17 + $0xa4] sm:$0x1] }
 0x127   : > { %v8294_v45 = vrot.slane %v9279_v11, 4  ;;  %v9281_v18 = vshrl.u32 %v9280_v59, 16  ;;  %v8303_v14 = vpop.f32.mrf.mxu1  ;;  %3753 = vmatprep.mubr.bf16.mxu0 %v5380_v44  ;;  %v1832_v11 = vor.u32 %v1831_v10, %v1827_v24  ;;  %v1226_v32 = vshll.u32 %v8244_v16, 16  ;;  %v5189_v21 = vld [vmem:[%s6990_s17 + $0x9c] sm:$0xe] }
 0x128   : > { %v5396_v60 = vcombine.low %v8247_v39, %v8260_v17  ;;  %v5881_v43 = vadd.f32 %v8237_v9, %v8226_v56  ;;  %v1823_v52 = vrot.slane %v1822_v25, 4  ;;  %v1214_v5 = vrot.slane %v1213_v28, 4  ;;  %v8314_v44 = vpop.f32.mrf.mxu0 }
 0x129   : > { %v1222_v3 = vrot.slane %v9281_v18, 4  ;;  %v1218_v61 = vrot.slane %v1216_v29, 5  ;;  %v5993_v37 = vadd.f32 %v8239_v50, %v8228_v40  ;;  %v8316_v10 = vpop.f32.mrf.mxu1  ;;  %v1833_v16 = vrot.slane %v1832_v11, 4  ;;  %v8327_v50 = vld [vmem:[%s6990_s17 + $0xa8] sm:$0xf] }
 0x12a   : > { %v1228_v59 = vrot.slane %v1226_v32, 5  ;;  %v5884_v39 = vadd.f32 %v5883_v20, %v8249_v22  ;;  %v5996_v56 = vadd.f32 %v5995_v31, %v8251_v62  ;;  %v1828_v9 = vsel %vm7021_vm4, %v1823_v52, %v1827_v24  ;;  %v8330_v29 = vld [vmem:[%s6990_s17 + $0xac] sm:$0xf]  ;;  %v8332_v18 = vpop.f32.mrf.mxu0  ;;  %v6633_v32 = vld [vmem:[%s6990_s17 + $0xa0] sm:$0xf] }
 0x12b   : > { %v1219_v25 = vsel %vm7021_vm4, %v1214_v5, %v1218_v61  ;;  %v1223_v28 = vor.u32 %v1222_v3, %v1218_v61  ;;  %v8324_v40 = vadd.f32 %v5993_v37, %v5881_v43  ;;  %v8334_v22 = vpop.f32.mrf.mxu1  ;;  %v1838_v62 = vsel %vm7021_vm4, %v1833_v16, %v1837_v57 }
 0x12c   : > { %v8338_v20 = vadd.f32 %v5996_v56, %v5884_v39  ;;  %v1250_v24 = vshll.u32 %v5173_v19, 16  ;;  %v5205_v31 = vrot.slane %v5189_v21, 9  ;;  %v5412_v11 = vcombine.low %v1828_v9, %v1838_v62  ;;  %v8341_v5 = vpop.f32.mrf.mxu0 }
 0x12d   : > { %9282 = vst [vmem:[#allocation20_spill] sm:$0xff] %v8324_v40  ;;  %v1224_v3 = vrot.slane %v1223_v28, 4  ;;  %v1476_v43 = vrot.slane %v6633_v32, 5  ;;  %v1479_v52 = vrot.slane %v5173_v19, 5  ;;  %v8343_v61 = vpop.f32.mrf.mxu1  ;;  %v8348_v40 = vld [vmem:[%s6990_s17 + $0xb0] sm:$0x1]  ;;  %v5887_v41 = vadd.f32 %v8288_v7, %v8276_v27 }
 0x12e   : > { %9283 = vst [vmem:[#allocation30_spill] sm:$0xff] %v8338_v20  ;;  %v1840_v57 = vshrl.u32 %v8327_v50, 16  ;;  %v1843_v16 = vshll.u32 %v8327_v50, 16  ;;  %v1849_v21 = vshll.u32 %v8330_v29, 16  ;;  %3914 = vmatprep.mubr.bf16.mxu1 %v5412_v11  ;;  %v1853_v9 = vshrl.u32 %v8330_v29, 16  ;;  %v8358_v28 = vpop.f32.mrf.mxu0 }
 0x12f   : > { %v1229_v39 = vsel %vm7021_vm4, %v1224_v3, %v1228_v59  ;;  %v1477_v19 = vsel %vm7030_vm5, %v5205_v31, %v1476_v43  ;;  %v1478_v56 = vrot.slane %v1476_v43, 4  ;;  %v8360_v62 = vpop.f32.mrf.mxu1  ;;  %3915 = vmatmul.mubr.bf16.gmra.mxu1 %v5396_v60  ;;  %v1252_v13 = vrot.slane %v1250_v24, 5  ;;  %v9285_v60 = vld [vmem:[#allocation23_spill] sm:$0xff]  ;;  %v9286_v24 = vld [vmem:[#allocation24_spill] sm:$0xff] }
 0x130   : > { %v8362_v32 = vcombine.low %v1219_v25, %v1229_v39  ;;  %v1842_v37 = vrot.slane %v1840_v57, 4  ;;  %v1845_v11 = vrot.slane %v1843_v16, 5  ;;  %v1851_v20 = vrot.slane %v1849_v21, 5  ;;  %v8367_v43 = vpop.f32.mrf.mxu0  ;;  %v5190_v21 = vld [vmem:[%s6990_s17 + $0xa8] sm:$0xe] }
 0x131   : > { %v1480_v59 = vsel %vm7030_vm5, %v1478_v56, %v1479_v52  ;;  %v1855_v31 = vrot.slane %v1853_v9, 4  ;;  %v1859_v3 = vshll.u32 %v8348_v40, 16  ;;  %v8369_v23 = vpop.f32.mrf.mxu1  ;;  %v1243_v57 = vsel %vm7021_vm4, %v7715_v6, %v9285_v60  ;;  %v5174_v52 = vld [vmem:[%s6990_s17 + $0xb0] sm:$0x1] }
 0x132   : > { %9284 = vst [vmem:[#allocation31_spill] sm:$0xff] %v8362_v32  ;;  %3754 = vmatmul.mubr.bf16.gmra.mxu0 %v8362_v32  ;;  %v5381_v25 = vcombine.low %v1477_v19, %v1480_v59  ;;  %v1846_v39 = vor.u32 %v1845_v11, %v1842_v37  ;;  %v1247_v16 = vor.u32 %v9286_v24, %v9285_v60  ;;  %v8384_v37 = vpop.f32.mrf.mxu0  ;;  %v8395_v60 = vld [vmem:[%s6990_s17 + $0xb4] sm:$0xf] }
 0x133   : > { %v1856_v56 = vor.u32 %v1855_v31, %v1851_v20  ;;  %v1861_v9 = vrot.slane %v1859_v3, 5  ;;  %v5999_v19 = vadd.f32 %v8290_v15, %v8278_v46  ;;  %v8386_v11 = vpop.f32.mrf.mxu1  ;;  %v5890_v31 = vadd.f32 %v8314_v44, %v8301_v54 }
 0x134   : > { %3761 = vmatprep.mubr.bf16.mxu0 %v5381_v25  ;;  %v1847_v6 = vrot.slane %v1846_v39, 4  ;;  %v1248_v59 = vrot.slane %v1247_v16, 4  ;;  %v6002_v3 = vadd.f32 %v8316_v10, %v8303_v14  ;;  %v1274_v15 = vshll.u32 %v5174_v52, 16  ;;  %v8397_v24 = vpop.f32.mrf.mxu0  ;;  %v6634_v14 = vld [vmem:[%s6990_s17 + $0xac] sm:$0xf] }
 0x135   : > { %v1857_v7 = vrot.slane %v1856_v56, 4  ;;  %v8392_v27 = vadd.f32 %v5999_v19, %v5887_v41  ;;  %v5206_v46 = vrot.slane %v5190_v21, 9  ;;  %v8399_v25 = vpop.f32.mrf.mxu1  ;;  %v1483_v10 = vrot.slane %v6634_v14, 5  ;;  %v8409_v41 = vld [vmem:[%s6990_s17 + $0xb8] sm:$0xf] }
 0x136   : > { %v1852_v39 = vsel %vm7021_vm4, %v1847_v6, %v1851_v20  ;;  %v1253_v54 = vsel %vm7021_vm4, %v1248_v59, %v1252_v13  ;;  %v8405_v44 = vadd.f32 %v6002_v3, %v5890_v31  ;;  %v8412_v16 = vld [vmem:[%s6990_s17 + $0xbc] sm:$0x1]  ;;  %v5397_v19 = vcombine.low %v8327_v50, %v8330_v29  ;;  %v8420_v6 = vpop.f32.mrf.mxu0 }
 0x137   : > { %9287 = vst [vmem:[#allocation23_spill] sm:$0xff] %v8392_v27  ;;  %v1862_v21 = vsel %vm7021_vm4, %v1857_v7, %v1861_v9  ;;  %v8416_v56 = vcombine.low %v1243_v57, %v1253_v54  ;;  %v1486_v20 = vrot.slane %v5174_v52, 5  ;;  %v8422_v13 = vpop.f32.mrf.mxu1  ;;  %v1484_v31 = vsel %vm7030_vm5, %v5206_v46, %v1483_v10  ;;  %v5175_v27 = vld [vmem:[%s6990_s17 + $0xbc] sm:$0x1] }
 0x138   : > { %9288 = vst [vmem:[#allocation24_spill] sm:$0xff] %v8405_v44  ;;  %v5413_v59 = vcombine.low %v1852_v39, %v1862_v21  ;;  %v1485_v3 = vrot.slane %v1483_v10, 4  ;;  %v1864_v14 = vshrl.u32 %v8395_v60, 16  ;;  %v1867_v9 = vshll.u32 %v8395_v60, 16  ;;  %v8431_v52 = vpop.f32.mrf.mxu0 }
 0x139   : > { %v1873_v57 = vshll.u32 %v8409_v41, 16  ;;  %v1877_v7 = vshrl.u32 %v8409_v41, 16  ;;  %v1883_v50 = vshll.u32 %v8412_v16, 16  ;;  %v8433_v54 = vpop.f32.mrf.mxu1  ;;  %v9289_v39 = vor.u32 %v8092_v47, %v7917_v26 }
 0x13a   : > { %3922 = vmatprep.mubr.bf16.mxu1 %v5413_v59  ;;  %3762 = vmatmul.mubr.bf16.gmra.mxu0 %v8416_v56  ;;  %v1276_v10 = vrot.slane %v1274_v15, 5  ;;  %v1487_v21 = vsel %vm7030_vm5, %v1485_v3, %v1486_v20  ;;  %v1866_v44 = vrot.slane %v1864_v14, 4  ;;  %v1869_v34 = vrot.slane %v1867_v9, 5  ;;  %v8445_v53 = vpop.f32.mrf.mxu0 }
 0x13b   : > { %v8438_v46 = vrot.slane %v9289_v39, 4  ;;  %3923 = vmatmul.mubr.bf16.gmra.mxu1 %v5397_v19  ;;  %v5382_v32 = vcombine.low %v1484_v31, %v1487_v21  ;;  %v1875_v17 = vrot.slane %v1873_v57, 5  ;;  %v1879_v38 = vrot.slane %v1877_v7, 4  ;;  %v8447_v26 = vpop.f32.mrf.mxu1  ;;  %v8484_v7 = vld [vmem:[%s6990_s17 + $0xc4] sm:$0xf] }
 0x13c   : > { %v1885_v47 = vrot.slane %v1883_v50, 5  ;;  %v1267_v15 = vsel %vm7021_vm4, %v7717_v42, %v7719_v30  ;;  %v1271_v20 = vor.u32 %v7721_v2, %v7719_v30  ;;  %v5893_v19 = vadd.f32 %v8341_v5, %v8332_v18  ;;  %v8461_v9 = vpop.f32.mrf.mxu0  ;;  %v8487_v50 = vld [vmem:[%s6990_s17 + $0xc8] sm:$0x1] }
 0x13d   : > { %3769 = vmatprep.mubr.bf16.mxu0 %v5382_v32  ;;  %v1870_v59 = vor.u32 %v1869_v34, %v1866_v44  ;;  %v1880_v31 = vor.u32 %v1879_v38, %v1875_v17  ;;  %v6005_v3 = vadd.f32 %v8343_v61, %v8334_v22  ;;  %v5896_v14 = vadd.f32 %v8367_v43, %v8358_v28  ;;  %v8463_v42 = vpop.f32.mrf.mxu1  ;;  %v6635_v22 = vld [vmem:[%s6990_s17 + $0xb8] sm:$0xf]  ;;  %v8471_v32 = vld [vmem:[%s6990_s17 + $0xc0] sm:$0xf] }
 0x13e   : > { %v1272_v57 = vrot.slane %v1271_v20, 4  ;;  %v6008_v30 = vadd.f32 %v8369_v23, %v8360_v62  ;;  %v1298_v2 = vshll.u32 %v5175_v27, 16  ;;  %v5207_v18 = vrot.slane %v5191_v49, 9  ;;  %v8473_v28 = vpop.f32.mrf.mxu0 }
 0x13f   : > { %v1871_v34 = vrot.slane %v1870_v59, 4  ;;  %v1881_v38 = vrot.slane %v1880_v31, 4  ;;  %v8467_v5 = vadd.f32 %v6005_v3, %v5893_v19  ;;  %v1490_v61 = vrot.slane %v6635_v22, 5  ;;  %v8475_v43 = vpop.f32.mrf.mxu1 }
 0x140   : > { %v1277_v44 = vsel %vm7021_vm4, %v1272_v57, %v1276_v10  ;;  %v5398_v23 = vcombine.low %v8395_v60, %v8409_v41  ;;  %v8481_v62 = vadd.f32 %v6008_v30, %v5896_v14  ;;  %v1493_v49 = vrot.slane %v5175_v27, 5  ;;  %v8497_v19 = vpop.f32.mrf.mxu0 }
 0x141   : > { %9290 = vst [vmem:[#allocation32_spill] sm:$0xff] %v8467_v5  ;;  %v1876_v39 = vsel %vm7021_vm4, %v1871_v34, %v1875_v17  ;;  %v1886_v21 = vsel %vm7021_vm4, %v1881_v38, %v1885_v47  ;;  %v8493_v20 = vcombine.low %v1267_v15, %v1277_v44  ;;  %v1491_v10 = vsel %vm7030_vm5, %v5207_v18, %v1490_v61  ;;  %v8499_v60 = vpop.f32.mrf.mxu1  ;;  %v5257_v5 = vld [vmem:[%s6990_s17 + $0x18] sm:$0xe] }
 0x142   : > { %9291 = vst [vmem:[#allocation33_spill] sm:$0xff] %v8481_v62  ;;  %v5414_v27 = vcombine.low %v1876_v39, %v1886_v21  ;;  %v1492_v59 = vrot.slane %v1490_v61, 4  ;;  %v1888_v31 = vshrl.u32 %v8471_v32, 16  ;;  %v1891_v3 = vshll.u32 %v8471_v32, 16  ;;  %v8507_v57 = vpop.f32.mrf.mxu0  ;;  %v5192_v21 = vld [vmem:[%s6990_s17 + $0xc0] sm:$0xe] }
 0x143   : > { %3770 = vmatmul.mubr.bf16.gmra.mxu0 %v8493_v20  ;;  %v1300_v17 = vrot.slane %v1298_v2, 5  ;;  %v1897_v47 = vshll.u32 %v8484_v7, 16  ;;  %v1901_v15 = vshrl.u32 %v8484_v7, 16  ;;  %v1907_v14 = vshll.u32 %v8487_v50, 16  ;;  %v8509_v30 = vpop.f32.mrf.mxu1 }
 0x144   : > { %3930 = vmatprep.mubr.bf16.mxu1 %v5414_v27  ;;  %v1494_v18 = vsel %vm7030_vm5, %v1492_v59, %v1493_v49  ;;  %v1890_v34 = vrot.slane %v1888_v31, 4  ;;  %v1893_v38 = vrot.slane %v1891_v3, 5  ;;  %v1295_v2 = vor.u32 %v7732_v48, %v7724_v36  ;;  %v8520_v27 = vpop.f32.mrf.mxu0  ;;  %v5176_v3 = vld [vmem:[%s6990_s17 + $0xc8] sm:$0x1] }
 0x145   : > { %3931 = vmatmul.mubr.bf16.gmra.mxu1 %v5398_v23  ;;  %v5383_v22 = vcombine.low %v1491_v10, %v1494_v18  ;;  %v1899_v61 = vrot.slane %v1897_v47, 5  ;;  %v1903_v44 = vrot.slane %v1901_v15, 4  ;;  %v1291_v39 = vsel %vm7021_vm4, %v7730_v8, %v7724_v36  ;;  %v8522_v62 = vpop.f32.mrf.mxu1 }
 0x146   : > { %v1894_v49 = vor.u32 %v1893_v38, %v1890_v34  ;;  %v1909_v59 = vrot.slane %v1907_v14, 5  ;;  %v1296_v48 = vrot.slane %v1295_v2, 4  ;;  %v5899_v23 = vadd.f32 %v8397_v24, %v8384_v37  ;;  %v8533_v47 = vpop.f32.mrf.mxu0  ;;  %v6636_v2 = vld [vmem:[%s6990_s17 + $0xc4] sm:$0xf] }
 0x147   : > { %3777 = vmatprep.mubr.bf16.mxu0 %v5383_v22  ;;  %v1904_v10 = vor.u32 %v1903_v44, %v1899_v61  ;;  %v6011_v31 = vadd.f32 %v8399_v25, %v8386_v11  ;;  %v5902_v36 = vadd.f32 %v8431_v52, %v8420_v6  ;;  %v6014_v8 = vadd.f32 %v8433_v54, %v8422_v13  ;;  %v8535_v15 = vpop.f32.mrf.mxu1  ;;  %v8542_v25 = vld [vmem:[%s6990_s17 + $0xcc] sm:$0xf]  ;;  %v8545_v6 = vld [vmem:[%s6990_s17 + $0xd0] sm:$0xf] }
 0x148   : > { %v1895_v14 = vrot.slane %v1894_v49, 4  ;;  %v1301_v37 = vsel %vm7021_vm4, %v1296_v48, %v1300_v17  ;;  %v5399_v11 = vcombine.low %v8471_v32, %v8484_v7  ;;  %v5208_v24 = vrot.slane %v5192_v21, 9  ;;  %v8553_v34 = vpop.f32.mrf.mxu0  ;;  %v8561_v21 = vld [vmem:[%s6990_s17 + $0xd4] sm:$0x1] }
 0x149   : > { %v1905_v13 = vrot.slane %v1904_v10, 4  ;;  %v8547_v52 = vcombine.low %v1291_v39, %v1301_v37  ;;  %v8549_v54 = vadd.f32 %v6011_v31, %v5899_v23  ;;  %v8551_v18 = vadd.f32 %v6014_v8, %v5902_v36  ;;  %v8555_v38 = vpop.f32.mrf.mxu1 }
 0x14a   : > { %v1900_v17 = vsel %vm7021_vm4, %v1895_v14, %v1899_v61  ;;  %v1322_v32 = vshll.u32 %v5176_v3, 16  ;;  %v1497_v22 = vrot.slane %v6636_v2, 5  ;;  %v1500_v44 = vrot.slane %v5176_v3, 5  ;;  %v8569_v10 = vpop.f32.mrf.mxu0 }
 0x14b   : > { %9292 = vst [vmem:[#allocation34_spill] sm:$0xff] %v8547_v52  ;;  %9293 = vst [vmem:[#allocation35_spill] sm:$0xff] %v8549_v54  ;;  %v1910_v39 = vsel %vm7021_vm4, %v1905_v13, %v1909_v59  ;;  %3778 = vmatmul.mubr.bf16.gmra.mxu0 %v8547_v52  ;;  %v1912_v49 = vshrl.u32 %v8542_v25, 16  ;;  %v1915_v48 = vshll.u32 %v8542_v25, 16  ;;  %v1921_v23 = vshll.u32 %v8545_v6, 16  ;;  %v8571_v61 = vpop.f32.mrf.mxu1 }
 0x14c   : > { %9294 = vst [vmem:[#allocation36_spill] sm:$0xff] %v8551_v18  ;;  %v5415_v31 = vcombine.low %v1900_v17, %v1910_v39  ;;  %v1498_v36 = vsel %vm7030_vm5, %v5208_v24, %v1497_v22  ;;  %v1499_v8 = vrot.slane %v1497_v22, 4  ;;  %v1925_v3 = vshrl.u32 %v8545_v6, 16  ;;  %v8577_v2 = vpop.f32.mrf.mxu0 }
 0x14d   : > { %v1914_v59 = vrot.slane %v1912_v49, 4  ;;  %v1917_v14 = vrot.slane %v1915_v48, 5  ;;  %v1923_v37 = vrot.slane %v1921_v23, 5  ;;  %v1931_v13 = vshll.u32 %v8561_v21, 16  ;;  %v8579_v18 = vpop.f32.mrf.mxu1 }
 0x14e   : > { %3938 = vmatprep.mubr.bf16.mxu1 %v5415_v31  ;;  %v1324_v54 = vrot.slane %v1322_v32, 5  ;;  %v1501_v17 = vsel %vm7030_vm5, %v1499_v8, %v1500_v44  ;;  %v1927_v39 = vrot.slane %v1925_v3, 4  ;;  %v1315_v24 = vsel %vm7021_vm4, %v8438_v46, %v8182_v63  ;;  %v8590_v52 = vpop.f32.mrf.mxu0 }
 0x14f   : > { %3939 = vmatmul.mubr.bf16.gmra.mxu1 %v5399_v11  ;;  %v5384_v22 = vcombine.low %v1498_v36, %v1501_v17  ;;  %v1918_v49 = vor.u32 %v1917_v14, %v1914_v59  ;;  %v1933_v48 = vrot.slane %v1931_v13, 5  ;;  %v1319_v23 = vor.u32 %v8294_v45, %v8182_v63  ;;  %v8592_v32 = vpop.f32.mrf.mxu1 }
 0x150   : > { %v1928_v44 = vor.u32 %v1927_v39, %v1923_v37  ;;  %v5400_v31 = vcombine.low %v8542_v25, %v8545_v6  ;;  %v5905_v46 = vadd.f32 %v8461_v9, %v8445_v53  ;;  %v6017_v11 = vadd.f32 %v8463_v42, %v8447_v26  ;;  %v5919_v3 = vpop.f32.mrf.mxu0  ;;  %v6637_v9 = vld [vmem:[%s6990_s17 + $0x1c] sm:$0xf]  ;;  %v5258_v26 = vld [vmem:[%s6990_s17 + $0x24] sm:$0xe] }
 0x151   : > { %3785 = vmatprep.mubr.bf16.mxu0 %v5384_v22  ;;  %v1919_v63 = vrot.slane %v1918_v49, 4  ;;  %v1320_v45 = vrot.slane %v1319_v23, 4  ;;  %v5908_v36 = vadd.f32 %v8497_v19, %v8473_v28  ;;  %v6020_v8 = vadd.f32 %v8499_v60, %v8475_v43  ;;  %v6031_v59 = vpop.f32.mrf.mxu1  ;;  %v6638_v28 = vld [vmem:[%s6990_s17 + $0x20] sm:$0x1]  ;;  %v5259_v43 = vld [vmem:[%s6990_s17 + $0x30] sm:$0xe] }
 0x152   : > { %v1929_v25 = vrot.slane %v1928_v44, 4  ;;  %v8604_v14 = vadd.f32 %v6017_v11, %v5905_v46  ;;  %v5273_v53 = vrot.slane %v5257_v5, 9  ;;  %v2001_v13 = vrot.slane %v6637_v9, 5  ;;  %v8616_v60 = vpop.f32.mrf.mxu0  ;;  %v6640_v9 = vld [vmem:[%s6990_s17 + $0x44] sm:$0x1] }
 0x153   : > { %v1924_v42 = vsel %vm7021_vm4, %v1919_v63, %v1923_v37  ;;  %v1325_v17 = vsel %vm7021_vm4, %v1320_v45, %v1324_v54  ;;  %v8612_v39 = vadd.f32 %v6020_v8, %v5908_v36  ;;  %v2004_v19 = vrot.slane %v6638_v28, 5  ;;  %v8618_v22 = vpop.f32.mrf.mxu1  ;;  %v6639_v8 = vld [vmem:[%s6990_s17 + $0x34] sm:$0xf] }
 0x154   : > { %v1934_v5 = vsel %vm7021_vm4, %v1929_v25, %v1933_v48  ;;  %v8622_v49 = vcombine.low %v1315_v24, %v1325_v17  ;;  %v2002_v37 = vsel %vm7030_vm5, %v5273_v53, %v2001_v13  ;;  %v2003_v23 = vrot.slane %v2001_v13, 4  ;;  %v5922_v63 = vpop.f32.mrf.mxu0  ;;  %v5260_v53 = vld [vmem:[%s6990_s17 + $0x3c] sm:$0xe] }
 0x155   : > { %v5416_v54 = vcombine.low %v1924_v42, %v1934_v5  ;;  %v5274_v44 = vrot.slane %v5258_v26, 9  ;;  %v5911_v46 = vadd.f32 %v8520_v27, %v8507_v57  ;;  %v6023_v11 = vadd.f32 %v8522_v62, %v8509_v30  ;;  %v6034_v55 = vpop.f32.mrf.mxu1  ;;  %v6641_v26 = vld [vmem:[%s6990_s17 + $0x38] sm:$0x1]  ;;  %v5261_v42 = vld [vmem:[%s6990_s17 + $0x48] sm:$0xe] }
 0x156   : > { %3786 = vmatmul.mubr.bf16.gmra.mxu0 %v8622_v49  ;;  %v2005_v24 = vsel %vm7030_vm5, %v2003_v23, %v2004_v19  ;;  %v5914_v48 = vadd.f32 %v8553_v34, %v8533_v47  ;;  %v6026_v45 = vadd.f32 %v8555_v38, %v8535_v15  ;;  %v5275_v36 = vrot.slane %v5259_v43, 9  ;;  %v5924_v47 = vpop.f32.mrf.mxu0  ;;  %v6642_v19 = vld [vmem:[%s6990_s17 + $0x40] sm:$0xf] }
 0x157   : > { %3946 = vmatprep.mubr.bf16.mxu1 %v5416_v54  ;;  %v5417_v57 = vcombine.low %v2002_v37, %v2005_v24  ;;  %v9295_v62 = vrot.slane %v7778_v35, 5  ;;  %v8641_v27 = vadd.f32 %v6023_v11, %v5911_v46  ;;  %v2015_v25 = vrot.slane %v6639_v8, 5  ;;  %v6036_v34 = vpop.f32.mrf.mxu1  ;;  %v6643_v24 = vld [vmem:[%s6990_s17 + $0x4c] sm:$0xf] }
 0x158   : > { %v2025_v15 = vrot.slane %v6640_v9, 5  ;;  %3947 = vmatmul.mubr.bf16.gmra.mxu1 %v5400_v31  ;;  %v8647_v13 = vadd.f32 %v6026_v45, %v5914_v48  ;;  %v2018_v35 = vrot.slane %v6641_v26, 5  ;;  %v2022_v43 = vrot.slane %v6642_v19, 5  ;;  %v5925_v5 = vpop.f32.mrf.mxu0 }
 0x159   : > { %v2009_v30 = vsel %vm7030_vm5, %v5274_v44, %v9295_v62  ;;  %6357 = vmatprep.mubr.bf16.mxu0 %v5417_v57  ;;  %6405 = vmatprep.mubr.bf16.mxu1 %v7785_v4  ;;  %v2016_v17 = vsel %vm7030_vm5, %v5275_v36, %v2015_v25  ;;  %v2017_v28 = vrot.slane %v2015_v25, 4  ;;  %v5917_v31 = vadd.f32 %v8577_v2, %v8569_v10  ;;  %v5262_v62 = vld [vmem:[%s6990_s17 + $0x54] sm:$0xe] }
 0x15a   : > { %v5418_v38 = vcombine.low %v2009_v30, %v7846_v1  ;;  %v6037_v1 = vpop.f32.mrf.mxu1  ;;  %v5276_v37 = vrot.slane %v5260_v53, 9  ;;  %v6029_v23 = vadd.f32 %v8579_v18, %v8571_v61  ;;  %v5920_v54 = vadd.f32 %v5919_v3, %v8590_v52  ;;  %v5927_v10 = vpop.f32.mrf.mxu0  ;;  %v6644_v18 = vld [vmem:[%s6990_s17 + $0x50] sm:$0x1]  ;;  %v6645_v53 = vld [vmem:[%s6990_s17 + $0x58] sm:$0xf] }
 0x15b   : > { %v6032_v4 = vadd.f32 %v6031_v59, %v8592_v32  ;;  %v2019_v44 = vsel %vm7030_vm5, %v2017_v28, %v2018_v35  ;;  %v2024_v46 = vrot.slane %v2022_v43, 4  ;;  %v5277_v11 = vrot.slane %v5261_v42, 9  ;;  %v5263_v42 = vld [vmem:[%s6990_s17 + $0x60] sm:$0xe] }
 0x15c   : > { %v2029_v48 = vrot.slane %v6643_v24, 5  ;;  %v6039_v2 = vpop.f32.mrf.mxu1  ;;  %v5419_v45 = vcombine.low %v2016_v17, %v2019_v44  ;;  %v8664_v36 = vadd.f32 %v6029_v23, %v5917_v31  ;;  %v2032_v52 = vrot.slane %v6644_v18, 5  ;;  %v5928_v32 = vpop.f32.mrf.mxu0  ;;  %v5264_v18 = vld [vmem:[%s6990_s17 + $0x6c] sm:$0xe] }
 0x15d   : > { %v8666_v57 = vadd.f32 %v6032_v4, %v5920_v54  ;;  %v2023_v59 = vsel %vm7030_vm5, %v5276_v37, %v2022_v43  ;;  %v5923_v30 = vadd.f32 %v5922_v63, %v8616_v60  ;;  %v6035_v8 = vadd.f32 %v6034_v55, %v8618_v22  ;;  %v6646_v63 = vld [vmem:[%s6990_s17 + $0x5c] sm:$0x1]  ;;  %v6648_v4 = vld [vmem:[%s6990_s17 + $0x70] sm:$0xf] }
 0x15e   : > { %v2031_v61 = vrot.slane %v2029_v48, 4  ;;  %v6040_v3 = vpop.f32.mrf.mxu1  ;;  %6358 = vmatmul.mubr.bf16.vlgmr.msra.gmra.mxu0 %v5418_v38  ;;  %v2026_v25 = vsel %vm7030_vm5, %v2024_v46, %v2025_v15  ;;  %v2036_v9 = vrot.slane %v6645_v53, 5  ;;  %v5926_v26 = vadd.f32 %v5925_v5, %v5924_v47  ;;  %v5930_v38 = vpop.f32.mrf.mxu0  ;;  %v6647_v15 = vld [vmem:[%s6990_s17 + $0x64] sm:$0xf] }
 0x15f   : > { %6361 = vmatprep.mubr.bf16.mxu0 %v5419_v45  ;;  %v6038_v35 = vadd.f32 %v6037_v1, %v6036_v34  ;;  %v2030_v28 = vsel %vm7030_vm5, %v5277_v11, %v2029_v48  ;;  %v8683_v22 = vadd.f32 %v6035_v8, %v5923_v30  ;;  %v2039_v55 = vrot.slane %v6646_v63, 5  ;;  %v6649_v48 = vld [vmem:[%s6990_s17 + $0x68] sm:$0x1]  ;;  %v8699_v8 = vld [vmem:[%s6990_s17 + $0x8c] sm:$0x1] }
 0x160   : > { %v6042_v17 = vpop.f32.mrf.mxu1  ;;  %6406 = vmatmul.mubr.bf16.vlgmr.msra.gmra.mxu1 %v7874_v33  ;;  %v2033_v60 = vsel %vm7030_vm5, %v2031_v61, %v2032_v52  ;;  %v5278_v47 = vrot.slane %v5262_v62, 9  ;;  %v2043_v19 = vrot.slane %v6647_v15, 5  ;;  %v5931_v33 = vpop.f32.mrf.mxu0  ;;  %v5420_v31 = vcombine.low %v2023_v59, %v2026_v25  ;;  %v5265_v59 = vld [vmem:[%s6990_s17 + $0x78] sm:$0xe]  ;;  %v6651_v62 = vld [vmem:[%s6990_s17 + $0x74] sm:$0x1] }
 0x161   : > { %6409 = vmatprep.mubr.bf16.mxu1 %v7927_v51  ;;  %v8687_v34 = vadd.f32 %v6038_v35, %v5926_v26  ;;  %v5279_v5 = vrot.slane %v5263_v42, 9  ;;  %v5929_v1 = vadd.f32 %v5928_v32, %v5927_v10  ;;  %v6041_v37 = vadd.f32 %v6040_v3, %v6039_v2  ;;  %v6650_v10 = vld [vmem:[%s6990_s17 + $0x7c] sm:$0xf] }
 0x162   : > { %v6043_v43 = vpop.f32.mrf.mxu1  ;;  %v5421_v23 = vcombine.low %v2030_v28, %v2033_v60  ;;  %v2038_v54 = vrot.slane %v2036_v9, 4  ;;  %v2050_v51 = vrot.slane %v6648_v4, 5  ;;  %v5932_v44 = vadd.f32 %v5931_v33, %v5930_v38  ;;  %v5933_v46 = vpop.f32.mrf.mxu0 }
 0x163   : > { %v2045_v24 = vrot.slane %v2043_v19, 4  ;;  %v2046_v45 = vrot.slane %v6649_v48, 5  ;;  %v8693_v52 = vadd.f32 %v6041_v37, %v5929_v1  ;;  %v6044_v61 = vadd.f32 %v6043_v43, %v6042_v17  ;;  %v5269_v37 = vld [vmem:[%s6990_s17 + $0xa8] sm:$0xe] }
 0x164   : > { %v6045_v11 = vpop.f32.mrf.mxu1  ;;  %v2057_v32 = vrot.slane %v6650_v10, 5  ;;  %v5934_v2 = vpop.f32.mrf.mxu0  ;;  %v2053_v30 = vrot.slane %v6651_v62, 5  ;;  %v2067_v25 = vrot.slane %v8699_v8, 5  ;;  %v2037_v53 = vsel %vm7030_vm5, %v5278_v47, %v2036_v9  ;;  %v8714_v47 = vld [vmem:[%s6990_s17 + $0x84] sm:$0xe] }
 0x165   : > { %v8704_v26 = vadd.f32 %v6044_v61, %v5932_v44  ;;  %v2040_v35 = vsel %vm7030_vm5, %v2038_v54, %v2039_v55  ;;  %v2044_v42 = vsel %vm7030_vm5, %v5279_v5, %v2043_v19  ;;  %v5280_v38 = vrot.slane %v5264_v18, 9  ;;  %v8739_v10 = vld [vmem:[%s6990_s17 + $0x88] sm:$0xf] }
 0x166   : > { %v6046_v3 = vpop.f32.mrf.mxu1  ;;  %6362 = vmatmul.mubr.bf16.gmra.mxu0 %v5420_v31  ;;  %v2052_v17 = vrot.slane %v2050_v51, 4  ;;  %v5936_v28 = vpop.f32.mrf.mxu0  ;;  %v2047_v9 = vsel %vm7030_vm5, %v2045_v24, %v2046_v45  ;;  %v5281_v63 = vrot.slane %v5265_v59, 9  ;;  %v5935_v15 = vadd.f32 %v5934_v2, %v5933_v46  ;;  %v6653_v31 = vld [vmem:[%s6990_s17 + $0x80] sm:$0x1]  ;;  %v5270_v46 = vld [vmem:[%s6990_s17 + $0xb4] sm:$0xe] }
 0x167   : > { %6365 = vmatprep.mubr.bf16.mxu0 %v5421_v23  ;;  %v6047_v55 = vadd.f32 %v6046_v3, %v6045_v11  ;;  %v2095_v33 = vrot.slane %v8412_v16, 5  ;;  %v2109_v19 = vrot.slane %v8561_v21, 5  ;;  %v2059_v43 = vrot.slane %v2057_v32, 4  ;;  %v8734_v45 = vld [vmem:[%s6990_s17 + $0x90] sm:$0xe] }
 0x168   : > { %v6048_v60 = vpop.f32.mrf.mxu1  ;;  %6410 = vmatmul.mubr.bf16.gmra.mxu1 %v7987_v58  ;;  %v2060_v5 = vrot.slane %v6653_v31, 5  ;;  %v5937_v58 = vpop.f32.mrf.mxu0  ;;  %v5422_v23 = vcombine.low %v2037_v53, %v2040_v35  ;;  %v5423_v11 = vcombine.low %v2044_v42, %v2047_v9  ;;  %v8726_v24 = vsel %vm7030_vm5, %v5280_v38, %v2050_v51 }
 0x169   : > { %6413 = vmatprep.mubr.bf16.mxu1 %v8018_v12  ;;  %v8721_v54 = vadd.f32 %v6047_v55, %v5935_v15  ;;  %v5938_v4 = vadd.f32 %v5937_v58, %v5936_v28  ;;  %v8730_v12 = vsel %vm7030_vm5, %v2052_v17, %v2053_v30  ;;  %v5282_v48 = vrot.slane %v8714_v47, 9  ;;  %v5271_v17 = vld [vmem:[%s6990_s17 + $0xc0] sm:$0xe] }
 0x16a   : > { %v6049_v1 = vpop.f32.mrf.mxu1  ;;  %v5939_v18 = vpop.f32.mrf.mxu0  ;;  %v2058_v59 = vsel %vm7030_vm5, %v5281_v63, %v2057_v32  ;;  %v2064_v2 = vrot.slane %v8739_v10, 5  ;;  %v5285_v3 = vrot.slane %v5269_v37, 9  ;;  %v2061_v62 = vsel %vm7030_vm5, %v2059_v43, %v2060_v5  ;;  %v9297_v5 = vld [vmem:[#allocation25_spill] sm:$0xff] }
 0x16b   : > { %v6050_v44 = vadd.f32 %v6049_v1, %v6048_v60  ;;  %v2085_v35 = vrot.slane %v8330_v29, 5  ;;  %v2088_v42 = vrot.slane %v8348_v40, 5  ;;  %v5286_v38 = vrot.slane %v5270_v46, 9  ;;  %v9296_v60 = vld [vmem:[#allocation19_spill] sm:$0xff] }
 0x16c   : > { %v6051_v61 = vpop.f32.mrf.mxu1  ;;  %v5940_v30 = vpop.f32.mrf.mxu0  ;;  %v5424_v32 = vcombine.low %v8726_v24, %v8730_v12  ;;  %v5283_v28 = vrot.slane %v8734_v45, 9  ;;  %v2071_v9 = vrot.slane %v9296_v60, 5  ;;  %v2092_v31 = vrot.slane %v8409_v41, 5 }
 0x16d   : > { %v8742_v51 = vadd.f32 %v6050_v44, %v5938_v4  ;;  %v5941_v63 = vadd.f32 %v5940_v30, %v5939_v18  ;;  %v8755_v29 = vsel %vm7030_vm5, %v5285_v3, %v2085_v35  ;;  %v2087_v40 = vrot.slane %v2085_v35, 4  ;;  %v5272_v4 = vld [vmem:[%s6990_s17 + $0xcc] sm:$0xe]  ;;  %v9298_v44 = vld [vmem:[#allocation26_spill] sm:$0xff] }
 0x16e   : > { %v6052_v53 = vpop.f32.mrf.mxu1  ;;  %6366 = vmatmul.mubr.bf16.gmra.mxu0 %v5422_v23  ;;  %v5942_v55 = vpop.f32.mrf.mxu0  ;;  %v5425_v58 = vcombine.low %v2058_v59, %v2061_v62  ;;  %v2066_v1 = vrot.slane %v2064_v2, 4  ;;  %v5287_v37 = vrot.slane %v5271_v17, 9  ;;  %v2099_v23 = vrot.slane %v8484_v7, 5 }
 0x16f   : > { %6369 = vmatprep.mubr.bf16.mxu0 %v5423_v11  ;;  %v6053_v15 = vadd.f32 %v6052_v53, %v6051_v61  ;;  %v8766_v12 = vsel %vm7030_vm5, %v2087_v40, %v2088_v42  ;;  %v8770_v41 = vsel %vm7030_vm5, %v5286_v38, %v2092_v31  ;;  %v2102_v45 = vrot.slane %v8487_v50, 5  ;;  %v6655_v38 = vld [vmem:[%s6990_s17 + $0x98] sm:$0x1] }
 0x170   : > { %v6054_v43 = vpop.f32.mrf.mxu1  ;;  %6414 = vmatmul.mubr.bf16.gmra.mxu1 %v9297_v5  ;;  %v5943_v11 = vpop.f32.mrf.mxu0  ;;  %v5429_v61 = vcombine.low %v8755_v29, %v8766_v12  ;;  %v2094_v59 = vrot.slane %v2092_v31, 4  ;;  %v8777_v62 = vsel %vm7030_vm5, %v5287_v37, %v2099_v23  ;;  %v2101_v30 = vrot.slane %v2099_v23, 4  ;;  %v9299_v23 = vld [vmem:[#allocation22_spill] sm:$0xff] }
 0x171   : > { %6417 = vmatprep.mubr.bf16.mxu1 %v9298_v44  ;;  %v8762_v46 = vadd.f32 %v6053_v15, %v5941_v63  ;;  %v5944_v18 = vadd.f32 %v5943_v11, %v5942_v55  ;;  %v5288_v53 = vrot.slane %v5272_v4, 9  ;;  %v2106_v35 = vrot.slane %v8545_v6, 5 }
 0x172   : > { %v6055_v24 = vpop.f32.mrf.mxu1  ;;  %v5945_v10 = vpop.f32.mrf.mxu0  ;;  %v2073_v42 = vrot.slane %v2071_v9, 4  ;;  %v2074_v17 = vrot.slane %v6655_v38, 5  ;;  %v8787_v60 = vsel %vm7030_vm5, %v2094_v59, %v2095_v33  ;;  %v2065_v5 = vsel %vm7030_vm5, %v5282_v48, %v2064_v2  ;;  %v5268_v48 = vld [vmem:[%s6990_s17 + $0x9c] sm:$0xe]  ;;  %s8948_s17 = sand.u32 1, %s6794_s22  }
 0x173   : > { %v6056_v7 = vadd.f32 %v6055_v24, %v6054_v43  ;;  %v5430_v63 = vcombine.low %v8770_v41, %v8787_v60  ;;  %v8793_v43 = vsel %vm7030_vm5, %v2101_v30, %v2102_v45  ;;  %v8797_v6 = vsel %vm7030_vm5, %v5288_v53, %v2106_v35  ;;  %v9309_v60 = vld [vmem:[#allocation18_spill] sm:$0xff]  ;;  %s5108_s14 = sshll.u32 %s8948_s17, 7  ;;  %s4879_s20 = scalar_lea.sflag [#allocation3], %s8948_s17 }
 0x174   : > { %v6057_v3 = vpop.f32.mrf.mxu1  ;;  %v5946_v15 = vpop.f32.mrf.mxu0  ;;  %v2108_v40 = vrot.slane %v2106_v35, 4  ;;  %v5431_v33 = vcombine.low %v8777_v62, %v8793_v43  ;;  %v2068_v37 = vsel %vm7030_vm5, %v2066_v1, %v2067_v25  ;;  %v2078_v4 = vrot.slane %v9299_v23, 5  ;;  %v9301_v1 = vld [vmem:[#allocation13_spill] sm:$0xff]  ;;  %s8958_s15 = scalar_lea.vmem [#allocation2], %s5108_s14  ;;  %s8961_s11 = scalar_lea.vmem [#allocation6], %s5108_s14 }
 0x175   : > { %v8781_v50 = vadd.f32 %v6056_v7, %v5944_v18  ;;  %v5947_v16 = vadd.f32 %v5946_v15, %v5945_v10  ;;  %v2072_v47 = vsel %vm7030_vm5, %v5283_v28, %v2071_v9  ;;  %v2075_v8 = vsel %vm7030_vm5, %v2073_v42, %v2074_v17  ;;  %v9302_v7 = vld [vmem:[#allocation28_spill] sm:$0xff]  ;;  %s4907_s18 = sshll.u32 %s8958_s15, 4  ;;  %s9038_s18 = int_to_ptr.vmem [resolvable:$true] %s4907_s18 }
 0x176   : > { %v6058_v55 = vpop.f32.mrf.mxu1  ;;  %6370 = vmatmul.mubr.bf16.gmra.mxu0 %v5424_v32  ;;  %v5948_v44 = vpop.f32.mrf.mxu0  ;;  %v8814_v11 = vsel %vm7030_vm5, %v2108_v40, %v2109_v19  ;;  %v5426_v19 = vcombine.low %v2065_v5, %v2068_v37  ;;  %v2081_v59 = vrot.slane %v9302_v7, 5  ;;  %v5427_v10 = vcombine.low %v2072_v47, %v2075_v8  ;;  %v9304_v5 = vld [vmem:[#allocation29_spill] sm:$0xff]  ;;  %s6656_s9 = scalar_lea.vmem %s9038_s18, 2048  ;;  %p6663_p0 = scmp.lt.s32.totalorder %s9038_s18, %s6661_s12 }
 0x177   : > { %v6059_v31 = vadd.f32 %v6058_v55, %v6057_v3  ;;  %6373 = vmatprep.mubr.bf16.mxu0 %v5425_v58  ;;  %v9300_v58 = vld [vmem:[#allocation12_spill] sm:$0xff]  ;;  %v5432_v2 = vcombine.low %v8797_v6, %v8814_v11  ;;  %v5284_v28 = vrot.slane %v5268_v48, 9  ;;  %v2080_v9 = vrot.slane %v2078_v4, 4  ;;  %v9311_v11 = vld [vmem:[#allocation21_spill] sm:$0xff]  ;;  %p6657_p11 = scmp.ne.s32.totalorder %s9038_s18, %s6656_s9  ;;  %p6664_p1 = scmp.lt.s32.totalorder %s6662_s13, %s6656_s9 }
 0x178   : > { %v6060_v32 = vpop.f32.mrf.mxu1  ;;  %6418 = vmatmul.mubr.bf16.gmra.mxu1 %v9300_v58  ;;  %v5949_v21 = vpop.f32.mrf.mxu0 }
 0x179   : > { %v8822_v25 = vadd.f32 %v6059_v31, %v5947_v16  ;;  %6421 = vmatprep.mubr.bf16.mxu1 %v9301_v1  ;;  %v5950_v45 = vadd.f32 %v5949_v21, %v5948_v44  ;;  %v2079_v17 = vsel %vm7030_vm5, %v5284_v28, %v2078_v4  ;;  %v2082_v15 = vsel %vm7030_vm5, %v2080_v9, %v2081_v59  ;;  %v9303_v16 = vld [vmem:[#allocation27_spill] sm:$0xff]  ;;  %p6658_p12 = pnand %p6657_p11, %p6885_p5  ;;  %p6665_p2 = por %p6664_p1, %p6663_p0 }
 0x17a   : > { %v6061_v24 = vpop.f32.mrf.mxu1  ;;  %v5951_v3 = vpop.f32.mrf.mxu0  ;;  %v5428_v44 = vcombine.low %v2079_v17, %v2082_v15 }
 0x17b   : > { %v6062_v18 = vadd.f32 %v6061_v24, %v6060_v32  ;;  %v9305_v24 = vld [vmem:[#allocation31_spill] sm:$0xff]  ;;  %p6659_p13 = pneg %p6658_p12 }
 0x17c   : > { %v6063_v53 = vpop.f32.mrf.mxu1  ;;  %v5952_v35 = vpop.f32.mrf.mxu0 }
 0x17d   : > { %v8828_v30 = vadd.f32 %v6062_v18, %v5950_v45  ;;  %v5953_v42 = vadd.f32 %v5952_v35, %v5951_v3  ;;  %v9307_v3 = vld [vmem:[#allocation17_spill] sm:$0xff]  ;;  %p6666_p3 = pnand %p6665_p2, %p6659_p13 }
 0x17e   : > { %6374 = vmatmul.mubr.bf16.gmra.mxu0 %v5426_v19  ;;  %v6064_v38 = vpop.f32.mrf.mxu1  ;;  %v5954_v40 = vpop.f32.mrf.mxu0  ;;  %v9306_v19 = vld [vmem:[#allocation15_spill] sm:$0xff] }
 0x17f   : > { %6377 = vmatprep.mubr.bf16.mxu0 %v5427_v10  ;;  %v6065_v55 = vadd.f32 %v6064_v38, %v6063_v53  ;;  %v9308_v38 = vld [vmem:[#allocation34_spill] sm:$0xff] }
 0x180   : > { %6422 = vmatmul.mubr.bf16.gmra.mxu1 %v9303_v16  ;;  %v6066_v31 = vpop.f32.mrf.mxu1  ;;  %v5955_v23 = vpop.f32.mrf.mxu0 }
 0x181   : > { %6425 = vmatprep.mubr.bf16.mxu1 %v9304_v5  ;;  %v8836_v37 = vadd.f32 %v6065_v55, %v5953_v42  ;;  %v5956_v32 = vadd.f32 %v5955_v23, %v5954_v40  ;;  %v9310_v5 = vld [vmem:[#allocation14_spill] sm:$0xff] }
 0x182   : > { %v6067_v58 = vpop.f32.mrf.mxu1  ;;  %v6085_v8 = vpop.f32.mrf.mxu0 }
 0x183   : > { %v6068_v47 = vadd.f32 %v6067_v58, %v6066_v31 }
 0x184   : > { %v6086_v4 = vpop.f32.mrf.mxu0  ;;  %v6197_v0 = vpop.f32.mrf.mxu1 }
 0x185   : > { %v8838_v48 = vadd.f32 %v6068_v47, %v5956_v32  ;;  %v6087_v1 = vadd.f32 %v6086_v4, %v6085_v8 }
 0x186   : > { %6378 = vmatmul.mubr.bf16.gmra.mxu0 %v5428_v44  ;;  %v6088_v21 = vpop.f32.mrf.mxu0  ;;  %v6198_v18 = vpop.f32.mrf.mxu1 }
 0x187   : > { %6381 = vmatprep.mubr.bf16.mxu0 %v5429_v61  ;;  %v3668_v45 = vadd.f32 %v6087_v1, %v9306_v19  ;;  %v6199_v7 = vadd.f32 %v6198_v18, %v6197_v0 }
 0x188   : > { %6426 = vmatmul.mubr.bf16.gmra.mxu1 %v9305_v24  ;;  %v6089_v59 = vpop.f32.mrf.mxu0  ;;  %v6200_v10 = vpop.f32.mrf.mxu1 }
 0x189   : > { %6429 = vmatprep.mubr.bf16.mxu1 %v8416_v56  ;;  %v6090_v28 = vadd.f32 %v6089_v59, %v6088_v21  ;;  %v8846_v9 = vadd.f32 %v6199_v7, %v3668_v45 }
 0x18a   : > { %v6201_v35 = vpop.f32.mrf.mxu1 }
 0x18b   : > { %v3671_v53 = vadd.f32 %v6090_v28, %v9307_v3  ;;  %v6202_v42 = vadd.f32 %v6201_v35, %v6200_v10 }
 0x18c   : > { %v6203_v29 = vpop.f32.mrf.mxu1 }
 0x18d   : > { %v8855_v56 = vadd.f32 %v6202_v42, %v3671_v53  ;;  %v6091_v12 = vpop.f32.mrf.mxu0 }
 0x18e   : > { %6382 = vmatmul.mubr.bf16.gmra.mxu0 %v5430_v63  ;;  %v6204_v61 = vpop.f32.mrf.mxu1 }
 0x18f   : > { %6385 = vmatprep.mubr.bf16.mxu0 %v5431_v33  ;;  %v6205_v17 = vadd.f32 %v6204_v61, %v6203_v29  ;;  %v6092_v15 = vpop.f32.mrf.mxu0 }
 0x190   : > { %6430 = vmatmul.mubr.bf16.gmra.mxu1 %v8493_v20  ;;  %v6206_v55 = vpop.f32.mrf.mxu1  ;;  %v6093_v40 = vadd.f32 %v6092_v15, %v6091_v12 }
 0x191   : > { %6433 = vmatprep.mubr.bf16.mxu1 %v9308_v38  ;;  %v6094_v16 = vpop.f32.mrf.mxu0  ;;  %v9313_v38 = vld [vmem:[#allocation20_spill] sm:$0xff] }
 0x192   : > { %v6207_v41 = vpop.f32.mrf.mxu1  ;;  %v3676_v63 = vadd.f32 %v6093_v40, %v9309_v60  ;;  %v9314_v60 = vld [vmem:[#allocation30_spill] sm:$0xff] }
 0x193   : > { %v6208_v31 = vadd.f32 %v6207_v41, %v6206_v55  ;;  %v6095_v62 = vpop.f32.mrf.mxu0 }
 0x194   : > { %v6096_v43 = vadd.f32 %v6095_v62, %v6094_v16  ;;  %v6209_v20 = vpop.f32.mrf.mxu1  ;;  %v8863_v33 = vadd.f32 %v6205_v17, %v3676_v63 }
 0x196   : > { %6386 = vmatmul.mubr.bf16.gmra.mxu0 %v5432_v2  ;;  %v3679_v23 = vadd.f32 %v6096_v43, %v9310_v5  ;;  %v6097_v44 = vpop.f32.mrf.mxu0  ;;  %v6210_v32 = vpop.f32.mrf.mxu1 }
 0x197   : > { %v6211_v58 = vadd.f32 %v6210_v32, %v6209_v20  ;;  %v9315_v32 = vld [vmem:[#allocation23_spill] sm:$0xff] }
 0x198   : > { %6434 = vmatmul.mubr.bf16.gmra.mxu1 %v8622_v49  ;;  %v6098_v47 = vpop.f32.mrf.mxu0  ;;  %v6212_v8 = vpop.f32.mrf.mxu1  ;;  %v8867_v4 = vadd.f32 %v6208_v31, %v3679_v23  ;;  %v9312_v49 = vld [vmem:[#allocation16_spill] sm:$0xff] }
 0x199   : > { %v6099_v0 = vadd.f32 %v6098_v47, %v6097_v44 }
 0x19a   : > { %v6100_v1 = vpop.f32.mrf.mxu0  ;;  %v6213_v6 = vpop.f32.mrf.mxu1 }
 0x19b   : > { %v3684_v2 = vadd.f32 %v6099_v0, %v9311_v11  ;;  %v6214_v21 = vadd.f32 %v6213_v6, %v6212_v8 }
 0x19c   : > { %v6101_v24 = vpop.f32.mrf.mxu0 }
 0x19d   : > { %v6102_v19 = vadd.f32 %v6101_v24, %v6100_v1  ;;  %v6215_v45 = vpop.f32.mrf.mxu1  ;;  %v8870_v18 = vadd.f32 %v6211_v58, %v3684_v2  ;;  %v9316_v2 = vld [vmem:[#allocation24_spill] sm:$0xff] }
 0x19f   : > { %v3687_v7 = vadd.f32 %v6102_v19, %v9312_v49  ;;  %v6216_v59 = vpop.f32.mrf.mxu1 }
 0x1a0   : > { %v6103_v10 = vpop.f32.mrf.mxu0  ;;  %v6217_v28 = vadd.f32 %v6216_v59, %v6215_v45 }
 0x1a1   : > { %v6218_v3 = vpop.f32.mrf.mxu1  ;;  %v8873_v53 = vadd.f32 %v6214_v21, %v3687_v7 }
 0x1a2   : > { %v6104_v35 = vpop.f32.mrf.mxu0 }
 0x1a3   : > { %v6105_v42 = vadd.f32 %v6104_v35, %v6103_v10  ;;  %v6219_v29 = vpop.f32.mrf.mxu1  ;;  %v9317_v35 = vld [vmem:[#allocation32_spill] sm:$0xff] }
 0x1a4   : > { %v6106_v12 = vpop.f32.mrf.mxu0  ;;  %v6220_v61 = vadd.f32 %v6219_v29, %v6218_v3 }
 0x1a5   : > { %v3692_v17 = vadd.f32 %v6105_v42, %v9313_v38 }
 0x1a6   : > { %v6107_v15 = vpop.f32.mrf.mxu0 }
 0x1a7   : > { %v6108_v55 = vadd.f32 %v6107_v15, %v6106_v12  ;;  %v8876_v16 = vadd.f32 %v6217_v28, %v3692_v17  ;;  %v9318_v15 = vld [vmem:[#allocation33_spill] sm:$0xff] }
 0x1a8   : > { %v6221_v40 = vpop.f32.mrf.mxu1 }
 0x1a9   : > { %v3695_v63 = vadd.f32 %v6108_v55, %v9314_v60 }
 0x1aa   : > { %v6109_v41 = vpop.f32.mrf.mxu0  ;;  %v6222_v31 = vpop.f32.mrf.mxu1 }
 0x1ab   : > { %v6223_v43 = vadd.f32 %v6222_v31, %v6221_v40  ;;  %v8879_v23 = vadd.f32 %v6220_v61, %v3695_v63 }
 0x1ac   : > { %v6110_v62 = vpop.f32.mrf.mxu0  ;;  %v6224_v5 = vpop.f32.mrf.mxu1 }
 0x1ad   : > { %v6111_v20 = vadd.f32 %v6110_v62, %v6109_v41 }
 0x1ae   : > { %v6112_v44 = vpop.f32.mrf.mxu0  ;;  %v6225_v47 = vpop.f32.mrf.mxu1 }
 0x1af   : > { %v3700_v58 = vadd.f32 %v6111_v20, %v9315_v32  ;;  %v6226_v0 = vadd.f32 %v6225_v47, %v6224_v5 }
 0x1b0   : > { %v6113_v8 = vpop.f32.mrf.mxu0  ;;  %v6227_v11 = vpop.f32.mrf.mxu1 }
 0x1b1   : > { %v6114_v1 = vadd.f32 %v6113_v8, %v6112_v44  ;;  %v8882_v6 = vadd.f32 %v6223_v43, %v3700_v58  ;;  %v9319_v44 = vld [vmem:[#allocation35_spill] sm:$0xff] }
 0x1b2   : > { %v6115_v24 = vpop.f32.mrf.mxu0  ;;  %v6228_v19 = vpop.f32.mrf.mxu1 }
 0x1b3   : > { %v3703_v21 = vadd.f32 %v6114_v1, %v9316_v2  ;;  %v6229_v45 = vadd.f32 %v6228_v19, %v6227_v11  ;;  %v9320_v11 = vld [vmem:[#allocation36_spill] sm:$0xff] }
 0x1b4   : > { %v6116_v7 = vpop.f32.mrf.mxu0  ;;  %v6230_v59 = vpop.f32.mrf.mxu1 }
 0x1b5   : > { %v8885_v49 = vadd.f32 %v6226_v0, %v3703_v21  ;;  %v6117_v10 = vadd.f32 %v6116_v7, %v6115_v24 }
 0x1b6   : > { %v6118_v28 = vpop.f32.mrf.mxu0  ;;  %v6231_v3 = vpop.f32.mrf.mxu1 }
 0x1b7   : > { %v3708_v42 = vadd.f32 %v6117_v10, %v9317_v35  ;;  %v6232_v29 = vadd.f32 %v6231_v3, %v6230_v59 }
 0x1b8   : > { %v6119_v12 = vpop.f32.mrf.mxu0 }
 0x1b9   : > { %v6120_v61 = vadd.f32 %v6119_v12, %v6118_v28  ;;  %v8888_v38 = vadd.f32 %v6229_v45, %v3708_v42 }
 0x1bb   : > { %v6233_v17 = vpop.f32.mrf.mxu1  ;;  %v3711_v55 = vadd.f32 %v6120_v61, %v9318_v15 }
 0x1bd   : > { %v6121_v40 = vpop.f32.mrf.mxu0  ;;  %v6234_v41 = vpop.f32.mrf.mxu1  ;;  %v8891_v63 = vadd.f32 %v6232_v29, %v3711_v55 }
 0x1be   : > { %v6235_v60 = vadd.f32 %v6234_v41, %v6233_v17 }
 0x1bf   : > { %v6122_v31 = vpop.f32.mrf.mxu0  ;;  %v6236_v62 = vpop.f32.mrf.mxu1 }
 0x1c0   : > { %v6123_v43 = vadd.f32 %v6122_v31, %v6121_v40 }
 0x1c1   : > { %v6124_v20 = vpop.f32.mrf.mxu0  ;;  %v6237_v5 = vpop.f32.mrf.mxu1 }
 0x1c2   : > { %v3716_v32 = vadd.f32 %v6123_v43, %v9319_v44  ;;  %v6238_v58 = vadd.f32 %v6237_v5, %v6236_v62 }
 0x1c3   : > { %v6125_v47 = vpop.f32.mrf.mxu0 }
 0x1c4   : > { %v6126_v8 = vadd.f32 %v6125_v47, %v6124_v20  ;;  %v6239_v0 = vpop.f32.mrf.mxu1  ;;  %v8894_v1 = vadd.f32 %v6235_v60, %v3716_v32 }
 0x1c6   : > { %v3719_v2 = vadd.f32 %v6126_v8, %v9320_v11  ;;  %v6240_v24 = vpop.f32.mrf.mxu1 }
 0x1c7   : > { %v6127_v21 = vpop.f32.mrf.mxu0  ;;  %v6241_v19 = vadd.f32 %v6240_v24, %v6239_v0 }
 0x1c8   : > { %v6242_v7 = vpop.f32.mrf.mxu1  ;;  %v8897_v59 = vadd.f32 %v6238_v58, %v3719_v2 }
 0x1c9   : > { %v6128_v45 = vpop.f32.mrf.mxu0 }
 0x1ca   : > { %v6129_v10 = vadd.f32 %v6128_v45, %v6127_v21  ;;  %v6243_v3 = vpop.f32.mrf.mxu1 }
 0x1cb   : > { %v6130_v28 = vpop.f32.mrf.mxu0  ;;  %v6244_v42 = vadd.f32 %v6243_v3, %v6242_v7 }
 0x1cc   : > { %v3724_v35 = vadd.f32 %v6129_v10, %v8604_v14 }
 0x1cd   : > { %v6131_v29 = vpop.f32.mrf.mxu0 }
 0x1ce   : > { %v6132_v12 = vadd.f32 %v6131_v29, %v6130_v28  ;;  %v8900_v61 = vadd.f32 %v6241_v19, %v3724_v35  ;;  %v6245_v17 = vpop.f32.mrf.mxu1 }
 0x1d0   : > { %v3727_v15 = vadd.f32 %v6132_v12, %v8612_v39  ;;  %v6133_v55 = vpop.f32.mrf.mxu0  ;;  %v6246_v40 = vpop.f32.mrf.mxu1 }
 0x1d1   : > { %v6247_v60 = vadd.f32 %v6246_v40, %v6245_v17 }
 0x1d2   : > { %v6134_v41 = vpop.f32.mrf.mxu0  ;;  %v8903_v31 = vadd.f32 %v6244_v42, %v3727_v15  ;;  %v6248_v43 = vpop.f32.mrf.mxu1 }
 0x1d3   : > { %v6135_v62 = vadd.f32 %v6134_v41, %v6133_v55 }
 0x1d4   : > { %v6136_v20 = vpop.f32.mrf.mxu0  ;;  %v6249_v14 = vpop.f32.mrf.mxu1 }
 0x1d5   : > { %v3732_v5 = vadd.f32 %v6135_v62, %v8641_v27  ;;  %v6250_v32 = vadd.f32 %v6249_v14, %v6248_v43 }
 0x1d6   : > { %v6137_v44 = vpop.f32.mrf.mxu0 }
 0x1d7   : > { %v6138_v58 = vadd.f32 %v6137_v44, %v6136_v20  ;;  %v8906_v47 = vadd.f32 %v6247_v60, %v3732_v5 }
 0x1d9   : > { %v3735_v8 = vadd.f32 %v6138_v58, %v8647_v13  ;;  %v6251_v39 = vpop.f32.mrf.mxu1 }
 0x1db   : > { %v6139_v0 = vpop.f32.mrf.mxu0  ;;  %v6252_v11 = vpop.f32.mrf.mxu1  ;;  %v8909_v2 = vadd.f32 %v6250_v32, %v3735_v8 }
 0x1dc   : > { %v6253_v21 = vadd.f32 %v6252_v11, %v6251_v39 }
 0x1dd   : > { %v6140_v24 = vpop.f32.mrf.mxu0  ;;  %v6254_v19 = vpop.f32.mrf.mxu1 }
 0x1de   : > { %v6141_v45 = vadd.f32 %v6140_v24, %v6139_v0 }
 0x1df   : > { %v6142_v7 = vpop.f32.mrf.mxu0  ;;  %v6255_v10 = vpop.f32.mrf.mxu1 }
 0x1e0   : > { %v3740_v27 = vadd.f32 %v6141_v45, %v8664_v36  ;;  %v6256_v28 = vadd.f32 %v6255_v10, %v6254_v19 }
 0x1e1   : > { %v6143_v3 = vpop.f32.mrf.mxu0 }
 0x1e2   : > { %v6144_v35 = vadd.f32 %v6143_v3, %v6142_v7  ;;  %v8912_v42 = vadd.f32 %v6253_v21, %v3740_v27 }
 0x1e4   : > { %v3743_v13 = vadd.f32 %v6144_v35, %v8666_v57  ;;  %v6257_v29 = vpop.f32.mrf.mxu1 }
 0x1e6   : > { %v6145_v12 = vpop.f32.mrf.mxu0  ;;  %v6258_v17 = vpop.f32.mrf.mxu1  ;;  %v8915_v15 = vadd.f32 %v6256_v28, %v3743_v13 }
 0x1e7   : > { %v6259_v55 = vadd.f32 %v6258_v17, %v6257_v29 }
 0x1e8   : > { %v6146_v40 = vpop.f32.mrf.mxu0  ;;  %v6260_v41 = vpop.f32.mrf.mxu1 }
 0x1e9   : > { %v6147_v60 = vadd.f32 %v6146_v40, %v6145_v12 }
 0x1ea   : > { %v6148_v62 = vpop.f32.mrf.mxu0  ;;  %v6261_v43 = vpop.f32.mrf.mxu1 }
 0x1eb   : > { %v3748_v36 = vadd.f32 %v6147_v60, %v8683_v22  ;;  %v6262_v20 = vadd.f32 %v6261_v43, %v6260_v41 }
 0x1ec   : > { %v6149_v5 = vpop.f32.mrf.mxu0 }
 0x1ed   : > { %v6150_v14 = vadd.f32 %v6149_v5, %v6148_v62  ;;  %v8918_v44 = vadd.f32 %v6259_v55, %v3748_v36 }
 0x1ef   : > { %v3751_v57 = vadd.f32 %v6150_v14, %v8687_v34  ;;  %v6263_v32 = vpop.f32.mrf.mxu1 }
 0x1f1   : > { %v6264_v8 = vpop.f32.mrf.mxu1  ;;  %v8921_v39 = vadd.f32 %v6262_v20, %v3751_v57 }
 0x1f2   : > { %v6151_v58 = vpop.f32.mrf.mxu0  ;;  %v6265_v0 = vadd.f32 %v6264_v8, %v6263_v32 }
 0x1f3   : > { %v6266_v21 = vpop.f32.mrf.mxu1 }
 0x1f4   : > { %v6152_v11 = vpop.f32.mrf.mxu0 }
 0x1f5   : > { %v6153_v24 = vadd.f32 %v6152_v11, %v6151_v58  ;;  %v6267_v45 = vpop.f32.mrf.mxu1 }
 0x1f6   : > { %v6154_v19 = vpop.f32.mrf.mxu0  ;;  %v6268_v7 = vadd.f32 %v6267_v45, %v6266_v21 }
 0x1f7   : > { %v3756_v22 = vadd.f32 %v6153_v24, %v8693_v52 }
 0x1f8   : > { %v6155_v10 = vpop.f32.mrf.mxu0 }
 0x1f9   : > { %v6156_v27 = vadd.f32 %v6155_v10, %v6154_v19  ;;  %v8924_v28 = vadd.f32 %v6265_v0, %v3756_v22 }
 0x1fa   : > { %v6157_v3 = vpop.f32.mrf.mxu0 }
 0x1fb   : > { %v3759_v34 = vadd.f32 %v6156_v27, %v8704_v26  ;;  %v6269_v35 = vpop.f32.mrf.mxu1 }
 0x1fc   : > { %v6158_v13 = vpop.f32.mrf.mxu0 }
 0x1fd   : > { %v6159_v29 = vadd.f32 %v6158_v13, %v6157_v3  ;;  %v6270_v12 = vpop.f32.mrf.mxu1  ;;  %v8927_v17 = vadd.f32 %v6268_v7, %v3759_v34 }
 0x1fe   : > { %v6271_v55 = vadd.f32 %v6270_v12, %v6269_v35  ;;  %v6160_v40 = vpop.f32.mrf.mxu0 }
 0x1ff   : > { %v3764_v41 = vadd.f32 %v6159_v29, %v8721_v54  ;;  %v6272_v60 = vpop.f32.mrf.mxu1 }
 0x200   : > { %v6161_v52 = vpop.f32.mrf.mxu0 }
 0x201   : > { %v6162_v62 = vadd.f32 %v6161_v52, %v6160_v40  ;;  %v6273_v43 = vpop.f32.mrf.mxu1  ;;  %v8930_v36 = vadd.f32 %v6271_v55, %v3764_v41 }
 0x202   : > { %v6274_v20 = vadd.f32 %v6273_v43, %v6272_v60 }
 0x203   : > { %v3767_v5 = vadd.f32 %v6162_v62, %v8742_v51  ;;  %v6163_v26 = vpop.f32.mrf.mxu0 }
 0x205   : > { %v6275_v14 = vpop.f32.mrf.mxu1  ;;  %v6164_v57 = vpop.f32.mrf.mxu0  ;;  %v8933_v32 = vadd.f32 %v6274_v20, %v3767_v5 }
 0x206   : > { %v6165_v58 = vadd.f32 %v6164_v57, %v6163_v26 }
 0x207   : > { %v6276_v8 = vpop.f32.mrf.mxu1  ;;  %v6166_v0 = vpop.f32.mrf.mxu0 }
 0x208   : > { %v3772_v11 = vadd.f32 %v6165_v58, %v8762_v46  ;;  %v6277_v54 = vadd.f32 %v6276_v8, %v6275_v14 }
 0x209   : > { %v6278_v21 = vpop.f32.mrf.mxu1  ;;  %v6167_v24 = vpop.f32.mrf.mxu0 }
 0x20a   : > { %v6168_v19 = vadd.f32 %v6167_v24, %v6166_v0  ;;  %v8936_v45 = vadd.f32 %v6277_v54, %v3772_v11 }
 0x20b   : > { %v6279_v22 = vpop.f32.mrf.mxu1  ;;  %v6169_v7 = vpop.f32.mrf.mxu0 }
 0x20c   : > { %v3775_v51 = vadd.f32 %v6168_v19, %v8781_v50  ;;  %v6280_v10 = vadd.f32 %v6279_v22, %v6278_v21 }
 0x20d   : > { %v6170_v27 = vpop.f32.mrf.mxu0 }
 0x20e   : > { %v6171_v3 = vadd.f32 %v6170_v27, %v6169_v7  ;;  %v8939_v34 = vadd.f32 %v6280_v10, %v3775_v51 }
 0x20f   : > { %v6281_v35 = vpop.f32.mrf.mxu1  ;;  %v6172_v13 = vpop.f32.mrf.mxu0 }
 0x210   : > { %v3780_v29 = vadd.f32 %v6171_v3, %v8822_v25 }
 0x211   : > { %v6282_v46 = vpop.f32.mrf.mxu1  ;;  %v6173_v12 = vpop.f32.mrf.mxu0 }
 0x212   : > { %v6283_v55 = vadd.f32 %v6282_v46, %v6281_v35  ;;  %v6174_v40 = vadd.f32 %v6173_v12, %v6172_v13 }
 0x213   : > { %v6284_v41 = vpop.f32.mrf.mxu1 }
 0x214   : > { %v3783_v60 = vadd.f32 %v6174_v40, %v8828_v30  ;;  %v8943_v52 = vadd.f32 %v6283_v55, %v3780_v29 }
 0x215   : > { %v6285_v50 = vpop.f32.mrf.mxu1 }
 0x216   : > { %v6286_v62 = vadd.f32 %v6285_v50, %v6284_v41  ;;  %v6175_v43 = vpop.f32.mrf.mxu0 }
 0x218   : > { %v6287_v20 = vpop.f32.mrf.mxu1  ;;  %v6176_v5 = vpop.f32.mrf.mxu0  ;;  %v8945_v26 = vadd.f32 %v6286_v62, %v3783_v60 }
 0x219   : > { %v6177_v54 = vadd.f32 %v6176_v5, %v6175_v43 }
 0x21a   : > { %v6288_v14 = vpop.f32.mrf.mxu1  ;;  %v6178_v57 = vpop.f32.mrf.mxu0 }
 0x21b   : > { %v8955_v27 = vadd.f32 %v6177_v54, %v8836_v37  ;;  %v6289_v13 = vadd.f32 %v6288_v14, %v6287_v20 }
 0x21c   : > { %v6290_v25 = vpop.f32.mrf.mxu1  ;;  %v6179_v58 = vpop.f32.mrf.mxu0 }
 0x21d   : > { %v6180_v29 = vadd.f32 %v6179_v58, %v6178_v57 }
 0x21e   : > { %v6291_v8 = vpop.f32.mrf.mxu1  ;;  %v6359_v0 = vpop.f32.mrf.mxu0 }
 0x21f   : > { %v3998_v21 = vadd.f32 %v6359_v0, %v8863_v33 }
 0x220   : > { %v6407_v11 = vpop.f32.mrf.mxu1  ;;  %v3989_v30 = vpop.f32.mrf.mxu0 }
 0x221   : > { %v3990_v7 = vadd.f32 %v3989_v30, %v8846_v9  ;;  %v4155_v46 = vmul.f32 %v3998_v21, %v3998_v21  ;;  %v4649_v20 = vmul.f32 %v6407_v11, %v6407_v11 }
 0x222   : > { %v4483_v24 = vpop.f32.mrf.mxu1  ;;  %v6360_v19 = vpop.f32.mrf.mxu0 }
 0x223   : > { %v4001_v22 = vadd.f32 %v6360_v19, %v8867_v4  ;;  %v4647_v40 = vmul.f32 %v4483_v24, %v4483_v24  ;;  %v4153_v41 = vmul.f32 %v3990_v7, %v3990_v7 }
 0x224   : > { %v6408_v51 = vpop.f32.mrf.mxu1  ;;  %v3992_v10 = vpop.f32.mrf.mxu0 }
 0x225   : > { %v5663_v3 = vpack.c.bf16 %v4001_v22, %v3998_v21  ;;  %v5743_v35 = vpack.c.bf16 %v6408_v51, %v6407_v11  ;;  %v3993_v12 = vadd.f32 %v3992_v10, %v8855_v56  ;;  %v4650_v5 = vmul.f32 %v6408_v51, %v6408_v51 }
 0x226   : > { %v4486_v55 = vpop.f32.mrf.mxu1  ;;  %v6363_v33 = vpop.f32.mrf.mxu0 }
 0x227   : > { %5815 = vst [vmem:[%s8958_s15 + $0x8] sm:$0xff] %v5663_v3   ;;  %5830 = vst [vmem:[%s8961_s11 + $0x8] sm:$0xff] %v5743_v35   ;;  %v4610_v37 = vadd.f32 %v4486_v55, %v4483_v24  ;;  %v4648_v9 = vmul.f32 %v4486_v55, %v4486_v55  ;;  %v5738_v4 = vpack.c.bf16 %v4486_v55, %v4483_v24 }
 0x228   : > { %v4116_v60 = vadd.f32 %v3993_v12, %v3990_v7  ;;  %v4154_v50 = vmul.f32 %v3993_v12, %v3993_v12  ;;  %v5658_v56 = vpack.c.bf16 %v3993_v12, %v3990_v7  ;;  %v6411_v62 = vpop.f32.mrf.mxu1  ;;  %v4005_v43 = vpop.f32.mrf.mxu0  ;;  %v4014_v30 = vadd.f32 %v6363_v33, %v8876_v16 }
 0x229   : > { %v4611_v14 = vadd.f32 %v6407_v11, %v4610_v37  ;;  %v4679_v57 = vadd.f32 %v4648_v9, %v4647_v40  ;;  %5739 = vst [vmem:[%s8961_s11] sm:$0xff] %v5738_v4   ;;  %v4006_v54 = vadd.f32 %v4005_v43, %v8870_v18  ;;  %v3791_v12 = vadd.f32 %v6180_v29, %v8838_v48 }
 0x22a   : > { %v4117_v58 = vadd.f32 %v4116_v60, %v3998_v21  ;;  %v4185_v0 = vadd.f32 %v4154_v50, %v4153_v41  ;;  %5659 = vst [vmem:[%s8958_s15] sm:$0xff] %v5658_v56   ;;  %v4499_v19 = vpop.f32.mrf.mxu1  ;;  %v6364_v24 = vpop.f32.mrf.mxu0  ;;  %v4156_v55 = vmul.f32 %v4001_v22, %v4001_v22  ;;  %v6292_v9 = vadd.f32 %v6291_v8, %v6290_v25 }
 0x22b   : > { %v4680_v10 = vadd.f32 %v4679_v57, %v4649_v20  ;;  %v4612_v3 = vadd.f32 %v6408_v51, %v4611_v14  ;;  %v4651_v35 = vmul.f32 %v4499_v19, %v4499_v19  ;;  %v4017_v7 = vadd.f32 %v6364_v24, %v8879_v23 }
 0x22c   : > { %v4186_v11 = vadd.f32 %v4185_v0, %v4155_v46  ;;  %v4118_v40 = vadd.f32 %v4117_v58, %v4001_v22  ;;  %v6412_v21 = vpop.f32.mrf.mxu1  ;;  %v4008_v37 = vpop.f32.mrf.mxu0  ;;  %v4157_v41 = vmul.f32 %v4006_v54, %v4006_v54  ;;  %v8974_v20 = vadd.f32 %v6289_v13, %v8955_v27 }
 0x22d   : > { %v4613_v16 = vadd.f32 %v4612_v3, %v4499_v19  ;;  %v4681_v33 = vadd.f32 %v4680_v10, %v4650_v5  ;;  %v5673_v18 = vpack.c.bf16 %v4017_v7, %v4014_v30  ;;  %v5753_v51 = vpack.c.bf16 %v6412_v21, %v6411_v62 }
 0x22e   : > { %v4119_v4 = vadd.f32 %v4118_v40, %v4006_v54  ;;  %v4187_v60 = vadd.f32 %v4186_v11, %v4156_v55  ;;  %v4502_v50 = vpop.f32.mrf.mxu1  ;;  %v6367_v56 = vpop.f32.mrf.mxu0  ;;  %v4009_v48 = vadd.f32 %v4008_v37, %v8873_v53  ;;  %v8976_v5 = vadd.f32 %v6292_v9, %v3791_v12 }
 0x22f   : > { %v4682_v23 = vadd.f32 %v4681_v33, %v4651_v35  ;;  %5817 = vst [vmem:[%s8958_s15 + $0x18] sm:$0xff] %v5673_v18   ;;  %v4614_v29 = vadd.f32 %v4613_v16, %v4502_v50  ;;  %v4652_v22 = vmul.f32 %v4502_v50, %v4502_v50  ;;  %5832 = vst [vmem:[%s8961_s11 + $0x18] sm:$0xff] %v5753_v51  }
 0x230   : > { %v4188_v46 = vadd.f32 %v4187_v60, %v4157_v41  ;;  %v5748_v25 = vpack.c.bf16 %v4502_v50, %v4499_v19  ;;  %v6415_v8 = vpop.f32.mrf.mxu1  ;;  %v4021_v43 = vpop.f32.mrf.mxu0  ;;  %v4120_v14 = vadd.f32 %v4119_v4, %v4009_v48  ;;  %v4158_v57 = vmul.f32 %v4009_v48, %v4009_v48 }
 0x231   : > { %v5668_v58 = vpack.c.bf16 %v4009_v48, %v4006_v54  ;;  %v4615_v0 = vadd.f32 %v6411_v62, %v4614_v29  ;;  %v4159_v24 = vmul.f32 %v4014_v30, %v4014_v30  ;;  %v4653_v53 = vmul.f32 %v6411_v62, %v6411_v62 }
 0x232   : > { %v4683_v10 = vadd.f32 %v4682_v23, %v4652_v22  ;;  %5831 = vst [vmem:[%s8961_s11 + $0x10] sm:$0xff] %v5748_v25   ;;  %v4022_v3 = vadd.f32 %v4021_v43, %v8882_v6  ;;  %v4515_v35 = vpop.f32.mrf.mxu1  ;;  %v6368_v19 = vpop.f32.mrf.mxu0  ;;  %v4654_v55 = vmul.f32 %v6412_v21, %v6412_v21  ;;  %v4121_v11 = vadd.f32 %v4120_v14, %v4014_v30 }
 0x233   : > { %v4189_v40 = vadd.f32 %v4188_v46, %v4158_v57  ;;  %5816 = vst [vmem:[%s8958_s15 + $0x10] sm:$0xff] %v5668_v58   ;;  %v4616_v27 = vadd.f32 %v6412_v21, %v4615_v0  ;;  %v4030_v12 = vadd.f32 %v6367_v56, %v8888_v38  ;;  %v4655_v37 = vmul.f32 %v4515_v35, %v4515_v35 }
 0x234   : > { %v4684_v13 = vadd.f32 %v4683_v10, %v4653_v53  ;;  %v4033_v54 = vadd.f32 %v6368_v19, %v8891_v63  ;;  %v6416_v9 = vpop.f32.mrf.mxu1  ;;  %v4024_v16 = vpop.f32.mrf.mxu0  ;;  %v4160_v62 = vmul.f32 %v4017_v7, %v4017_v7  ;;  %v4122_v6 = vadd.f32 %v4121_v11, %v4017_v7 }
 0x235   : > { %v4190_v33 = vadd.f32 %v4189_v40, %v4159_v24  ;;  %v4617_v18 = vadd.f32 %v4616_v27, %v4515_v35  ;;  %v4161_v4 = vmul.f32 %v4022_v3, %v4022_v3  ;;  %v5763_v60 = vpack.c.bf16 %v6416_v9, %v6415_v8 }
 0x236   : > { %v4685_v41 = vadd.f32 %v4684_v13, %v4654_v55  ;;  %v5683_v30 = vpack.c.bf16 %v4033_v54, %v4030_v12  ;;  %v4518_v51 = vpop.f32.mrf.mxu1  ;;  %v6371_v21 = vpop.f32.mrf.mxu0  ;;  %v4123_v50 = vadd.f32 %v4122_v6, %v4022_v3  ;;  %v4025_v38 = vadd.f32 %v4024_v16, %v8885_v49 }
 0x237   : > { %v4191_v23 = vadd.f32 %v4190_v33, %v4160_v62  ;;  %v4618_v56 = vadd.f32 %v4617_v18, %v4518_v51  ;;  %5834 = vst [vmem:[%s8961_s11 + $0x28] sm:$0xff] %v5763_v60   ;;  %v4656_v48 = vmul.f32 %v4518_v51, %v4518_v51  ;;  %v5758_v29 = vpack.c.bf16 %v4518_v51, %v4515_v35 }
 0x238   : > { %v4686_v63 = vadd.f32 %v4685_v41, %v4655_v37  ;;  %5819 = vst [vmem:[%s8958_s15 + $0x28] sm:$0xff] %v5683_v30   ;;  %v4046_v7 = vadd.f32 %v6371_v21, %v8900_v61  ;;  %v6419_v22 = vpop.f32.mrf.mxu1  ;;  %v4037_v46 = vpop.f32.mrf.mxu0  ;;  %v4124_v43 = vadd.f32 %v4123_v50, %v4025_v38  ;;  %v4162_v14 = vmul.f32 %v4025_v38, %v4025_v38 }
 0x239   : > { %v4192_v25 = vadd.f32 %v4191_v23, %v4161_v4  ;;  %v5678_v57 = vpack.c.bf16 %v4025_v38, %v4022_v3  ;;  %v4163_v58 = vmul.f32 %v4030_v12, %v4030_v12  ;;  %v4657_v0 = vmul.f32 %v6415_v8, %v6415_v8  ;;  %5833 = vst [vmem:[%s8961_s11 + $0x20] sm:$0xff] %v5758_v29  }
 0x23a   : > { %v4619_v24 = vadd.f32 %v6415_v8, %v4618_v56  ;;  %v4687_v49 = vadd.f32 %v4686_v63, %v4656_v48  ;;  %v4531_v53 = vpop.f32.mrf.mxu1  ;;  %v6372_v10 = vpop.f32.mrf.mxu0  ;;  %v4658_v19 = vmul.f32 %v6416_v9, %v6416_v9  ;;  %v4125_v55 = vadd.f32 %v4124_v43, %v4030_v12 }
 0x23b   : > { %v4193_v11 = vadd.f32 %v4192_v25, %v4162_v14  ;;  %5818 = vst [vmem:[%s8958_s15 + $0x20] sm:$0xff] %v5678_v57   ;;  %v4038_v61 = vadd.f32 %v4037_v46, %v8894_v1  ;;  %v4659_v27 = vmul.f32 %v4531_v53, %v4531_v53  ;;  %v4049_v13 = vadd.f32 %v6372_v10, %v8903_v31 }
 0x23c   : > { %v4688_v35 = vadd.f32 %v4687_v49, %v4657_v0  ;;  %v4620_v40 = vadd.f32 %v6416_v9, %v4619_v24  ;;  %v6420_v37 = vpop.f32.mrf.mxu1  ;;  %v4040_v3 = vpop.f32.mrf.mxu0  ;;  %v4164_v16 = vmul.f32 %v4033_v54, %v4033_v54  ;;  %v4167_v62 = vmul.f32 %v4046_v7, %v4046_v7 }
 0x23d   : > { %v4194_v8 = vadd.f32 %v4193_v11, %v4163_v58  ;;  %v4126_v33 = vadd.f32 %v4125_v55, %v4033_v54  ;;  %v4165_v6 = vmul.f32 %v4038_v61, %v4038_v61  ;;  %v5693_v12 = vpack.c.bf16 %v4049_v13, %v4046_v7 }
 0x23e   : > { %v4621_v18 = vadd.f32 %v4620_v40, %v4531_v53  ;;  %v4689_v4 = vadd.f32 %v4688_v35, %v4658_v19  ;;  %v4534_v41 = vpop.f32.mrf.mxu1  ;;  %v6375_v30 = vpop.f32.mrf.mxu0  ;;  %v5773_v9 = vpack.c.bf16 %v6420_v37, %v6419_v22  ;;  %v4041_v51 = vadd.f32 %v4040_v3, %v8897_v59 }
 0x23f   : > { %v4127_v1 = vadd.f32 %v4126_v33, %v4038_v61  ;;  %v4195_v60 = vadd.f32 %v4194_v8, %v4164_v16  ;;  %5821 = vst [vmem:[%s8958_s15 + $0x38] sm:$0xff] %v5693_v12   ;;  %v4660_v50 = vmul.f32 %v4534_v41, %v4534_v41  ;;  %v5768_v23 = vpack.c.bf16 %v4534_v41, %v4531_v53 }
 0x240   : > { %v4690_v31 = vadd.f32 %v4689_v4, %v4659_v27  ;;  %v4622_v21 = vadd.f32 %v4621_v18, %v4534_v41  ;;  %v6423_v38 = vpop.f32.mrf.mxu1  ;;  %v4053_v54 = vpop.f32.mrf.mxu0  ;;  %5836 = vst [vmem:[%s8961_s11 + $0x38] sm:$0xff] %v5773_v9   ;;  %v4166_v48 = vmul.f32 %v4041_v51, %v4041_v51  ;;  %v5688_v29 = vpack.c.bf16 %v4041_v51, %v4038_v61 }
 0x241   : > { %v4196_v56 = vadd.f32 %v4195_v60, %v4165_v6  ;;  %v4128_v63 = vadd.f32 %v4127_v1, %v4041_v51  ;;  %v4661_v46 = vmul.f32 %v6419_v22, %v6419_v22  ;;  %v4662_v25 = vmul.f32 %v6420_v37, %v6420_v37  ;;  %5835 = vst [vmem:[%s8961_s11 + $0x30] sm:$0xff] %v5768_v23  }
 0x242   : > { %v4623_v43 = vadd.f32 %v6419_v22, %v4622_v21  ;;  %v4691_v14 = vadd.f32 %v4690_v31, %v4660_v50  ;;  %v4547_v59 = vpop.f32.mrf.mxu1  ;;  %v6376_v57 = vpop.f32.mrf.mxu0  ;;  %5820 = vst [vmem:[%s8958_s15 + $0x30] sm:$0xff] %v5688_v29   ;;  %v4062_v24 = vadd.f32 %v6375_v30, %v8912_v42  ;;  %v4054_v49 = vadd.f32 %v4053_v54, %v8906_v47 }
 0x243   : > { %v4129_v58 = vadd.f32 %v4128_v63, %v4046_v7  ;;  %v4197_v0 = vadd.f32 %v4196_v56, %v4166_v48  ;;  %v4663_v19 = vmul.f32 %v4547_v59, %v4547_v59  ;;  %v4065_v55 = vadd.f32 %v6376_v57, %v8915_v15 }
 0x244   : > { %v4692_v53 = vadd.f32 %v4691_v14, %v4661_v46  ;;  %v4624_v10 = vadd.f32 %v6420_v37, %v4623_v43  ;;  %v6424_v11 = vpop.f32.mrf.mxu1  ;;  %v4056_v61 = vpop.f32.mrf.mxu0  ;;  %v4168_v22 = vmul.f32 %v4049_v13, %v4049_v13  ;;  %v4665_v40 = vmul.f32 %v6423_v38, %v6423_v38 }
 0x245   : > { %v4198_v35 = vadd.f32 %v4197_v0, %v4167_v62  ;;  %v4130_v27 = vadd.f32 %v4129_v58, %v4049_v13  ;;  %v4169_v3 = vmul.f32 %v4054_v49, %v4054_v49  ;;  %v5703_v8 = vpack.c.bf16 %v4065_v55, %v4062_v24 }
 0x246   : > { %v4625_v7 = vadd.f32 %v4624_v10, %v4547_v59  ;;  %v4693_v16 = vadd.f32 %v4692_v53, %v4662_v25  ;;  %v4550_v42 = vpop.f32.mrf.mxu1  ;;  %v6379_v33 = vpop.f32.mrf.mxu0  ;;  %v5783_v37 = vpack.c.bf16 %v6424_v11, %v6423_v38  ;;  %v4057_v18 = vadd.f32 %v4056_v61, %v8909_v2 }
 0x247   : > { %v4131_v47 = vadd.f32 %v4130_v27, %v4054_v49  ;;  %v4199_v6 = vadd.f32 %v4198_v35, %v4168_v22  ;;  %5823 = vst [vmem:[%s8958_s15 + $0x48] sm:$0xff] %v5703_v8   ;;  %v4664_v12 = vmul.f32 %v4550_v42, %v4550_v42  ;;  %v5778_v62 = vpack.c.bf16 %v4550_v42, %v4547_v59 }
 0x248   : > { %v4694_v15 = vadd.f32 %v4693_v16, %v4663_v19  ;;  %v4626_v4 = vadd.f32 %v4625_v7, %v4550_v42  ;;  %v6427_v41 = vpop.f32.mrf.mxu1  ;;  %v4069_v13 = vpop.f32.mrf.mxu0  ;;  %5838 = vst [vmem:[%s8961_s11 + $0x48] sm:$0xff] %v5783_v37   ;;  %v4170_v60 = vmul.f32 %v4057_v18, %v4057_v18  ;;  %v5698_v9 = vpack.c.bf16 %v4057_v18, %v4054_v49 }
 0x249   : > { %v4200_v30 = vadd.f32 %v4199_v6, %v4169_v3  ;;  %v4132_v1 = vadd.f32 %v4131_v47, %v4057_v18  ;;  %v4171_v51 = vmul.f32 %v4062_v24, %v4062_v24  ;;  %v4666_v31 = vmul.f32 %v6424_v11, %v6424_v11  ;;  %5837 = vst [vmem:[%s8961_s11 + $0x40] sm:$0xff] %v5778_v62  }
 0x24a   : > { %v4627_v21 = vadd.f32 %v6423_v38, %v4626_v4  ;;  %v4695_v50 = vadd.f32 %v4694_v15, %v4664_v12  ;;  %v4563_v2 = vpop.f32.mrf.mxu1  ;;  %v6380_v23 = vpop.f32.mrf.mxu0  ;;  %5822 = vst [vmem:[%s8958_s15 + $0x40] sm:$0xff] %v5698_v9   ;;  %v4078_v63 = vadd.f32 %v6379_v33, %v8924_v28  ;;  %v4070_v48 = vadd.f32 %v4069_v13, %v8918_v44 }
 0x24b   : > { %v4133_v54 = vadd.f32 %v4132_v1, %v4062_v24  ;;  %v4201_v56 = vadd.f32 %v4200_v30, %v4170_v60  ;;  %v4667_v25 = vmul.f32 %v4563_v2, %v4563_v2  ;;  %v4081_v43 = vadd.f32 %v6380_v23, %v8927_v17 }
 0x24c   : > { %v4696_v29 = vadd.f32 %v4695_v50, %v4665_v40  ;;  %v4628_v46 = vadd.f32 %v6424_v11, %v4627_v21  ;;  %v6428_v14 = vpop.f32.mrf.mxu1  ;;  %v4072_v59 = vpop.f32.mrf.mxu0  ;;  %v4172_v38 = vmul.f32 %v4065_v55, %v4065_v55  ;;  %v4669_v58 = vmul.f32 %v6427_v41, %v6427_v41 }
 0x24d   : > { %v4202_v57 = vadd.f32 %v4201_v56, %v4171_v51  ;;  %v4134_v0 = vadd.f32 %v4133_v54, %v4065_v55  ;;  %v4173_v49 = vmul.f32 %v4070_v48, %v4070_v48  ;;  %v5713_v10 = vpack.c.bf16 %v4081_v43, %v4078_v63 }
 0x24e   : > { %v4629_v24 = vadd.f32 %v4628_v46, %v4563_v2  ;;  %v4697_v53 = vadd.f32 %v4696_v29, %v4666_v31  ;;  %v4566_v28 = vpop.f32.mrf.mxu1  ;;  %v6383_v19 = vpop.f32.mrf.mxu0  ;;  %v5793_v11 = vpack.c.bf16 %v6428_v14, %v6427_v41  ;;  %v4073_v22 = vadd.f32 %v4072_v59, %v8921_v39 }
 0x24f   : > { %v4135_v44 = vadd.f32 %v4134_v0, %v4070_v48  ;;  %v4203_v61 = vadd.f32 %v4202_v57, %v4172_v38  ;;  %5825 = vst [vmem:[%s8958_s15 + $0x58] sm:$0xff] %v5713_v10   ;;  %v4668_v40 = vmul.f32 %v4566_v28, %v4566_v28  ;;  %v5788_v27 = vpack.c.bf16 %v4566_v28, %v4563_v2 }
 0x250   : > { %v4698_v17 = vadd.f32 %v4697_v53, %v4667_v25  ;;  %v4630_v35 = vadd.f32 %v4629_v24, %v4566_v28  ;;  %v6431_v3 = vpop.f32.mrf.mxu1  ;;  %v4085_v55 = vpop.f32.mrf.mxu0  ;;  %5840 = vst [vmem:[%s8961_s11 + $0x58] sm:$0xff] %v5793_v11   ;;  %v4174_v8 = vmul.f32 %v4073_v22, %v4073_v22  ;;  %v5708_v42 = vpack.c.bf16 %v4073_v22, %v4070_v48 }
 0x251   : > { %v4204_v7 = vadd.f32 %v4203_v61, %v4173_v49  ;;  %v4136_v16 = vadd.f32 %v4135_v44, %v4073_v22  ;;  %v4175_v33 = vmul.f32 %v4078_v63, %v4078_v63  ;;  %v4670_v47 = vmul.f32 %v6428_v14, %v6428_v14  ;;  %5839 = vst [vmem:[%s8961_s11 + $0x50] sm:$0xff] %v5788_v27  }
 0x252   : > { %v4631_v6 = vadd.f32 %v6427_v41, %v4630_v35  ;;  %v4699_v37 = vadd.f32 %v4698_v17, %v4668_v40  ;;  %v4579_v39 = vpop.f32.mrf.mxu1  ;;  %v6384_v18 = vpop.f32.mrf.mxu0  ;;  %5824 = vst [vmem:[%s8958_s15 + $0x50] sm:$0xff] %v5708_v42   ;;  %v4094_v12 = vadd.f32 %v6383_v19, %v8936_v45  ;;  %v4086_v62 = vadd.f32 %v4085_v55, %v8930_v36 }
 0x253   : > { %v4137_v15 = vadd.f32 %v4136_v16, %v4078_v63  ;;  %v4205_v4 = vadd.f32 %v4204_v7, %v4174_v8  ;;  %v4671_v1 = vmul.f32 %v4579_v39, %v4579_v39  ;;  %v4097_v60 = vadd.f32 %v6384_v18, %v8939_v34 }
 0x254   : > { %v4700_v13 = vadd.f32 %v4699_v37, %v4669_v58  ;;  %v4632_v30 = vadd.f32 %v6428_v14, %v4631_v6  ;;  %v6432_v9 = vpop.f32.mrf.mxu1  ;;  %v4088_v51 = vpop.f32.mrf.mxu0  ;;  %v4176_v41 = vmul.f32 %v4081_v43, %v4081_v43  ;;  %v4673_v21 = vmul.f32 %v6431_v3, %v6431_v3 }
 0x255   : > { %v4206_v31 = vadd.f32 %v4205_v4, %v4175_v33  ;;  %v4138_v50 = vadd.f32 %v4137_v15, %v4081_v43  ;;  %v4177_v2 = vmul.f32 %v4086_v62, %v4086_v62  ;;  %v5723_v56 = vpack.c.bf16 %v4097_v60, %v4094_v12 }
 0x256   : > { %v4633_v23 = vadd.f32 %v4632_v30, %v4579_v39  ;;  %v4701_v54 = vadd.f32 %v4700_v13, %v4670_v47  ;;  %v4582_v45 = vpop.f32.mrf.mxu1  ;;  %v6387_v63 = vpop.f32.mrf.mxu0  ;;  %v5803_v29 = vpack.c.bf16 %v6432_v9, %v6431_v3  ;;  %v4089_v46 = vadd.f32 %v4088_v51, %v8933_v32 }
 0x257   : > { %v4139_v36 = vadd.f32 %v4138_v50, %v4086_v62  ;;  %v4207_v48 = vadd.f32 %v4206_v31, %v4176_v41  ;;  %5827 = vst [vmem:[%s8958_s15 + $0x68] sm:$0xff] %v5723_v56   ;;  %v4672_v14 = vmul.f32 %v4582_v45, %v4582_v45  ;;  %v5798_v59 = vpack.c.bf16 %v4582_v45, %v4579_v39 }
 0x258   : > { %v4702_v34 = vadd.f32 %v4701_v54, %v4671_v1  ;;  %v4634_v25 = vadd.f32 %v4633_v23, %v4582_v45  ;;  %v6435_v38 = vpop.f32.mrf.mxu1  ;;  %v4101_v43 = vpop.f32.mrf.mxu0  ;;  %5842 = vst [vmem:[%s8961_s11 + $0x68] sm:$0xff] %v5803_v29   ;;  %v4178_v0 = vmul.f32 %v4089_v46, %v4089_v46  ;;  %v5718_v49 = vpack.c.bf16 %v4089_v46, %v4086_v62 }
 0x259   : > { %v4208_v57 = vadd.f32 %v4207_v48, %v4177_v2  ;;  %v4140_v58 = vadd.f32 %v4139_v36, %v4089_v46  ;;  %v4179_v24 = vmul.f32 %v4094_v12, %v4094_v12  ;;  %v4674_v53 = vmul.f32 %v6432_v9, %v6432_v9  ;;  %5841 = vst [vmem:[%s8961_s11 + $0x60] sm:$0xff] %v5798_v59  }
 0x25a   : > { %v4635_v10 = vadd.f32 %v6431_v3, %v4634_v25  ;;  %v4703_v28 = vadd.f32 %v4702_v34, %v4672_v14  ;;  %v4595_v32 = vpop.f32.mrf.mxu1  ;;  %v6388_v19 = vpop.f32.mrf.mxu0  ;;  %5826 = vst [vmem:[%s8958_s15 + $0x60] sm:$0xff] %v5718_v49   ;;  %v4110_v11 = vadd.f32 %v6387_v63, %v8974_v20  ;;  %v4102_v22 = vadd.f32 %v4101_v43, %v8943_v52 }
 0x25b   : > { %v4141_v44 = vadd.f32 %v4140_v58, %v4094_v12  ;;  %v4209_v61 = vadd.f32 %v4208_v57, %v4178_v0  ;;  %v4675_v40 = vmul.f32 %v4595_v32, %v4595_v32  ;;  %v9023_v27 = vadd.f32 %v6388_v19, %v8976_v5 }
 0x25c   : > { %v4704_v17 = vadd.f32 %v4703_v28, %v4673_v21  ;;  %v4636_v35 = vadd.f32 %v6432_v9, %v4635_v10  ;;  %v6436_v3 = vpop.f32.mrf.mxu1  ;;  %v4104_v55 = vpop.f32.mrf.mxu0  ;;  %v4180_v7 = vmul.f32 %v4097_v60, %v4097_v60  ;;  %v4181_v42 = vmul.f32 %v4102_v22, %v4102_v22 }
 0x25d   : > { %v4210_v16 = vadd.f32 %v4209_v61, %v4179_v24  ;;  %v4142_v8 = vadd.f32 %v4141_v44, %v4097_v60  ;;  %v5733_v52 = vpack.c.bf16 %v9023_v27, %v4110_v11  ;;  %v5813_v5 = vpack.c.bf16 %v6436_v3, %v6435_v38 }
 0x25e   : > { %v4637_v33 = vadd.f32 %v4636_v35, %v4595_v32  ;;  %v4705_v20 = vadd.f32 %v4704_v17, %v4674_v53  ;;  %v4598_v47 = vpop.f32.mrf.mxu1  ;;  %v4105_v39 = vadd.f32 %v4104_v55, %v8945_v26  ;;  %v4677_v26 = vmul.f32 %v6435_v38, %v6435_v38 }
 0x25f   : > { %v4143_v6 = vadd.f32 %v4142_v8, %v4102_v22  ;;  %v4211_v37 = vadd.f32 %v4210_v16, %v4180_v7  ;;  %5829 = vst [vmem:[%s8958_s15 + $0x78] sm:$0xff] %v5733_v52   ;;  %v4676_v4 = vmul.f32 %v4598_v47, %v4598_v47  ;;  %v5808_v12 = vpack.c.bf16 %v4598_v47, %v4595_v32 }
 0x260   : > { %v4706_v18 = vadd.f32 %v4705_v20, %v4675_v40  ;;  %v4638_v15 = vadd.f32 %v4637_v33, %v4598_v47  ;;  %5844 = vst [vmem:[%s8961_s11 + $0x78] sm:$0xff] %v5813_v5   ;;  %v4182_v30 = vmul.f32 %v4105_v39, %v4105_v39  ;;  %v5728_v1 = vpack.c.bf16 %v4105_v39, %v4102_v22 }
 0x261   : > { %v4212_v62 = vadd.f32 %v4211_v37, %v4181_v42  ;;  %v4144_v13 = vadd.f32 %v4143_v6, %v4105_v39  ;;  %5843 = vst [vmem:[%s8961_s11 + $0x70] sm:$0xff] %v5808_v12   ;;  %v4183_v51 = vmul.f32 %v4110_v11, %v4110_v11  ;;  %v4678_v21 = vmul.f32 %v6436_v3, %v6436_v3 }
 0x262   : > { %v4639_v60 = vadd.f32 %v6435_v38, %v4638_v15  ;;  %v4707_v9 = vadd.f32 %v4706_v18, %v4676_v4  ;;  %5828 = vst [vmem:[%s8958_s15 + $0x70] sm:$0xff] %v5728_v1  }
 0x263   : > { %v4145_v41 = vadd.f32 %v4144_v13, %v4110_v11  ;;  %v4213_v31 = vadd.f32 %v4212_v62, %v4182_v30 }
 0x264   : > { %v4640_v50 = vadd.f32 %v6436_v3, %v4639_v60  ;;  %v4708_v2 = vadd.f32 %v4707_v9, %v4677_v26 }
 0x265   : > { %6669 = shalt.err (!%p6666_p3)
}
 0x266   : > { %s6670_s14 = scalar_lea.hbm %s9035_s29, 2048  ;;  %s6674_s28 = scalar_lea.hbm %s9190_s3, 4096 }
 0x267   : > { %p6671_p4 = scmp.ne.s32.totalorder %s9035_s29, %s6670_s14  ;;  %p6675_p9 = scmp.lt.s32.totalorder %s9035_s29, %s9190_s3 }
 0x268   : > { %p6676_p10 = scmp.lt.s32.totalorder %s6674_s28, %s6670_s14 }
 0x269   : > { %p6672_p7 = pnand %p6671_p4, %p6885_p5 }
 0x26a   : > { %p6677_p11 = por %p6676_p10, %p6675_p9 }
 0x26b   : > { %p6673_p8 = pneg %p6672_p7 }
 0x26d   : > { %p6678_p12 = pnand %p6677_p11, %p6673_p8 }
 0x26f   : > { %6681 = shalt.err (!%p6678_p12)
}
 0x270   : > { %s9213_s9 = smov 64   ;;  %s9214_s12 = smov 4   ;;  %v4184_v23 = vmul.f32 %v9023_v27, %v9023_v27  ;;  %v4146_v54 = vadd.f32 %v4145_v41, %v9023_v27  ;;  %v4214_v56 = vadd.f32 %v4213_v31, %v4183_v51  ;;  %v4641_v45 = vrot.slane %v4640_v50, 4 }
 0x271   : > { %6438 = dma.vmem_to_hbm [thread:$0]  (%p6885_p5), %s9038_s18, 2048, %s9035_s29, %s4879_s20, %s9213_s9, %s9213_s9, %s9214_s12   ;;  %v4709_v63 = vadd.f32 %v4708_v2, %v4678_v21  ;;  %vm4222_vm6 = vcmask 1040384  }
 0x272   : > { %v4147_v36 = vrot.slane %v4146_v54, 4  ;;  %v4215_v48 = vadd.f32 %v4214_v56, %v4184_v23  ;;  %v4642_v29 = vadd.f32 %v4641_v45, %v4640_v50  ;;  %s5109_s26 = sshll.u32 %s8948_s17, 1  ;;  %s5583_s29 = sshll.u32 %s6866_s25, 5 }
 0x273   : > { %v4710_v46 = vrot.slane %v4709_v63, 4  ;;  %s272_s20 = scalar_lea.vmem [#allocation7], %s5109_s26  ;;  %s258_s14 = scalar_lea.vmem [#allocation4], %s5109_s26 }
 0x274   : > { %v4148_v34 = vadd.f32 %v4147_v36, %v4146_v54  ;;  %v4216_v25 = vrot.slane %v4215_v48, 4  ;;  %v4643_v14 = vrot.slane %v4642_v29, 2  ;;  %s4952_s13 = sshll.u32 %s272_s20, 4  ;;  %s4923_s15 = sshll.u32 %s258_s14, 4  ;;  %s9080_s13 = int_to_ptr.vmem [resolvable:$true] %s4952_s13  ;;  %s9087_s15 = int_to_ptr.vmem [resolvable:$true] %s4923_s15 }
 0x275   : > { %v4711_v59 = vadd.f32 %v4710_v46, %v4709_v63  ;;  %s4936_s19 = sshll.u32 %s8961_s11, 4  ;;  %s9078_s9 = scalar_lea.hbm %s9193_s6, %s5583_s29  ;;  %s9096_s19 = int_to_ptr.vmem [resolvable:$true] %s4936_s19 }
 0x276   : > { %v4149_v38 = vrot.slane %v4148_v34, 2  ;;  %v4217_v43 = vadd.f32 %v4216_v25, %v4215_v48  ;;  %v4644_v57 = vadd.f32 %v4643_v14, %v4642_v29  ;;  %s9085_s26 = scalar_lea.hbm %s9191_s4, %s5583_s29  ;;  %s9094_s28 = scalar_lea.hbm %s9192_s5, %s5653_s16 }
 0x277   : > { %v4712_v58 = vrot.slane %v4711_v59, 2  ;;  %s4894_s12 = scalar_lea.sflag [#allocation8], %s8948_s17  ;;  %s6682_s18 = scalar_lea.vmem %s9080_s13, 32 }
 0x278   : > { %v4150_v0 = vadd.f32 %v4149_v38, %v4148_v34  ;;  %v4218_v49 = vrot.slane %v4217_v43, 2  ;;  %v4645_v24 = vrot.slane %v4644_v57, 1  ;;  %p6683_p13 = scmp.ne.s32.totalorder %s9080_s13, %s6682_s18  ;;  %s6807_s29 = smov [#allocation7]  }
 0x279   : > { %v4713_v53 = vadd.f32 %v4712_v58, %v4711_v59  ;;  %s6686_s10 = sshll.u32 %s6807_s29, 4  ;;  %s6687_s10 = int_to_ptr.vmem [resolvable:$false] %s6686_s10 }
 0x27a   : > { %v4151_v10 = vrot.slane %v4150_v0, 1  ;;  %v4219_v28 = vadd.f32 %v4218_v49, %v4217_v43  ;;  %v4646_v44 = vadd.f32 %v4645_v24, %v4644_v57  ;;  %p6684_p0 = pnand %p6683_p13, %p6885_p5  ;;  %s6688_s1 = scalar_lea.vmem %s6687_s10, 64 }
 0x27b   : > { %v4714_v32 = vrot.slane %v4713_v53, 1  ;;  %p6689_p2 = scmp.lt.s32.totalorder %s9080_s13, %s6687_s10  ;;  %p6690_p3 = scmp.lt.s32.totalorder %s6688_s1, %s6682_s18 }
 0x27c   : > { %v4220_v19 = vrot.slane %v4219_v28, 1  ;;  %v4152_v11 = vadd.f32 %v4151_v10, %v4150_v0  ;;  %p6685_p1 = pneg %p6684_p0 }
 0x27d   : > { %v4715_v61 = vadd.f32 %v4714_v32, %v4713_v53  ;;  %p6691_p4 = por %p6690_p3, %p6689_p2 }
 0x27e   : > { %v4221_v22 = vadd.f32 %v4220_v19, %v4219_v28 }
 0x27f   : > { %v4716_v17 = vsel %vm4222_vm6, %v4646_v44, %v4715_v61  ;;  %p6692_p7 = pnand %p6691_p4, %p6685_p1 }
 0x280   : > { %v4223_v35 = vsel %vm4222_vm6, %v4152_v11, %v4221_v22  ;;  %4717 = vst [vmem:[%s272_s20] sm:$0x3] %v4716_v17 }
 0x281   : > { %4224 = vst [vmem:[%s258_s14] sm:$0x3] %v4223_v35 }
 0x282   : > { %6695 = shalt.err (!%p6692_p7)
}
 0x283   : > { %s6696_s0 = scalar_lea.hbm %s9078_s9, 32  ;;  %s6700_s20 = scalar_lea.hbm %s9193_s6, 64 }
 0x284   : > { %p6697_p8 = scmp.ne.s32.totalorder %s9078_s9, %s6696_s0  ;;  %p6701_p11 = scmp.lt.s32.totalorder %s9078_s9, %s9193_s6 }
 0x285   : > { %p6702_p12 = scmp.lt.s32.totalorder %s6700_s20, %s6696_s0 }
 0x286   : > { %p6698_p9 = pnand %p6697_p8, %p6885_p5 }
 0x287   : > { %p6703_p13 = por %p6702_p12, %p6701_p11 }
 0x288   : > { %p6699_p10 = pneg %p6698_p9 }
 0x28a   : > { %p6704_p0 = pnand %p6703_p13, %p6699_p10 }
 0x28c   : > { %6707 = shalt.err (!%p6704_p0)
}
 0x28d   : > { %6441 = dma.vmem_to_hbm [thread:$0]  (%p6885_p5), %s9080_s13, 32, %s9078_s9, %s4894_s12  }
 0x28e   : > { %s9321_s1 = sand.u32 1, %s6866_s25   ;;  %s6708_s29 = scalar_lea.vmem %s9087_s15, 32 }
 0x28f   : > { %s9121_s18 = scalar_lea.sflag [#allocation5], %s9321_s1  ;;  %p6709_p1 = scmp.ne.s32.totalorder %s9087_s15, %s6708_s29 }
 0x290   : > { %s6808_s10 = smov [#allocation4]  }
 0x291   : > { %p6710_p2 = pnand %p6709_p1, %p6885_p5  ;;  %s6712_s0 = sshll.u32 %s6808_s10, 4  ;;  %s6713_s0 = int_to_ptr.vmem [resolvable:$false] %s6712_s0 }
 0x292   : > { %s6714_s17 = scalar_lea.vmem %s6713_s0, 64  ;;  %p6715_p4 = scmp.lt.s32.totalorder %s9087_s15, %s6713_s0 }
 0x293   : > { %p6711_p3 = pneg %p6710_p2  ;;  %p6716_p7 = scmp.lt.s32.totalorder %s6714_s17, %s6708_s29 }
 0x295   : > { %p6717_p8 = por %p6716_p7, %p6715_p4 }
 0x297   : > { %p6718_p9 = pnand %p6717_p8, %p6711_p3 }
 0x299   : > { %6721 = shalt.err (!%p6718_p9)
}
 0x29a   : > { %s6722_s25 = scalar_lea.hbm %s9085_s26, 32  ;;  %s6726_s12 = scalar_lea.hbm %s9191_s4, 64 }
 0x29b   : > { %p6723_p10 = scmp.ne.s32.totalorder %s9085_s26, %s6722_s25  ;;  %p6727_p13 = scmp.lt.s32.totalorder %s9085_s26, %s9191_s4 }
 0x29c   : > { %p6728_p0 = scmp.lt.s32.totalorder %s6726_s12, %s6722_s25 }
 0x29d   : > { %p6724_p11 = pnand %p6723_p10, %p6885_p5 }
 0x29e   : > { %p6729_p1 = por %p6728_p0, %p6727_p13 }
 0x29f   : > { %p6725_p12 = pneg %p6724_p11 }
 0x2a1   : > { %p6730_p2 = pnand %p6729_p1, %p6725_p12 }
 0x2a3   : > { %6733 = shalt.err (!%p6730_p2)
}
 0x2a4   : > { %6439 = dma.vmem_to_hbm [thread:$0]  (%p6885_p5), %s9087_s15, 32, %s9085_s26, %s9121_s18  }
 0x2a5   : > { %s6734_s14 = scalar_lea.vmem %s9096_s19, 2048  ;;  %s6809_s11 = smov [#allocation6]  }
 0x2a6   : > { %p6735_p3 = scmp.ne.s32.totalorder %s9096_s19, %s6734_s14  ;;  %s6738_s1 = sshll.u32 %s6809_s11, 4  ;;  %s6739_s1 = int_to_ptr.vmem [resolvable:$false] %s6738_s1 }
 0x2a7   : > { %s6740_s29 = scalar_lea.vmem %s6739_s1, 4096  ;;  %p6741_p8 = scmp.lt.s32.totalorder %s9096_s19, %s6739_s1 }
 0x2a8   : > { %p6736_p4 = pnand %p6735_p3, %p6885_p5  ;;  %p6742_p9 = scmp.lt.s32.totalorder %s6740_s29, %s6734_s14 }
 0x2aa   : > { %p6737_p7 = pneg %p6736_p4  ;;  %p6743_p10 = por %p6742_p9, %p6741_p8 }
 0x2ac   : > { %p6744_p11 = pnand %p6743_p10, %p6737_p7 }
 0x2ae   : > { %6747 = shalt.err (!%p6744_p11)
}
 0x2af   : > { %s6748_s10 = scalar_lea.hbm %s9094_s28, 2048  ;;  %s6752_s0 = scalar_lea.hbm %s9192_s5, 4096 }
 0x2b0   : > { %p6749_p12 = scmp.ne.s32.totalorder %s9094_s28, %s6748_s10  ;;  %p6753_p1 = scmp.lt.s32.totalorder %s9094_s28, %s9192_s5 }
 0x2b1   : > { %p6754_p2 = scmp.lt.s32.totalorder %s6752_s0, %s6748_s10 }
 0x2b2   : > { %p6750_p13 = pnand %p6749_p12, %p6885_p5 }
 0x2b3   : > { %p6755_p3 = por %p6754_p2, %p6753_p1 }
 0x2b4   : > { %p6751_p0 = pneg %p6750_p13 }
 0x2b6   : > { %p6756_p4 = pnand %p6755_p3, %p6751_p0 }
 0x2b8   : > { %6759 = shalt.err (!%p6756_p4)
}
 0x2b9   : > { %s9322_s9 = smov 4   ;;  %s9323_s13 = smov 64  }
 0x2ba   : > { %6440 = dma.vmem_to_hbm [thread:$0]  (%p6885_p5), %s9096_s19, 2048, %s9094_s28, %s9121_s18, %s9323_s13, %s9323_s13, %s9322_s9  }
 0x2bb PF: > { %p6459_p7 = scmp.ge.s32.totalorder %s6802_s24, 2  ;;  %s4964_s12 = sand.u32 1, %s6790_s21  }
 0x2bc   : > { %s4965_s16 = scalar_lea.sflag [#allocation3], %s4964_s12 }
 0x2bd   : > { %p6447_p8 = pnand %p6459_p7, %p6889_p6 }
 0x2bf   : > { %p6448_p9 = pneg %p6447_p8 }
 0x2c1   : > { %6777 = dma.done.wait (%p6448_p9), %s4965_s16, 2048  }
 0x2c2   : > { %6779 = vsyncadd (%p6448_p9), %s4965_s16, 4294965248  ;;  %s9324_s7 = sadd.s32 4294967294, %s6802_s24  }
 0x2c3   : > { %s4973_s20 = sand.u32 1, %s9324_s7  }
 0x2c4   : > { %s4974_s14 = scalar_lea.sflag [#allocation5], %s4973_s20 }
 0x2c5   : > { %6781 = dma.done.wait (%p6448_p9), %s4974_s14, 2080  }
 0x2c6   : > { %6783 = vsyncadd (%p6448_p9), %s4974_s14, 4294965216  ;;  %s4992_s11 = scalar_lea.sflag [#allocation8], %s4964_s12 }
 0x2c7   : > { %6785 = dma.done.wait (%p6448_p9), %s4992_s11, 32  }
 0x2c8   : > { %6787 = vsyncadd (%p6448_p9), %s4992_s11, 4294967264  ;;  %p23_p5 = scmp.ge.s32.totalorder %s6870_s27, 4   ;;  %s9325_s21 = smov %s6794_s22 }
 0x2c9   : > { %s9326_s22 = smov %s6798_s23  ;;  %s9327_s23 = smov %s6883_s30 }
 0x2ca   : > { %s9328_s24 = smov %s6870_s27  ;;  %25 = sbr.rel (!%p23_p5) target bundleno = 10 (0xa), region = 118 }
 0x2cf   :  { %4997 = vsyncpa [#allocation3], 1 }
 0x2d0   :  { %4999 = vsyncpa [#allocation3 + $0x1], 1 }
 0x2d1   :  { %5000 = vsyncpa [#allocation5], 1 }
 0x2d2   :  { %5002 = vsyncpa [#allocation5 + $0x1], 1 }
 0x2d3   :  { %5003 = vsyncpa [#allocation8], 1 }
 0x2d4   :  { %5005 = vsyncpa [#allocation8 + $0x1], 1 }

</bundles_post_ra>
